<compile_context>
chip_gen: v7x
topology: tpu7x:2x2x1
jax: 0.10.0
libtpu: 0.0.40
codegen_flags: <defaults>
</compile_context>

<pallas_src>
import functools
import math

import jax
import jax.numpy as jnp
from jax.experimental import pallas as pl
from jax.experimental.pallas import tpu as pltpu

BN_EPS = 1e-5


def _same_pad_1d(k):
    # Conv2dSamePadding convention: (left, right) = (k//2 + (k - 2*(k//2)) - 1, k//2)
    # k=50 -> (24, 25); k=8 -> (3, 4).  Matches the ZeroPad2d in the reference.
    return (k // 2 + (k - 2 * (k // 2)) - 1, k // 2)


# ----------------------------- Pallas kernels ------------------------------

def _conv1_pool_kernel(xb_ref, w_ref, b_ref, o_ref, *, L1, pool):
    # xb_ref: (1, L1 + nblk - 1, s1p) f32 stride-blocked, zero-padded raw EEG
    # w_ref : (nblk, s1p, C)          bf16 conv taps grouped by stride block
    #                                      (BN scale already folded in)
    # b_ref : (1, C)                  f32  folded BN bias
    # o_ref : (1, Lp1 + 16, C)        f32  pooled output, data at rows [8, 8+Lp1)
    #                                      (8-row zero halo = same-pad for conv2)
    C = o_ref.shape[-1]
    nblk = w_ref.shape[0]
    acc = jnp.zeros((L1, C), jnp.float32)
    for blk in range(nblk):                       # shifted tap-block matmuls
        xs = xb_ref[0, pl.ds(blk, L1), :].astype(jnp.bfloat16)
        acc = acc + jnp.dot(xs, w_ref[blk], preferred_element_type=jnp.float32)
    y = jnp.maximum(acc + b_ref[...], 0.0)        # BN bias + ReLU (f32)
    Lp = L1 // pool
    yp = jnp.max(y[: Lp * pool].reshape(Lp, pool, C), axis=1)   # fused MaxPool
    o_ref[...] = jnp.zeros_like(o_ref)            # zero halo for conv2 same-pad
    o_ref[0, pl.ds(8, Lp), :] = yp                # aligned (multiple-of-8) store


def _conv_chain_kernel(x_ref, w2_ref, b2_ref, w3_ref, b3_ref, w4_ref, b4_ref,
                       o_ref, buf_ref, *, L, k, pool):
    # x_ref : (1, L + 16, C) f32  conv1/pool1 output with 8-row zero halo
    # w*_ref: (k, C, C)      bf16 tap-major conv weights (BN scale folded in)
    # b*_ref: (1, C)         f32  folded BN bias
    # o_ref : (1, L//pool, C) f32 pooled conv4 output
    # buf_ref: VMEM (L + 16, C) f32 scratch holding the re-padded activation
    C = o_ref.shape[-1]
    left = _same_pad_1d(k)[0]
    off = 8 - left                                # first tap offset in the halo

    def conv_relu(load_tap, w_ref, b_ref):
        acc = jnp.zeros((L, C), jnp.float32)
        for t in range(k):                        # shifted tap matmuls (MXU)
            acc = acc + jnp.dot(load_tap(t).astype(jnp.bfloat16), w_ref[t],
                                preferred_element_type=jnp.float32)
        return jnp.maximum(acc + b_ref[...], 0.0)

    # conv2 reads the halo-padded input directly.
    y = conv_relu(lambda t: x_ref[0, pl.ds(off + t, L), :], w2_ref, b2_ref)
    buf_ref[...] = jnp.zeros_like(buf_ref)        # zero halo once
    buf_ref[pl.ds(8, L), :] = y                   # aligned store
    y = conv_relu(lambda t: buf_ref[pl.ds(off + t, L), :], w3_ref, b3_ref)
    buf_ref[pl.ds(8, L), :] = y
    y = conv_relu(lambda t: buf_ref[pl.ds(off + t, L), :], w4_ref, b4_ref)
    Lp = L // pool
    o_ref[0] = jnp.max(y[: Lp * pool].reshape(Lp, pool, C), axis=1)  # MaxPool(4)


def _linear_kernel(x_ref, w_ref, b_ref, o_ref):
    # Lane-dense classifier: Nout is padded to a multiple of 128, rows to 8.
    y = jnp.dot(x_ref[...].astype(jnp.bfloat16), w_ref[...],
                preferred_element_type=jnp.float32)
    o_ref[...] = y + b_ref[...]


# ------------------------------ pallas wrappers -----------------------------

_PARALLEL = pltpu.CompilerParams(dimension_semantics=("parallel",))


def conv1_pool(xb, w_blk, bias, *, L1, pool):
    N, rows_in, s1p = xb.shape
    nblk, _, C = w_blk.shape
    Lp = L1 // pool
    out_rows = Lp + 16
    kernel = functools.partial(_conv1_pool_kernel, L1=L1, pool=pool)
    return pl.pallas_call(
        kernel,
        out_shape=jax.ShapeDtypeStruct((N, out_rows, C), jnp.float32),
        grid=(N,),
        in_specs=[
            pl.BlockSpec((1, rows_in, s1p), lambda n: (n, 0, 0)),
            pl.BlockSpec((nblk, s1p, C), lambda n: (0, 0, 0)),   # resident
            pl.BlockSpec((1, C), lambda n: (0, 0)),              # resident
        ],
        out_specs=pl.BlockSpec((1, out_rows, C), lambda n: (n, 0, 0)),
        compiler_params=_PARALLEL,
    )(xb, w_blk, bias.reshape(1, C))


def conv_chain_pool(y1, w2, b2, w3, b3, w4, b4, *, k, pool):
    N, rows, C = y1.shape
    L = rows - 16
    Lp = L // pool
    kernel = functools.partial(_conv_chain_kernel, L=L, k=k, pool=pool)
    wspec = pl.BlockSpec((k, C, C), lambda n: (0, 0, 0))         # resident
    bspec = pl.BlockSpec((1, C), lambda n: (0, 0))               # resident
    return pl.pallas_call(
        kernel,
        out_shape=jax.ShapeDtypeStruct((N, Lp, C), jnp.float32),
        grid=(N,),
        in_specs=[pl.BlockSpec((1, rows, C), lambda n: (n, 0, 0)),
                  wspec, bspec, wspec, bspec, wspec, bspec],
        out_specs=pl.BlockSpec((1, Lp, C), lambda n: (n, 0, 0)),
        scratch_shapes=[pltpu.VMEM((rows, C), jnp.float32)],
        compiler_params=_PARALLEL,
    )(y1, w2, b2.reshape(1, C), w3, b3.reshape(1, C), w4, b4.reshape(1, C))


def linear_lane_dense(x, w, b, *, tm=512):
    # x: (M, K) f32, w: (K, Nout) bf16 with Nout % 128 == 0, b: (Nout,) f32.
    M, K = x.shape
    Kw, Nout = w.shape
    assert K == Kw and Nout % 128 == 0 and K % 128 == 0
    Mp = max(8, ((M + 7) // 8) * 8)
    if Mp <= tm:
        tm = Mp
    else:
        Mp = ((Mp + tm - 1) // tm) * tm
    if Mp != M:
        x = jnp.pad(x, ((0, Mp - M), (0, 0)))
    out = pl.pallas_call(
        _linear_kernel,
        out_shape=jax.ShapeDtypeStruct((Mp, Nout), jnp.float32),
        grid=(Mp // tm,),
        in_specs=[
            pl.BlockSpec((tm, K), lambda i: (i, 0)),
            pl.BlockSpec((K, Nout), lambda i: (0, 0)),           # resident
            pl.BlockSpec((1, Nout), lambda i: (0, 0)),           # resident
        ],
        out_specs=pl.BlockSpec((tm, Nout), lambda i: (i, 0)),
        compiler_params=_PARALLEL,
    )(x, w, b.reshape(1, Nout))
    return out[:M]


# ------------------------------ model params -------------------------------

def init_tinysleepnet_params(key, n_classes, n_timepoints, dropout=0.5,
                             n_filters_1=128, filter_size_1=50,
                             filter_stride_1=6, pool_size_1=8, pool_stride_1=8,
                             n_filters_1x3=128, filter_size_1x3=8,
                             pool_size_2=4, pool_stride_2=4):
    del dropout  # identity in eval mode
    assert pool_size_1 == pool_stride_1 and pool_size_2 == pool_stride_2, \
        "fused pooling assumes pool size == stride (TinySleepNet defaults)"
    C1, C2 = n_filters_1, n_filters_1x3
    k1, s1, k2 = filter_size_1, filter_stride_1, filter_size_1x3

    left1, right1 = _same_pad_1d(k1)
    assert left1 % s1 == 0, "stride-blocked conv1 needs left pad % stride == 0"
    L1 = (n_timepoints + left1 + right1 - k1) // s1 + 1
    Lp1 = L1 // pool_stride_1
    Lp2 = Lp1 // pool_stride_2
    feature_dim = Lp2 * C2
    # Must agree with the PyTorch classifier sizing formula.
    assert feature_dim == (n_timepoints // s1 // pool_stride_1
                           // pool_stride_2) * C2
    left2, right2 = _same_pad_1d(k2)
    assert left2 <= 8 and right2 <= 8, "conv2-4 halo assumes kernel <= 16"

    nblk = -(-k1 // s1)                       # ceil(k1 / stride) tap blocks
    s1p = ((s1 + 7) // 8) * 8                 # pad stride-phase axis to 8

    cfg = dict(n_classes=n_classes, n_timepoints=n_timepoints,
               n_filters_1=C1, filter_size_1=k1, filter_stride_1=s1,
               pool_stride_1=pool_stride_1, n_filters_1x3=C2,
               filter_size_1x3=k2, pool_stride_2=pool_stride_2,
               L1=L1, Lp1=Lp1, Lp2=Lp2, nblk1=nblk, s1p=s1p,
               left1=left1, feature_dim=feature_dim)

    def fold_bn(gamma, beta, mean, var):
        # Eval-mode BatchNorm -> per-channel (scale, bias); accepts real
        # running stats if pretrained weights are ever loaded.
        scale = gamma / jnp.sqrt(var + BN_EPS)
        return scale, beta - mean * scale

    def kaiming_fan_out(k, shape, fan_out):
        return jax.random.normal(k, shape, jnp.float32) * math.sqrt(2.0 / fan_out)

    ks = jax.random.split(key, 6)
    params = {}

    # conv1: PyTorch weight (C1, 1, k1, 1) -> tap-major (k1, C1), BN folded,
    # taps zero-padded to nblk*s1 and regrouped into stride blocks.
    bn1_scale, bn1_bias = fold_bn(jnp.ones((C1,)), jnp.zeros((C1,)),
                                  jnp.zeros((C1,)), jnp.ones((C1,)))
    w1 = kaiming_fan_out(ks[0], (k1, C1), C1 * k1) * bn1_scale[None, :]
    w1 = jnp.pad(w1, ((0, nblk * s1 - k1), (0, 0)))
    w1 = w1.reshape(nblk, s1, C1)
    w1 = jnp.pad(w1, ((0, 0), (0, s1p - s1), (0, 0)))
    params["w1"] = w1.astype(jnp.bfloat16)
    params["b1"] = bn1_bias

    # conv2-4: PyTorch weight (C2, Cin, k2, 1) -> tap-major (k2, Cin, C2).
    cin = C1
    for i, kk in zip((2, 3, 4), ks[1:4]):
        sc, bi = fold_bn(jnp.ones((C2,)), jnp.zeros((C2,)),
                         jnp.zeros((C2,)), jnp.ones((C2,)))
        w = kaiming_fan_out(kk, (k2, cin, C2), C2 * k2) * sc[None, None, :]
        params[f"w{i}"] = w.astype(jnp.bfloat16)
        params[f"b{i}"] = bi
        cin = C2

    # Classifier: PyTorch flattens (N, C, H, 1) channel-major; we keep the
    # activations location-major (H, C), so permute the weight rows instead of
    # transposing activations at runtime.  Output columns padded to 128 lanes.
    NOUT = ((n_classes + 127) // 128) * 128
    bound = 1.0 / math.sqrt(feature_dim)
    w_fc_cmajor = jax.random.uniform(ks[4], (feature_dim, n_classes),
                                     jnp.float32, -bound, bound)
    w_fc = w_fc_cmajor.reshape(C2, Lp2, n_classes).transpose(1, 0, 2)
    w_fc = w_fc.reshape(feature_dim, n_classes)
    params["w_fc"] = jnp.pad(
        w_fc, ((0, 0), (0, NOUT - n_classes))).astype(jnp.bfloat16)
    b_fc = jax.random.uniform(ks[5], (n_classes,), jnp.float32, -bound, bound)
    params["b_fc"] = jnp.pad(b_fc, (0, NOUT - n_classes))
    cfg["n_out_padded"] = NOUT
    return params, cfg


# ------------------------------ forward pass -------------------------------

def tinysleepnet_forward(params, cfg, x_nchw):
    """x_nchw: (N, 1, n_timepoints, 1), eval-mode forward."""
    N = x_nchw.shape[0]
    T, s1 = cfg["n_timepoints"], cfg["filter_stride_1"]
    L1, nblk, s1p = cfg["L1"], cfg["nblk1"], cfg["s1p"]
    x = x_nchw[:, 0, :, 0]                                   # (N, T) f32

    # Stride-blocked same-pad layout for conv1: cheap pad + reshape on host
    # (no im2col; the 8.3x patch expansion is gone).
    total = (L1 + nblk - 1) * s1
    xpad = jnp.pad(x, ((0, 0), (cfg["left1"], total - T - cfg["left1"])))
    xb = xpad.reshape(N, total // s1, s1)
    xb = jnp.pad(xb, ((0, 0), (0, 0), (0, s1p - s1)))

    # conv1 + BN + ReLU + MaxPool(8); output carries an 8-row zero halo so
    # conv2's same-padding needs no extra pass.  Dropout == identity (eval).
    y1 = conv1_pool(xb, params["w1"], params["b1"],
                    L1=L1, pool=cfg["pool_stride_1"])

    # conv2 -> conv3 -> conv4 (+BN+ReLU each) + MaxPool(4), all in VMEM.
    y4 = conv_chain_pool(y1, params["w2"], params["b2"], params["w3"],
                         params["b3"], params["w4"], params["b4"],
                         k=cfg["filter_size_1x3"], pool=cfg["pool_stride_2"])

    # Flatten location-major (classifier rows were permuted at init to match
    # PyTorch's channel-major x.view(N, -1)); lane-dense classifier.
    feat = y4.reshape(N, cfg["feature_dim"])
    logits = linear_lane_dense(feat, params["w_fc"], params["b_fc"])
    return logits[:, : cfg["n_classes"]]


# ---------------------------------- main -----------------------------------

if __name__ == "__main__":
    n_classes = 5
    n_timepoints = 384   # 384 // 6 // 8 // 4 = 2 -> feature_dim = 256
    batch = 2

    key = jax.random.PRNGKey(0)
    k_params, k_x = jax.random.split(key)
    params, cfg = init_tinysleepnet_params(k_params, n_classes, n_timepoints)

    x = jax.random.normal(k_x, (batch, 1, n_timepoints, 1), jnp.float32)

    fwd = jax.jit(lambda p, xx: tinysleepnet_forward(p, cfg, xx))
    out = jax.block_until_ready(fwd(params, x))

    assert out.shape == (batch, n_classes), out.shape
    assert bool(jnp.all(jnp.isfinite(out)))
    print("KERNEL_OK")
</pallas_src>

<mosaic_0001>
module attributes {stable_mosaic.version = 11 : i64} {
  func.func @_linear_kernel(%arg0: i32, %arg1: memref<8x256xf32, #tpu.memory_space<vmem>>, %arg2: memref<256x128xbf16, #tpu.memory_space<vmem>>, %arg3: memref<1x128xf32, #tpu.memory_space<vmem>>, %arg4: memref<8x128xf32, #tpu.memory_space<vmem>>) attributes {dimension_semantics = [#tpu.dimension_semantics<parallel>], iteration_bounds = array<i64: 1>, scalar_prefetch = 0 : i64, scratch_operands = 0 : i64, tpu.core_type = #tpu.core_type<tc>, window_params = [{transform_indices = @transform_0, window_bounds = array<i64: 8, 256>}, {pipeline_mode = #tpu.pipeline_mode<synchronous>, transform_indices = @transform_1, window_bounds = array<i64: 256, 128>}, {pipeline_mode = #tpu.pipeline_mode<synchronous>, transform_indices = @transform_2, window_bounds = array<i64: 1, 128>}, {transform_indices = @transform_3, window_bounds = array<i64: 8, 128>}]} {
    %c0 = arith.constant 0 : index
    %c0_0 = arith.constant 0 : index
    %0 = vector.load %arg1[%c0, %c0_0] : memref<8x256xf32, #tpu.memory_space<vmem>>, vector<8x256xf32>
    %1 = arith.truncf %0 : vector<8x256xf32> to vector<8x256xbf16>
    %c0_1 = arith.constant 0 : index
    %c0_2 = arith.constant 0 : index
    %2 = vector.load %arg2[%c0_1, %c0_2] : memref<256x128xbf16, #tpu.memory_space<vmem>>, vector<256x128xbf16>
    %cst = arith.constant dense<0.000000e+00> : vector<8x128xf32>
    %3 = tpu.matmul %1, %2, %cst {dimension_numbers = #tpu.dot_dimension_numbers<[1], [0], [0], [1], [0, 0, 1, 1], [], []>} : vector<8x256xbf16>, vector<256x128xbf16>, vector<8x128xf32> -> vector<8x128xf32>
    %c0_3 = arith.constant 0 : index
    %c0_4 = arith.constant 0 : index
    %4 = vector.load %arg3[%c0_3, %c0_4] : memref<1x128xf32, #tpu.memory_space<vmem>>, vector<1x128xf32>
    %5 = vector.broadcast %4 : vector<1x128xf32> to vector<8x128xf32>
    %6 = arith.addf %3, %5 : vector<8x128xf32>
    %c0_5 = arith.constant 0 : index
    %c0_6 = arith.constant 0 : index
    %7 = vector.load %arg4[%c0_5, %c0_6] : memref<8x128xf32, #tpu.memory_space<vmem>>, vector<8x128xf32>
    tpu.vector_store %arg4[%c0_5, %c0_6], %6 {strides = array<i32>} : memref<8x128xf32, #tpu.memory_space<vmem>>, vector<8x128xf32>,
    return
  }
  func.func @transform_0(%arg0: i32) -> (i32, i32) {
    %c0_i32 = arith.constant 0 : i32
    %c0_i32_0 = arith.constant 0 : i32
    return %arg0, %c0_i32 : i32, i32
  }
  func.func @transform_1(%arg0: i32) -> (i32, i32) {
    %c0_i32 = arith.constant 0 : i32
    %c0_i32_0 = arith.constant 0 : i32
    %c0_i32_1 = arith.constant 0 : i32
    return %c0_i32, %c0_i32_0 : i32, i32
  }
  func.func @transform_2(%arg0: i32) -> (i32, i32) {
    %c0_i32 = arith.constant 0 : i32
    %c0_i32_0 = arith.constant 0 : i32
    %c0_i32_1 = arith.constant 0 : i32
    return %c0_i32, %c0_i32_0 : i32, i32
  }
  func.func @transform_3(%arg0: i32) -> (i32, i32) {
    %c0_i32 = arith.constant 0 : i32
    %c0_i32_0 = arith.constant 0 : i32
    return %arg0, %c0_i32 : i32, i32
  }
}

module attributes {stable_mosaic.version = 11 : i64} {
  func.func @_conv1_pool_kernel(%arg0: i32, %arg1: memref<1x72x8xf32, #tpu.memory_space<vmem>>, %arg2: memref<9x8x128xbf16, #tpu.memory_space<vmem>>, %arg3: memref<1x128xf32, #tpu.memory_space<vmem>>, %arg4: memref<1x24x128xf32, #tpu.memory_space<vmem>>) attributes {dimension_semantics = [#tpu.dimension_semantics<parallel>], iteration_bounds = array<i64: 2>, scalar_prefetch = 0 : i64, scratch_operands = 0 : i64, tpu.core_type = #tpu.core_type<tc>, window_params = [{transform_indices = @transform_0, window_bounds = array<i64: 1, 72, 8>}, {pipeline_mode = #tpu.pipeline_mode<synchronous>, transform_indices = @transform_1, window_bounds = array<i64: 9, 8, 128>}, {pipeline_mode = #tpu.pipeline_mode<synchronous>, transform_indices = @transform_2, window_bounds = array<i64: 1, 128>}, {transform_indices = @transform_3, window_bounds = array<i64: 1, 24, 128>}]} {
    %cst = arith.constant 0.000000e+00 : f32
    %0 = vector.broadcast %cst : f32 to vector<64x128xf32>
    %c0 = arith.constant 0 : index
    %c0_0 = arith.constant 0 : index
    %c0_1 = arith.constant 0 : index
    %1 = vector.load %arg1[%c0, %c0_0, %c0_1] : memref<1x72x8xf32, #tpu.memory_space<vmem>>, vector<1x64x8xf32>
    %2 = vector.shape_cast %1 : vector<1x64x8xf32> to vector<64x8xf32>
    %3 = arith.truncf %2 : vector<64x8xf32> to vector<64x8xbf16>
    %c0_2 = arith.constant 0 : index
    %c0_3 = arith.constant 0 : index
    %c0_4 = arith.constant 0 : index
    %4 = vector.load %arg2[%c0_2, %c0_3, %c0_4] : memref<9x8x128xbf16, #tpu.memory_space<vmem>>, vector<1x8x128xbf16>
    %5 = vector.shape_cast %4 : vector<1x8x128xbf16> to vector<8x128xbf16>
    %cst_5 = arith.constant dense<0.000000e+00> : vector<64x128xf32>
    %6 = tpu.matmul %3, %5, %cst_5 {dimension_numbers = #tpu.dot_dimension_numbers<[1], [0], [0], [1], [0, 0, 1, 1], [], []>} : vector<64x8xbf16>, vector<8x128xbf16>, vector<64x128xf32> -> vector<64x128xf32>
    %7 = arith.addf %0, %6 : vector<64x128xf32>
    %c0_6 = arith.constant 0 : index
    %c1 = arith.constant 1 : index
    %c0_7 = arith.constant 0 : index
    %8 = vector.load %arg1[%c0_6, %c1, %c0_7] : memref<1x72x8xf32, #tpu.memory_space<vmem>>, vector<1x64x8xf32>
    %9 = vector.shape_cast %8 : vector<1x64x8xf32> to vector<64x8xf32>
    %10 = arith.truncf %9 : vector<64x8xf32> to vector<64x8xbf16>
    %c1_8 = arith.constant 1 : index
    %c0_9 = arith.constant 0 : index
    %c0_10 = arith.constant 0 : index
    %11 = vector.load %arg2[%c1_8, %c0_9, %c0_10] : memref<9x8x128xbf16, #tpu.memory_space<vmem>>, vector<1x8x128xbf16>
    %12 = vector.shape_cast %11 : vector<1x8x128xbf16> to vector<8x128xbf16>
    %cst_11 = arith.constant dense<0.000000e+00> : vector<64x128xf32>
    %13 = tpu.matmul %10, %12, %cst_11 {dimension_numbers = #tpu.dot_dimension_numbers<[1], [0], [0], [1], [0, 0, 1, 1], [], []>} : vector<64x8xbf16>, vector<8x128xbf16>, vector<64x128xf32> -> vector<64x128xf32>
    %14 = arith.addf %7, %13 : vector<64x128xf32>
    %c0_12 = arith.constant 0 : index
    %c2 = arith.constant 2 : index
    %c0_13 = arith.constant 0 : index
    %15 = vector.load %arg1[%c0_12, %c2, %c0_13] : memref<1x72x8xf32, #tpu.memory_space<vmem>>, vector<1x64x8xf32>
    %16 = vector.shape_cast %15 : vector<1x64x8xf32> to vector<64x8xf32>
    %17 = arith.truncf %16 : vector<64x8xf32> to vector<64x8xbf16>
    %c2_14 = arith.constant 2 : index
    %c0_15 = arith.constant 0 : index
    %c0_16 = arith.constant 0 : index
    %18 = vector.load %arg2[%c2_14, %c0_15, %c0_16] : memref<9x8x128xbf16, #tpu.memory_space<vmem>>, vector<1x8x128xbf16>
    %19 = vector.shape_cast %18 : vector<1x8x128xbf16> to vector<8x128xbf16>
    %cst_17 = arith.constant dense<0.000000e+00> : vector<64x128xf32>
    %20 = tpu.matmul %17, %19, %cst_17 {dimension_numbers = #tpu.dot_dimension_numbers<[1], [0], [0], [1], [0, 0, 1, 1], [], []>} : vector<64x8xbf16>, vector<8x128xbf16>, vector<64x128xf32> -> vector<64x128xf32>
    %21 = arith.addf %14, %20 : vector<64x128xf32>
    %c0_18 = arith.constant 0 : index
    %c3 = arith.constant 3 : index
    %c0_19 = arith.constant 0 : index
    %22 = vector.load %arg1[%c0_18, %c3, %c0_19] : memref<1x72x8xf32, #tpu.memory_space<vmem>>, vector<1x64x8xf32>
    %23 = vector.shape_cast %22 : vector<1x64x8xf32> to vector<64x8xf32>
    %24 = arith.truncf %23 : vector<64x8xf32> to vector<64x8xbf16>
    %c3_20 = arith.constant 3 : index
    %c0_21 = arith.constant 0 : index
    %c0_22 = arith.constant 0 : index
    %25 = vector.load %arg2[%c3_20, %c0_21, %c0_22] : memref<9x8x128xbf16, #tpu.memory_space<vmem>>, vector<1x8x128xbf16>
    %26 = vector.shape_cast %25 : vector<1x8x128xbf16> to vector<8x128xbf16>
    %cst_23 = arith.constant dense<0.000000e+00> : vector<64x128xf32>
    %27 = tpu.matmul %24, %26, %cst_23 {dimension_numbers = #tpu.dot_dimension_numbers<[1], [0], [0], [1], [0, 0, 1, 1], [], []>} : vector<64x8xbf16>, vector<8x128xbf16>, vector<64x128xf32> -> vector<64x128xf32>
    %28 = arith.addf %21, %27 : vector<64x128xf32>
    %c0_24 = arith.constant 0 : index
    %c4 = arith.constant 4 : index
    %c0_25 = arith.constant 0 : index
    %29 = vector.load %arg1[%c0_24, %c4, %c0_25] : memref<1x72x8xf32, #tpu.memory_space<vmem>>, vector<1x64x8xf32>
    %30 = vector.shape_cast %29 : vector<1x64x8xf32> to vector<64x8xf32>
    %31 = arith.truncf %30 : vector<64x8xf32> to vector<64x8xbf16>
    %c4_26 = arith.constant 4 : index
    %c0_27 = arith.constant 0 : index
    %c0_28 = arith.constant 0 : index
    %32 = vector.load %arg2[%c4_26, %c0_27, %c0_28] : memref<9x8x128xbf16, #tpu.memory_space<vmem>>, vector<1x8x128xbf16>
    %33 = vector.shape_cast %32 : vector<1x8x128xbf16> to vector<8x128xbf16>
    %cst_29 = arith.constant dense<0.000000e+00> : vector<64x128xf32>
    %34 = tpu.matmul %31, %33, %cst_29 {dimension_numbers = #tpu.dot_dimension_numbers<[1], [0], [0], [1], [0, 0, 1, 1], [], []>} : vector<64x8xbf16>, vector<8x128xbf16>, vector<64x128xf32> -> vector<64x128xf32>
    %35 = arith.addf %28, %34 : vector<64x128xf32>
    %c0_30 = arith.constant 0 : index
    %c5 = arith.constant 5 : index
    %c0_31 = arith.constant 0 : index
    %36 = vector.load %arg1[%c0_30, %c5, %c0_31] : memref<1x72x8xf32, #tpu.memory_space<vmem>>, vector<1x64x8xf32>
    %37 = vector.shape_cast %36 : vector<1x64x8xf32> to vector<64x8xf32>
    %38 = arith.truncf %37 : vector<64x8xf32> to vector<64x8xbf16>
    %c5_32 = arith.constant 5 : index
    %c0_33 = arith.constant 0 : index
    %c0_34 = arith.constant 0 : index
    %39 = vector.load %arg2[%c5_32, %c0_33, %c0_34] : memref<9x8x128xbf16, #tpu.memory_space<vmem>>, vector<1x8x128xbf16>
    %40 = vector.shape_cast %39 : vector<1x8x128xbf16> to vector<8x128xbf16>
    %cst_35 = arith.constant dense<0.000000e+00> : vector<64x128xf32>
    %41 = tpu.matmul %38, %40, %cst_35 {dimension_numbers = #tpu.dot_dimension_numbers<[1], [0], [0], [1], [0, 0, 1, 1], [], []>} : vector<64x8xbf16>, vector<8x128xbf16>, vector<64x128xf32> -> vector<64x128xf32>
    %42 = arith.addf %35, %41 : vector<64x128xf32>
    %c0_36 = arith.constant 0 : index
    %c6 = arith.constant 6 : index
    %c0_37 = arith.constant 0 : index
    %43 = vector.load %arg1[%c0_36, %c6, %c0_37] : memref<1x72x8xf32, #tpu.memory_space<vmem>>, vector<1x64x8xf32>
    %44 = vector.shape_cast %43 : vector<1x64x8xf32> to vector<64x8xf32>
    %45 = arith.truncf %44 : vector<64x8xf32> to vector<64x8xbf16>
    %c6_38 = arith.constant 6 : index
    %c0_39 = arith.constant 0 : index
    %c0_40 = arith.constant 0 : index
    %46 = vector.load %arg2[%c6_38, %c0_39, %c0_40] : memref<9x8x128xbf16, #tpu.memory_space<vmem>>, vector<1x8x128xbf16>
    %47 = vector.shape_cast %46 : vector<1x8x128xbf16> to vector<8x128xbf16>
    %cst_41 = arith.constant dense<0.000000e+00> : vector<64x128xf32>
    %48 = tpu.matmul %45, %47, %cst_41 {dimension_numbers = #tpu.dot_dimension_numbers<[1], [0], [0], [1], [0, 0, 1, 1], [], []>} : vector<64x8xbf16>, vector<8x128xbf16>, vector<64x128xf32> -> vector<64x128xf32>
    %49 = arith.addf %42, %48 : vector<64x128xf32>
    %c0_42 = arith.constant 0 : index
    %c7 = arith.constant 7 : index
    %c0_43 = arith.constant 0 : index
    %50 = vector.load %arg1[%c0_42, %c7, %c0_43] : memref<1x72x8xf32, #tpu.memory_space<vmem>>, vector<1x64x8xf32>
    %51 = vector.shape_cast %50 : vector<1x64x8xf32> to vector<64x8xf32>
    %52 = arith.truncf %51 : vector<64x8xf32> to vector<64x8xbf16>
    %c7_44 = arith.constant 7 : index
    %c0_45 = arith.constant 0 : index
    %c0_46 = arith.constant 0 : index
    %53 = vector.load %arg2[%c7_44, %c0_45, %c0_46] : memref<9x8x128xbf16, #tpu.memory_space<vmem>>, vector<1x8x128xbf16>
    %54 = vector.shape_cast %53 : vector<1x8x128xbf16> to vector<8x128xbf16>
    %cst_47 = arith.constant dense<0.000000e+00> : vector<64x128xf32>
    %55 = tpu.matmul %52, %54, %cst_47 {dimension_numbers = #tpu.dot_dimension_numbers<[1], [0], [0], [1], [0, 0, 1, 1], [], []>} : vector<64x8xbf16>, vector<8x128xbf16>, vector<64x128xf32> -> vector<64x128xf32>
    %56 = arith.addf %49, %55 : vector<64x128xf32>
    %c0_48 = arith.constant 0 : index
    %c8 = arith.constant 8 : index
    %c0_49 = arith.constant 0 : index
    %57 = vector.load %arg1[%c0_48, %c8, %c0_49] : memref<1x72x8xf32, #tpu.memory_space<vmem>>, vector<1x64x8xf32>
    %58 = vector.shape_cast %57 : vector<1x64x8xf32> to vector<64x8xf32>
    %59 = arith.truncf %58 : vector<64x8xf32> to vector<64x8xbf16>
    %c8_50 = arith.constant 8 : index
    %c0_51 = arith.constant 0 : index
    %c0_52 = arith.constant 0 : index
    %60 = vector.load %arg2[%c8_50, %c0_51, %c0_52] : memref<9x8x128xbf16, #tpu.memory_space<vmem>>, vector<1x8x128xbf16>
    %61 = vector.shape_cast %60 : vector<1x8x128xbf16> to vector<8x128xbf16>
    %cst_53 = arith.constant dense<0.000000e+00> : vector<64x128xf32>
    %62 = tpu.matmul %59, %61, %cst_53 {dimension_numbers = #tpu.dot_dimension_numbers<[1], [0], [0], [1], [0, 0, 1, 1], [], []>} : vector<64x8xbf16>, vector<8x128xbf16>, vector<64x128xf32> -> vector<64x128xf32>
    %63 = arith.addf %56, %62 : vector<64x128xf32>
    %c0_54 = arith.constant 0 : index
    %c0_55 = arith.constant 0 : index
    %64 = vector.load %arg3[%c0_54, %c0_55] : memref<1x128xf32, #tpu.memory_space<vmem>>, vector<1x128xf32>
    %65 = vector.broadcast %64 : vector<1x128xf32> to vector<64x128xf32>
    %66 = arith.addf %63, %65 : vector<64x128xf32>
    %cst_56 = arith.constant 0.000000e+00 : f32
    %67 = vector.broadcast %cst_56 : f32 to vector<64x128xf32>
    %68 = arith.maximumf %66, %67 : vector<64x128xf32>
    %69 = vector.shape_cast %68 : vector<64x128xf32> to vector<8x8x128xf32>
    %cst_57 = arith.constant dense<0xFF800000> : vector<8x128xf32>
    %70 = vector.multi_reduction <maximumf>, %69, %cst_57 [1] : vector<8x8x128xf32> to vector<8x128xf32>
    %cst_58 = arith.constant 0.000000e+00 : f32
    %71 = vector.broadcast %cst_58 : f32 to vector<1x24x128xf32>
    %c0_59 = arith.constant 0 : index
    %c0_60 = arith.constant 0 : index
    %c0_61 = arith.constant 0 : index
    %72 = vector.load %arg4[%c0_59, %c0_60, %c0_61] : memref<1x24x128xf32, #tpu.memory_space<vmem>>, vector<1x24x128xf32>
    tpu.vector_store %arg4[%c0_59, %c0_60, %c0_61], %71 {strides = array<i32>} : memref<1x24x128xf32, #tpu.memory_space<vmem>>, vector<1x24x128xf32>,
    %c0_62 = arith.constant 0 : index
    %c8_63 = arith.constant 8 : index
    %c0_64 = arith.constant 0 : index
    %73 = vector.load %arg4[%c0_62, %c8_63, %c0_64] : memref<1x24x128xf32, #tpu.memory_space<vmem>>, vector<1x8x128xf32>
    %74 = vector.shape_cast %73 : vector<1x8x128xf32> to vector<8x128xf32>
    %75 = vector.shape_cast %70 : vector<8x128xf32> to vector<1x8x128xf32>
    tpu.vector_store %arg4[%c0_62, %c8_63, %c0_64], %75 {strides = array<i32>} : memref<1x24x128xf32, #tpu.memory_space<vmem>>, vector<1x8x128xf32>,
    return
  }
  func.func @transform_0(%arg0: i32) -> (i32, i32, i32) {
    %c0_i32 = arith.constant 0 : i32
    %c0_i32_0 = arith.constant 0 : i32
    %c0_i32_1 = arith.constant 0 : i32
    return %arg0, %c0_i32, %c0_i32_0 : i32, i32, i32
  }
  func.func @transform_1(%arg0: i32) -> (i32, i32, i32) {
    %c0_i32 = arith.constant 0 : i32
    %c0_i32_0 = arith.constant 0 : i32
    %c0_i32_1 = arith.constant 0 : i32
    %c0_i32_2 = arith.constant 0 : i32
    return %c0_i32, %c0_i32_0, %c0_i32_1 : i32, i32, i32
  }
  func.func @transform_2(%arg0: i32) -> (i32, i32) {
    %c0_i32 = arith.constant 0 : i32
    %c0_i32_0 = arith.constant 0 : i32
    %c0_i32_1 = arith.constant 0 : i32
    return %c0_i32, %c0_i32_0 : i32, i32
  }
  func.func @transform_3(%arg0: i32) -> (i32, i32, i32) {
    %c0_i32 = arith.constant 0 : i32
    %c0_i32_0 = arith.constant 0 : i32
    %c0_i32_1 = arith.constant 0 : i32
    return %arg0, %c0_i32, %c0_i32_0 : i32, i32, i32
  }
}

module attributes {stable_mosaic.version = 11 : i64} {
  func.func @_conv_chain_kernel(%arg0: i32, %arg1: memref<1x24x128xf32, #tpu.memory_space<vmem>>, %arg2: memref<8x128x128xbf16, #tpu.memory_space<vmem>>, %arg3: memref<1x128xf32, #tpu.memory_space<vmem>>, %arg4: memref<8x128x128xbf16, #tpu.memory_space<vmem>>, %arg5: memref<1x128xf32, #tpu.memory_space<vmem>>, %arg6: memref<8x128x128xbf16, #tpu.memory_space<vmem>>, %arg7: memref<1x128xf32, #tpu.memory_space<vmem>>, %arg8: memref<1x2x128xf32, #tpu.memory_space<vmem>>, %arg9: memref<24x128xf32, #tpu.memory_space<vmem>>) attributes {dimension_semantics = [#tpu.dimension_semantics<parallel>], iteration_bounds = array<i64: 2>, scalar_prefetch = 0 : i64, scratch_operands = 1 : i64, tpu.core_type = #tpu.core_type<tc>, window_params = [{transform_indices = @transform_0, window_bounds = array<i64: 1, 24, 128>}, {pipeline_mode = #tpu.pipeline_mode<synchronous>, transform_indices = @transform_1, window_bounds = array<i64: 8, 128, 128>}, {pipeline_mode = #tpu.pipeline_mode<synchronous>, transform_indices = @transform_2, window_bounds = array<i64: 1, 128>}, {pipeline_mode = #tpu.pipeline_mode<synchronous>, transform_indices = @transform_3, window_bounds = array<i64: 8, 128, 128>}, {pipeline_mode = #tpu.pipeline_mode<synchronous>, transform_indices = @transform_4, window_bounds = array<i64: 1, 128>}, {pipeline_mode = #tpu.pipeline_mode<synchronous>, transform_indices = @transform_5, window_bounds = array<i64: 8, 128, 128>}, {pipeline_mode = #tpu.pipeline_mode<synchronous>, transform_indices = @transform_6, window_bounds = array<i64: 1, 128>}, {transform_indices = @transform_7, window_bounds = array<i64: 1, 2, 128>}]} {
    %cst = arith.constant 0.000000e+00 : f32
    %0 = vector.broadcast %cst : f32 to vector<8x128xf32>
    %c0 = arith.constant 0 : index
    %c5 = arith.constant 5 : index
    %c0_0 = arith.constant 0 : index
    %1 = vector.load %arg1[%c0, %c5, %c0_0] : memref<1x24x128xf32, #tpu.memory_space<vmem>>, vector<1x8x128xf32>
    %2 = vector.shape_cast %1 : vector<1x8x128xf32> to vector<8x128xf32>
    %3 = arith.truncf %2 : vector<8x128xf32> to vector<8x128xbf16>
    %c0_1 = arith.constant 0 : index
    %c0_2 = arith.constant 0 : index
    %c0_3 = arith.constant 0 : index
    %4 = vector.load %arg2[%c0_1, %c0_2, %c0_3] : memref<8x128x128xbf16, #tpu.memory_space<vmem>>, vector<1x128x128xbf16>
    %5 = vector.shape_cast %4 : vector<1x128x128xbf16> to vector<128x128xbf16>
    %cst_4 = arith.constant dense<0.000000e+00> : vector<8x128xf32>
    %6 = tpu.matmul %3, %5, %cst_4 {dimension_numbers = #tpu.dot_dimension_numbers<[1], [0], [0], [1], [0, 0, 1, 1], [], []>} : vector<8x128xbf16>, vector<128x128xbf16>, vector<8x128xf32> -> vector<8x128xf32>
    %7 = arith.addf %0, %6 : vector<8x128xf32>
    %c0_5 = arith.constant 0 : index
    %c6 = arith.constant 6 : index
    %c0_6 = arith.constant 0 : index
    %8 = vector.load %arg1[%c0_5, %c6, %c0_6] : memref<1x24x128xf32, #tpu.memory_space<vmem>>, vector<1x8x128xf32>
    %9 = vector.shape_cast %8 : vector<1x8x128xf32> to vector<8x128xf32>
    %10 = arith.truncf %9 : vector<8x128xf32> to vector<8x128xbf16>
    %c1 = arith.constant 1 : index
    %c0_7 = arith.constant 0 : index
    %c0_8 = arith.constant 0 : index
    %11 = vector.load %arg2[%c1, %c0_7, %c0_8] : memref<8x128x128xbf16, #tpu.memory_space<vmem>>, vector<1x128x128xbf16>
    %12 = vector.shape_cast %11 : vector<1x128x128xbf16> to vector<128x128xbf16>
    %cst_9 = arith.constant dense<0.000000e+00> : vector<8x128xf32>
    %13 = tpu.matmul %10, %12, %cst_9 {dimension_numbers = #tpu.dot_dimension_numbers<[1], [0], [0], [1], [0, 0, 1, 1], [], []>} : vector<8x128xbf16>, vector<128x128xbf16>, vector<8x128xf32> -> vector<8x128xf32>
    %14 = arith.addf %7, %13 : vector<8x128xf32>
    %c0_10 = arith.constant 0 : index
    %c7 = arith.constant 7 : index
    %c0_11 = arith.constant 0 : index
    %15 = vector.load %arg1[%c0_10, %c7, %c0_11] : memref<1x24x128xf32, #tpu.memory_space<vmem>>, vector<1x8x128xf32>
    %16 = vector.shape_cast %15 : vector<1x8x128xf32> to vector<8x128xf32>
    %17 = arith.truncf %16 : vector<8x128xf32> to vector<8x128xbf16>
    %c2 = arith.constant 2 : index
    %c0_12 = arith.constant 0 : index
    %c0_13 = arith.constant 0 : index
    %18 = vector.load %arg2[%c2, %c0_12, %c0_13] : memref<8x128x128xbf16, #tpu.memory_space<vmem>>, vector<1x128x128xbf16>
    %19 = vector.shape_cast %18 : vector<1x128x128xbf16> to vector<128x128xbf16>
    %cst_14 = arith.constant dense<0.000000e+00> : vector<8x128xf32>
    %20 = tpu.matmul %17, %19, %cst_14 {dimension_numbers = #tpu.dot_dimension_numbers<[1], [0], [0], [1], [0, 0, 1, 1], [], []>} : vector<8x128xbf16>, vector<128x128xbf16>, vector<8x128xf32> -> vector<8x128xf32>
    %21 = arith.addf %14, %20 : vector<8x128xf32>
    %c0_15 = arith.constant 0 : index
    %c8 = arith.constant 8 : index
    %c0_16 = arith.constant 0 : index
    %22 = vector.load %arg1[%c0_15, %c8, %c0_16] : memref<1x24x128xf32, #tpu.memory_space<vmem>>, vector<1x8x128xf32>
    %23 = vector.shape_cast %22 : vector<1x8x128xf32> to vector<8x128xf32>
    %24 = arith.truncf %23 : vector<8x128xf32> to vector<8x128xbf16>
    %c3 = arith.constant 3 : index
    %c0_17 = arith.constant 0 : index
    %c0_18 = arith.constant 0 : index
    %25 = vector.load %arg2[%c3, %c0_17, %c0_18] : memref<8x128x128xbf16, #tpu.memory_space<vmem>>, vector<1x128x128xbf16>
    %26 = vector.shape_cast %25 : vector<1x128x128xbf16> to vector<128x128xbf16>
    %cst_19 = arith.constant dense<0.000000e+00> : vector<8x128xf32>
    %27 = tpu.matmul %24, %26, %cst_19 {dimension_numbers = #tpu.dot_dimension_numbers<[1], [0], [0], [1], [0, 0, 1, 1], [], []>} : vector<8x128xbf16>, vector<128x128xbf16>, vector<8x128xf32> -> vector<8x128xf32>
    %28 = arith.addf %21, %27 : vector<8x128xf32>
    %c0_20 = arith.constant 0 : index
    %c9 = arith.constant 9 : index
    %c0_21 = arith.constant 0 : index
    %29 = vector.load %arg1[%c0_20, %c9, %c0_21] : memref<1x24x128xf32, #tpu.memory_space<vmem>>, vector<1x8x128xf32>
    %30 = vector.shape_cast %29 : vector<1x8x128xf32> to vector<8x128xf32>
    %31 = arith.truncf %30 : vector<8x128xf32> to vector<8x128xbf16>
    %c4 = arith.constant 4 : index
    %c0_22 = arith.constant 0 : index
    %c0_23 = arith.constant 0 : index
    %32 = vector.load %arg2[%c4, %c0_22, %c0_23] : memref<8x128x128xbf16, #tpu.memory_space<vmem>>, vector<1x128x128xbf16>
    %33 = vector.shape_cast %32 : vector<1x128x128xbf16> to vector<128x128xbf16>
    %cst_24 = arith.constant dense<0.000000e+00> : vector<8x128xf32>
    %34 = tpu.matmul %31, %33, %cst_24 {dimension_numbers = #tpu.dot_dimension_numbers<[1], [0], [0], [1], [0, 0, 1, 1], [], []>} : vector<8x128xbf16>, vector<128x128xbf16>, vector<8x128xf32> -> vector<8x128xf32>
    %35 = arith.addf %28, %34 : vector<8x128xf32>
    %c0_25 = arith.constant 0 : index
    %c10 = arith.constant 10 : index
    %c0_26 = arith.constant 0 : index
    %36 = vector.load %arg1[%c0_25, %c10, %c0_26] : memref<1x24x128xf32, #tpu.memory_space<vmem>>, vector<1x8x128xf32>
    %37 = vector.shape_cast %36 : vector<1x8x128xf32> to vector<8x128xf32>
    %38 = arith.truncf %37 : vector<8x128xf32> to vector<8x128xbf16>
    %c5_27 = arith.constant 5 : index
    %c0_28 = arith.constant 0 : index
    %c0_29 = arith.constant 0 : index
    %39 = vector.load %arg2[%c5_27, %c0_28, %c0_29] : memref<8x128x128xbf16, #tpu.memory_space<vmem>>, vector<1x128x128xbf16>
    %40 = vector.shape_cast %39 : vector<1x128x128xbf16> to vector<128x128xbf16>
    %cst_30 = arith.constant dense<0.000000e+00> : vector<8x128xf32>
    %41 = tpu.matmul %38, %40, %cst_30 {dimension_numbers = #tpu.dot_dimension_numbers<[1], [0], [0], [1], [0, 0, 1, 1], [], []>} : vector<8x128xbf16>, vector<128x128xbf16>, vector<8x128xf32> -> vector<8x128xf32>
    %42 = arith.addf %35, %41 : vector<8x128xf32>
    %c0_31 = arith.constant 0 : index
    %c11 = arith.constant 11 : index
    %c0_32 = arith.constant 0 : index
    %43 = vector.load %arg1[%c0_31, %c11, %c0_32] : memref<1x24x128xf32, #tpu.memory_space<vmem>>, vector<1x8x128xf32>
    %44 = vector.shape_cast %43 : vector<1x8x128xf32> to vector<8x128xf32>
    %45 = arith.truncf %44 : vector<8x128xf32> to vector<8x128xbf16>
    %c6_33 = arith.constant 6 : index
    %c0_34 = arith.constant 0 : index
    %c0_35 = arith.constant 0 : index
    %46 = vector.load %arg2[%c6_33, %c0_34, %c0_35] : memref<8x128x128xbf16, #tpu.memory_space<vmem>>, vector<1x128x128xbf16>
    %47 = vector.shape_cast %46 : vector<1x128x128xbf16> to vector<128x128xbf16>
    %cst_36 = arith.constant dense<0.000000e+00> : vector<8x128xf32>
    %48 = tpu.matmul %45, %47, %cst_36 {dimension_numbers = #tpu.dot_dimension_numbers<[1], [0], [0], [1], [0, 0, 1, 1], [], []>} : vector<8x128xbf16>, vector<128x128xbf16>, vector<8x128xf32> -> vector<8x128xf32>
    %49 = arith.addf %42, %48 : vector<8x128xf32>
    %c0_37 = arith.constant 0 : index
    %c12 = arith.constant 12 : index
    %c0_38 = arith.constant 0 : index
    %50 = vector.load %arg1[%c0_37, %c12, %c0_38] : memref<1x24x128xf32, #tpu.memory_space<vmem>>, vector<1x8x128xf32>
    %51 = vector.shape_cast %50 : vector<1x8x128xf32> to vector<8x128xf32>
    %52 = arith.truncf %51 : vector<8x128xf32> to vector<8x128xbf16>
    %c7_39 = arith.constant 7 : index
    %c0_40 = arith.constant 0 : index
    %c0_41 = arith.constant 0 : index
    %53 = vector.load %arg2[%c7_39, %c0_40, %c0_41] : memref<8x128x128xbf16, #tpu.memory_space<vmem>>, vector<1x128x128xbf16>
    %54 = vector.shape_cast %53 : vector<1x128x128xbf16> to vector<128x128xbf16>
    %cst_42 = arith.constant dense<0.000000e+00> : vector<8x128xf32>
    %55 = tpu.matmul %52, %54, %cst_42 {dimension_numbers = #tpu.dot_dimension_numbers<[1], [0], [0], [1], [0, 0, 1, 1], [], []>} : vector<8x128xbf16>, vector<128x128xbf16>, vector<8x128xf32> -> vector<8x128xf32>
    %56 = arith.addf %49, %55 : vector<8x128xf32>
    %c0_43 = arith.constant 0 : index
    %c0_44 = arith.constant 0 : index
    %57 = vector.load %arg3[%c0_43, %c0_44] : memref<1x128xf32, #tpu.memory_space<vmem>>, vector<1x128xf32>
    %58 = vector.broadcast %57 : vector<1x128xf32> to vector<8x128xf32>
    %59 = arith.addf %56, %58 : vector<8x128xf32>
    %cst_45 = arith.constant 0.000000e+00 : f32
    %60 = vector.broadcast %cst_45 : f32 to vector<8x128xf32>
    %61 = arith.maximumf %59, %60 : vector<8x128xf32>
    %cst_46 = arith.constant 0.000000e+00 : f32
    %62 = vector.broadcast %cst_46 : f32 to vector<24x128xf32>
    %c0_47 = arith.constant 0 : index
    %c0_48 = arith.constant 0 : index
    %63 = vector.load %arg9[%c0_47, %c0_48] : memref<24x128xf32, #tpu.memory_space<vmem>>, vector<24x128xf32>
    tpu.vector_store %arg9[%c0_47, %c0_48], %62 {strides = array<i32>} : memref<24x128xf32, #tpu.memory_space<vmem>>, vector<24x128xf32>,
    %c8_49 = arith.constant 8 : index
    %c0_50 = arith.constant 0 : index
    %64 = vector.load %arg9[%c8_49, %c0_50] : memref<24x128xf32, #tpu.memory_space<vmem>>, vector<8x128xf32>
    tpu.vector_store %arg9[%c8_49, %c0_50], %61 {strides = array<i32>} : memref<24x128xf32, #tpu.memory_space<vmem>>, vector<8x128xf32>,
    %cst_51 = arith.constant 0.000000e+00 : f32
    %65 = vector.broadcast %cst_51 : f32 to vector<8x128xf32>
    %c5_52 = arith.constant 5 : index
    %c0_53 = arith.constant 0 : index
    %66 = vector.load %arg9[%c5_52, %c0_53] : memref<24x128xf32, #tpu.memory_space<vmem>>, vector<8x128xf32>
    %67 = arith.truncf %66 : vector<8x128xf32> to vector<8x128xbf16>
    %c0_54 = arith.constant 0 : index
    %c0_55 = arith.constant 0 : index
    %c0_56 = arith.constant 0 : index
    %68 = vector.load %arg4[%c0_54, %c0_55, %c0_56] : memref<8x128x128xbf16, #tpu.memory_space<vmem>>, vector<1x128x128xbf16>
    %69 = vector.shape_cast %68 : vector<1x128x128xbf16> to vector<128x128xbf16>
    %cst_57 = arith.constant dense<0.000000e+00> : vector<8x128xf32>
    %70 = tpu.matmul %67, %69, %cst_57 {dimension_numbers = #tpu.dot_dimension_numbers<[1], [0], [0], [1], [0, 0, 1, 1], [], []>} : vector<8x128xbf16>, vector<128x128xbf16>, vector<8x128xf32> -> vector<8x128xf32>
    %71 = arith.addf %65, %70 : vector<8x128xf32>
    %c6_58 = arith.constant 6 : index
    %c0_59 = arith.constant 0 : index
    %72 = vector.load %arg9[%c6_58, %c0_59] : memref<24x128xf32, #tpu.memory_space<vmem>>, vector<8x128xf32>
    %73 = arith.truncf %72 : vector<8x128xf32> to vector<8x128xbf16>
    %c1_60 = arith.constant 1 : index
    %c0_61 = arith.constant 0 : index
    %c0_62 = arith.constant 0 : index
    %74 = vector.load %arg4[%c1_60, %c0_61, %c0_62] : memref<8x128x128xbf16, #tpu.memory_space<vmem>>, vector<1x128x128xbf16>
    %75 = vector.shape_cast %74 : vector<1x128x128xbf16> to vector<128x128xbf16>
    %cst_63 = arith.constant dense<0.000000e+00> : vector<8x128xf32>
    %76 = tpu.matmul %73, %75, %cst_63 {dimension_numbers = #tpu.dot_dimension_numbers<[1], [0], [0], [1], [0, 0, 1, 1], [], []>} : vector<8x128xbf16>, vector<128x128xbf16>, vector<8x128xf32> -> vector<8x128xf32>
    %77 = arith.addf %71, %76 : vector<8x128xf32>
    %c7_64 = arith.constant 7 : index
    %c0_65 = arith.constant 0 : index
    %78 = vector.load %arg9[%c7_64, %c0_65] : memref<24x128xf32, #tpu.memory_space<vmem>>, vector<8x128xf32>
    %79 = arith.truncf %78 : vector<8x128xf32> to vector<8x128xbf16>
    %c2_66 = arith.constant 2 : index
    %c0_67 = arith.constant 0 : index
    %c0_68 = arith.constant 0 : index
    %80 = vector.load %arg4[%c2_66, %c0_67, %c0_68] : memref<8x128x128xbf16, #tpu.memory_space<vmem>>, vector<1x128x128xbf16>
    %81 = vector.shape_cast %80 : vector<1x128x128xbf16> to vector<128x128xbf16>
    %cst_69 = arith.constant dense<0.000000e+00> : vector<8x128xf32>
    %82 = tpu.matmul %79, %81, %cst_69 {dimension_numbers = #tpu.dot_dimension_numbers<[1], [0], [0], [1], [0, 0, 1, 1], [], []>} : vector<8x128xbf16>, vector<128x128xbf16>, vector<8x128xf32> -> vector<8x128xf32>
    %83 = arith.addf %77, %82 : vector<8x128xf32>
    %c8_70 = arith.constant 8 : index
    %c0_71 = arith.constant 0 : index
    %84 = vector.load %arg9[%c8_70, %c0_71] : memref<24x128xf32, #tpu.memory_space<vmem>>, vector<8x128xf32>
    %85 = arith.truncf %84 : vector<8x128xf32> to vector<8x128xbf16>
    %c3_72 = arith.constant 3 : index
    %c0_73 = arith.constant 0 : index
    %c0_74 = arith.constant 0 : index
    %86 = vector.load %arg4[%c3_72, %c0_73, %c0_74] : memref<8x128x128xbf16, #tpu.memory_space<vmem>>, vector<1x128x128xbf16>
    %87 = vector.shape_cast %86 : vector<1x128x128xbf16> to vector<128x128xbf16>
    %cst_75 = arith.constant dense<0.000000e+00> : vector<8x128xf32>
    %88 = tpu.matmul %85, %87, %cst_75 {dimension_numbers = #tpu.dot_dimension_numbers<[1], [0], [0], [1], [0, 0, 1, 1], [], []>} : vector<8x128xbf16>, vector<128x128xbf16>, vector<8x128xf32> -> vector<8x128xf32>
    %89 = arith.addf %83, %88 : vector<8x128xf32>
    %c9_76 = arith.constant 9 : index
    %c0_77 = arith.constant 0 : index
    %90 = vector.load %arg9[%c9_76, %c0_77] : memref<24x128xf32, #tpu.memory_space<vmem>>, vector<8x128xf32>
    %91 = arith.truncf %90 : vector<8x128xf32> to vector<8x128xbf16>
    %c4_78 = arith.constant 4 : index
    %c0_79 = arith.constant 0 : index
    %c0_80 = arith.constant 0 : index
    %92 = vector.load %arg4[%c4_78, %c0_79, %c0_80] : memref<8x128x128xbf16, #tpu.memory_space<vmem>>, vector<1x128x128xbf16>
    %93 = vector.shape_cast %92 : vector<1x128x128xbf16> to vector<128x128xbf16>
    %cst_81 = arith.constant dense<0.000000e+00> : vector<8x128xf32>
    %94 = tpu.matmul %91, %93, %cst_81 {dimension_numbers = #tpu.dot_dimension_numbers<[1], [0], [0], [1], [0, 0, 1, 1], [], []>} : vector<8x128xbf16>, vector<128x128xbf16>, vector<8x128xf32> -> vector<8x128xf32>
    %95 = arith.addf %89, %94 : vector<8x128xf32>
    %c10_82 = arith.constant 10 : index
    %c0_83 = arith.constant 0 : index
    %96 = vector.load %arg9[%c10_82, %c0_83] : memref<24x128xf32, #tpu.memory_space<vmem>>, vector<8x128xf32>
    %97 = arith.truncf %96 : vector<8x128xf32> to vector<8x128xbf16>
    %c5_84 = arith.constant 5 : index
    %c0_85 = arith.constant 0 : index
    %c0_86 = arith.constant 0 : index
    %98 = vector.load %arg4[%c5_84, %c0_85, %c0_86] : memref<8x128x128xbf16, #tpu.memory_space<vmem>>, vector<1x128x128xbf16>
    %99 = vector.shape_cast %98 : vector<1x128x128xbf16> to vector<128x128xbf16>
    %cst_87 = arith.constant dense<0.000000e+00> : vector<8x128xf32>
    %100 = tpu.matmul %97, %99, %cst_87 {dimension_numbers = #tpu.dot_dimension_numbers<[1], [0], [0], [1], [0, 0, 1, 1], [], []>} : vector<8x128xbf16>, vector<128x128xbf16>, vector<8x128xf32> -> vector<8x128xf32>
    %101 = arith.addf %95, %100 : vector<8x128xf32>
    %c11_88 = arith.constant 11 : index
    %c0_89 = arith.constant 0 : index
    %102 = vector.load %arg9[%c11_88, %c0_89] : memref<24x128xf32, #tpu.memory_space<vmem>>, vector<8x128xf32>
    %103 = arith.truncf %102 : vector<8x128xf32> to vector<8x128xbf16>
    %c6_90 = arith.constant 6 : index
    %c0_91 = arith.constant 0 : index
    %c0_92 = arith.constant 0 : index
    %104 = vector.load %arg4[%c6_90, %c0_91, %c0_92] : memref<8x128x128xbf16, #tpu.memory_space<vmem>>, vector<1x128x128xbf16>
    %105 = vector.shape_cast %104 : vector<1x128x128xbf16> to vector<128x128xbf16>
    %cst_93 = arith.constant dense<0.000000e+00> : vector<8x128xf32>
    %106 = tpu.matmul %103, %105, %cst_93 {dimension_numbers = #tpu.dot_dimension_numbers<[1], [0], [0], [1], [0, 0, 1, 1], [], []>} : vector<8x128xbf16>, vector<128x128xbf16>, vector<8x128xf32> -> vector<8x128xf32>
    %107 = arith.addf %101, %106 : vector<8x128xf32>
    %c12_94 = arith.constant 12 : index
    %c0_95 = arith.constant 0 : index
    %108 = vector.load %arg9[%c12_94, %c0_95] : memref<24x128xf32, #tpu.memory_space<vmem>>, vector<8x128xf32>
    %109 = arith.truncf %108 : vector<8x128xf32> to vector<8x128xbf16>
    %c7_96 = arith.constant 7 : index
    %c0_97 = arith.constant 0 : index
    %c0_98 = arith.constant 0 : index
    %110 = vector.load %arg4[%c7_96, %c0_97, %c0_98] : memref<8x128x128xbf16, #tpu.memory_space<vmem>>, vector<1x128x128xbf16>
    %111 = vector.shape_cast %110 : vector<1x128x128xbf16> to vector<128x128xbf16>
    %cst_99 = arith.constant dense<0.000000e+00> : vector<8x128xf32>
    %112 = tpu.matmul %109, %111, %cst_99 {dimension_numbers = #tpu.dot_dimension_numbers<[1], [0], [0], [1], [0, 0, 1, 1], [], []>} : vector<8x128xbf16>, vector<128x128xbf16>, vector<8x128xf32> -> vector<8x128xf32>
    %113 = arith.addf %107, %112 : vector<8x128xf32>
    %c0_100 = arith.constant 0 : index
    %c0_101 = arith.constant 0 : index
    %114 = vector.load %arg5[%c0_100, %c0_101] : memref<1x128xf32, #tpu.memory_space<vmem>>, vector<1x128xf32>
    %115 = vector.broadcast %114 : vector<1x128xf32> to vector<8x128xf32>
    %116 = arith.addf %113, %115 : vector<8x128xf32>
    %cst_102 = arith.constant 0.000000e+00 : f32
    %117 = vector.broadcast %cst_102 : f32 to vector<8x128xf32>
    %118 = arith.maximumf %116, %117 : vector<8x128xf32>
    %c8_103 = arith.constant 8 : index
    %c0_104 = arith.constant 0 : index
    %119 = vector.load %arg9[%c8_103, %c0_104] : memref<24x128xf32, #tpu.memory_space<vmem>>, vector<8x128xf32>
    tpu.vector_store %arg9[%c8_103, %c0_104], %118 {strides = array<i32>} : memref<24x128xf32, #tpu.memory_space<vmem>>, vector<8x128xf32>,
    %cst_105 = arith.constant 0.000000e+00 : f32
    %120 = vector.broadcast %cst_105 : f32 to vector<8x128xf32>
    %c5_106 = arith.constant 5 : index
    %c0_107 = arith.constant 0 : index
    %121 = vector.load %arg9[%c5_106, %c0_107] : memref<24x128xf32, #tpu.memory_space<vmem>>, vector<8x128xf32>
    %122 = arith.truncf %121 : vector<8x128xf32> to vector<8x128xbf16>
    %c0_108 = arith.constant 0 : index
    %c0_109 = arith.constant 0 : index
    %c0_110 = arith.constant 0 : index
    %123 = vector.load %arg6[%c0_108, %c0_109, %c0_110] : memref<8x128x128xbf16, #tpu.memory_space<vmem>>, vector<1x128x128xbf16>
    %124 = vector.shape_cast %123 : vector<1x128x128xbf16> to vector<128x128xbf16>
    %cst_111 = arith.constant dense<0.000000e+00> : vector<8x128xf32>
    %125 = tpu.matmul %122, %124, %cst_111 {dimension_numbers = #tpu.dot_dimension_numbers<[1], [0], [0], [1], [0, 0, 1, 1], [], []>} : vector<8x128xbf16>, vector<128x128xbf16>, vector<8x128xf32> -> vector<8x128xf32>
    %126 = arith.addf %120, %125 : vector<8x128xf32>
    %c6_112 = arith.constant 6 : index
    %c0_113 = arith.constant 0 : index
    %127 = vector.load %arg9[%c6_112, %c0_113] : memref<24x128xf32, #tpu.memory_space<vmem>>, vector<8x128xf32>
    %128 = arith.truncf %127 : vector<8x128xf32> to vector<8x128xbf16>
    %c1_114 = arith.constant 1 : index
    %c0_115 = arith.constant 0 : index
    %c0_116 = arith.constant 0 : index
    %129 = vector.load %arg6[%c1_114, %c0_115, %c0_116] : memref<8x128x128xbf16, #tpu.memory_space<vmem>>, vector<1x128x128xbf16>
    %130 = vector.shape_cast %129 : vector<1x128x128xbf16> to vector<128x128xbf16>
    %cst_117 = arith.constant dense<0.000000e+00> : vector<8x128xf32>
    %131 = tpu.matmul %128, %130, %cst_117 {dimension_numbers = #tpu.dot_dimension_numbers<[1], [0], [0], [1], [0, 0, 1, 1], [], []>} : vector<8x128xbf16>, vector<128x128xbf16>, vector<8x128xf32> -> vector<8x128xf32>
    %132 = arith.addf %126, %131 : vector<8x128xf32>
    %c7_118 = arith.constant 7 : index
    %c0_119 = arith.constant 0 : index
    %133 = vector.load %arg9[%c7_118, %c0_119] : memref<24x128xf32, #tpu.memory_space<vmem>>, vector<8x128xf32>
    %134 = arith.truncf %133 : vector<8x128xf32> to vector<8x128xbf16>
    %c2_120 = arith.constant 2 : index
    %c0_121 = arith.constant 0 : index
    %c0_122 = arith.constant 0 : index
    %135 = vector.load %arg6[%c2_120, %c0_121, %c0_122] : memref<8x128x128xbf16, #tpu.memory_space<vmem>>, vector<1x128x128xbf16>
    %136 = vector.shape_cast %135 : vector<1x128x128xbf16> to vector<128x128xbf16>
    %cst_123 = arith.constant dense<0.000000e+00> : vector<8x128xf32>
    %137 = tpu.matmul %134, %136, %cst_123 {dimension_numbers = #tpu.dot_dimension_numbers<[1], [0], [0], [1], [0, 0, 1, 1], [], []>} : vector<8x128xbf16>, vector<128x128xbf16>, vector<8x128xf32> -> vector<8x128xf32>
    %138 = arith.addf %132, %137 : vector<8x128xf32>
    %c8_124 = arith.constant 8 : index
    %c0_125 = arith.constant 0 : index
    %139 = vector.load %arg9[%c8_124, %c0_125] : memref<24x128xf32, #tpu.memory_space<vmem>>, vector<8x128xf32>
    %140 = arith.truncf %139 : vector<8x128xf32> to vector<8x128xbf16>
    %c3_126 = arith.constant 3 : index
    %c0_127 = arith.constant 0 : index
    %c0_128 = arith.constant 0 : index
    %141 = vector.load %arg6[%c3_126, %c0_127, %c0_128] : memref<8x128x128xbf16, #tpu.memory_space<vmem>>, vector<1x128x128xbf16>
    %142 = vector.shape_cast %141 : vector<1x128x128xbf16> to vector<128x128xbf16>
    %cst_129 = arith.constant dense<0.000000e+00> : vector<8x128xf32>
    %143 = tpu.matmul %140, %142, %cst_129 {dimension_numbers = #tpu.dot_dimension_numbers<[1], [0], [0], [1], [0, 0, 1, 1], [], []>} : vector<8x128xbf16>, vector<128x128xbf16>, vector<8x128xf32> -> vector<8x128xf32>
    %144 = arith.addf %138, %143 : vector<8x128xf32>
    %c9_130 = arith.constant 9 : index
    %c0_131 = arith.constant 0 : index
    %145 = vector.load %arg9[%c9_130, %c0_131] : memref<24x128xf32, #tpu.memory_space<vmem>>, vector<8x128xf32>
    %146 = arith.truncf %145 : vector<8x128xf32> to vector<8x128xbf16>
    %c4_132 = arith.constant 4 : index
    %c0_133 = arith.constant 0 : index
    %c0_134 = arith.constant 0 : index
    %147 = vector.load %arg6[%c4_132, %c0_133, %c0_134] : memref<8x128x128xbf16, #tpu.memory_space<vmem>>, vector<1x128x128xbf16>
    %148 = vector.shape_cast %147 : vector<1x128x128xbf16> to vector<128x128xbf16>
    %cst_135 = arith.constant dense<0.000000e+00> : vector<8x128xf32>
    %149 = tpu.matmul %146, %148, %cst_135 {dimension_numbers = #tpu.dot_dimension_numbers<[1], [0], [0], [1], [0, 0, 1, 1], [], []>} : vector<8x128xbf16>, vector<128x128xbf16>, vector<8x128xf32> -> vector<8x128xf32>
    %150 = arith.addf %144, %149 : vector<8x128xf32>
    %c10_136 = arith.constant 10 : index
    %c0_137 = arith.constant 0 : index
    %151 = vector.load %arg9[%c10_136, %c0_137] : memref<24x128xf32, #tpu.memory_space<vmem>>, vector<8x128xf32>
    %152 = arith.truncf %151 : vector<8x128xf32> to vector<8x128xbf16>
    %c5_138 = arith.constant 5 : index
    %c0_139 = arith.constant 0 : index
    %c0_140 = arith.constant 0 : index
    %153 = vector.load %arg6[%c5_138, %c0_139, %c0_140] : memref<8x128x128xbf16, #tpu.memory_space<vmem>>, vector<1x128x128xbf16>
    %154 = vector.shape_cast %153 : vector<1x128x128xbf16> to vector<128x128xbf16>
    %cst_141 = arith.constant dense<0.000000e+00> : vector<8x128xf32>
    %155 = tpu.matmul %152, %154, %cst_141 {dimension_numbers = #tpu.dot_dimension_numbers<[1], [0], [0], [1], [0, 0, 1, 1], [], []>} : vector<8x128xbf16>, vector<128x128xbf16>, vector<8x128xf32> -> vector<8x128xf32>
    %156 = arith.addf %150, %155 : vector<8x128xf32>
    %c11_142 = arith.constant 11 : index
    %c0_143 = arith.constant 0 : index
    %157 = vector.load %arg9[%c11_142, %c0_143] : memref<24x128xf32, #tpu.memory_space<vmem>>, vector<8x128xf32>
    %158 = arith.truncf %157 : vector<8x128xf32> to vector<8x128xbf16>
    %c6_144 = arith.constant 6 : index
    %c0_145 = arith.constant 0 : index
    %c0_146 = arith.constant 0 : index
    %159 = vector.load %arg6[%c6_144, %c0_145, %c0_146] : memref<8x128x128xbf16, #tpu.memory_space<vmem>>, vector<1x128x128xbf16>
    %160 = vector.shape_cast %159 : vector<1x128x128xbf16> to vector<128x128xbf16>
    %cst_147 = arith.constant dense<0.000000e+00> : vector<8x128xf32>
    %161 = tpu.matmul %158, %160, %cst_147 {dimension_numbers = #tpu.dot_dimension_numbers<[1], [0], [0], [1], [0, 0, 1, 1], [], []>} : vector<8x128xbf16>, vector<128x128xbf16>, vector<8x128xf32> -> vector<8x128xf32>
    %162 = arith.addf %156, %161 : vector<8x128xf32>
    %c12_148 = arith.constant 12 : index
    %c0_149 = arith.constant 0 : index
    %163 = vector.load %arg9[%c12_148, %c0_149] : memref<24x128xf32, #tpu.memory_space<vmem>>, vector<8x128xf32>
    %164 = arith.truncf %163 : vector<8x128xf32> to vector<8x128xbf16>
    %c7_150 = arith.constant 7 : index
    %c0_151 = arith.constant 0 : index
    %c0_152 = arith.constant 0 : index
    %165 = vector.load %arg6[%c7_150, %c0_151, %c0_152] : memref<8x128x128xbf16, #tpu.memory_space<vmem>>, vector<1x128x128xbf16>
    %166 = vector.shape_cast %165 : vector<1x128x128xbf16> to vector<128x128xbf16>
    %cst_153 = arith.constant dense<0.000000e+00> : vector<8x128xf32>
    %167 = tpu.matmul %164, %166, %cst_153 {dimension_numbers = #tpu.dot_dimension_numbers<[1], [0], [0], [1], [0, 0, 1, 1], [], []>} : vector<8x128xbf16>, vector<128x128xbf16>, vector<8x128xf32> -> vector<8x128xf32>
    %168 = arith.addf %162, %167 : vector<8x128xf32>
    %c0_154 = arith.constant 0 : index
    %c0_155 = arith.constant 0 : index
    %169 = vector.load %arg7[%c0_154, %c0_155] : memref<1x128xf32, #tpu.memory_space<vmem>>, vector<1x128xf32>
    %170 = vector.broadcast %169 : vector<1x128xf32> to vector<8x128xf32>
    %171 = arith.addf %168, %170 : vector<8x128xf32>
    %cst_156 = arith.constant 0.000000e+00 : f32
    %172 = vector.broadcast %cst_156 : f32 to vector<8x128xf32>
    %173 = arith.maximumf %171, %172 : vector<8x128xf32>
    %174 = vector.shape_cast %173 : vector<8x128xf32> to vector<2x4x128xf32>
    %cst_157 = arith.constant dense<0xFF800000> : vector<2x128xf32>
    %175 = vector.multi_reduction <maximumf>, %174, %cst_157 [1] : vector<2x4x128xf32> to vector<2x128xf32>
    %c0_158 = arith.constant 0 : index
    %c0_159 = arith.constant 0 : index
    %c0_160 = arith.constant 0 : index
    %176 = vector.load %arg8[%c0_158, %c0_159, %c0_160] : memref<1x2x128xf32, #tpu.memory_space<vmem>>, vector<1x2x128xf32>
    %177 = vector.shape_cast %176 : vector<1x2x128xf32> to vector<2x128xf32>
    %178 = vector.shape_cast %175 : vector<2x128xf32> to vector<1x2x128xf32>
    tpu.vector_store %arg8[%c0_158, %c0_159, %c0_160], %178 {strides = array<i32>} : memref<1x2x128xf32, #tpu.memory_space<vmem>>, vector<1x2x128xf32>,
    return
  }
  func.func @transform_0(%arg0: i32) -> (i32, i32, i32) {
    %c0_i32 = arith.constant 0 : i32
    %c0_i32_0 = arith.constant 0 : i32
    %c0_i32_1 = arith.constant 0 : i32
    return %arg0, %c0_i32, %c0_i32_0 : i32, i32, i32
  }
  func.func @transform_1(%arg0: i32) -> (i32, i32, i32) {
    %c0_i32 = arith.constant 0 : i32
    %c0_i32_0 = arith.constant 0 : i32
    %c0_i32_1 = arith.constant 0 : i32
    %c0_i32_2 = arith.constant 0 : i32
    return %c0_i32, %c0_i32_0, %c0_i32_1 : i32, i32, i32
  }
  func.func @transform_2(%arg0: i32) -> (i32, i32) {
    %c0_i32 = arith.constant 0 : i32
    %c0_i32_0 = arith.constant 0 : i32
    %c0_i32_1 = arith.constant 0 : i32
    return %c0_i32, %c0_i32_0 : i32, i32
  }
  func.func @transform_3(%arg0: i32) -> (i32, i32, i32) {
    %c0_i32 = arith.constant 0 : i32
    %c0_i32_0 = arith.constant 0 : i32
    %c0_i32_1 = arith.constant 0 : i32
    %c0_i32_2 = arith.constant 0 : i32
    return %c0_i32, %c0_i32_0, %c0_i32_1 : i32, i32, i32
  }
  func.func @transform_4(%arg0: i32) -> (i32, i32) {
    %c0_i32 = arith.constant 0 : i32
    %c0_i32_0 = arith.constant 0 : i32
    %c0_i32_1 = arith.constant 0 : i32
    return %c0_i32, %c0_i32_0 : i32, i32
  }
  func.func @transform_5(%arg0: i32) -> (i32, i32, i32) {
    %c0_i32 = arith.constant 0 : i32
    %c0_i32_0 = arith.constant 0 : i32
    %c0_i32_1 = arith.constant 0 : i32
    %c0_i32_2 = arith.constant 0 : i32
    return %c0_i32, %c0_i32_0, %c0_i32_1 : i32, i32, i32
  }
  func.func @transform_6(%arg0: i32) -> (i32, i32) {
    %c0_i32 = arith.constant 0 : i32
    %c0_i32_0 = arith.constant 0 : i32
    %c0_i32_1 = arith.constant 0 : i32
    return %c0_i32, %c0_i32_0 : i32, i32
  }
  func.func @transform_7(%arg0: i32) -> (i32, i32, i32) {
    %c0_i32 = arith.constant 0 : i32
    %c0_i32_0 = arith.constant 0 : i32
    %c0_i32_1 = arith.constant 0 : i32
    return %arg0, %c0_i32, %c0_i32_0 : i32, i32, i32
  }
}

</mosaic_0001>

<bundles_post_ra>
// kernel: _lambda_.5
= control target key start
LH: loop header
LB: loop body
LE: loop exit
PB: predicated region body
PF: predicated region fallthrough
CT: control target
= control target key end

     0   :  { %s334_s1 = inlined_call_operand.vmem [shape: bf16[256,128], index: 1, kind: input, shape index: {}]   ;;  %s335_s0 = inlined_call_operand.vmem [shape: f32[8,256], index: 0, kind: input, shape index: {}]   ;;  %s336_s2 = inlined_call_operand.vmem [shape: f32[1,128], index: 2, kind: input, shape index: {}]   ;;  %s337_s3 = inlined_call_operand.vmem [shape: f32[8,128], index: 3, kind: output, shape index: {}]  }
   0x1   :  { %v238_v0 = vld [vmem:[%s334_s1 + $0x40] sm:$0xff]   ;;  %v240_v2 = vld [vmem:[%s334_s1 + $0x48] sm:$0xff]   ;;  %v242_v4 = vld [vmem:[%s334_s1 + $0x50] sm:$0xff]  }
   0x2   :  { %v239_v1 = vld [vmem:[%s334_s1] sm:$0xff]   ;;  %216 = vmatprep.subr.bf16.mxu0 %v238_v0  ;;  %v241_v3 = vld [vmem:[%s334_s1 + $0x8] sm:$0xff]   ;;  %v243_v5 = vld [vmem:[%s334_s1 + $0x10] sm:$0xff]  }
   0x3   :  { %217 = vmatpush3.bf16.msra.mxu0 %v239_v1  ;;  %v244_v6 = vld [vmem:[%s334_s1 + $0x58] sm:$0xff]   ;;  %v246_v8 = vld [vmem:[%s334_s1 + $0x60] sm:$0xff]   ;;  %v248_v10 = vld [vmem:[%s334_s1 + $0x68] sm:$0xff]  }
   0x4   :  { %218 = vmatprep.subr.bf16.mxu0 %v240_v2  ;;  %v245_v7 = vld [vmem:[%s334_s1 + $0x18] sm:$0xff]   ;;  %v247_v9 = vld [vmem:[%s334_s1 + $0x20] sm:$0xff]   ;;  %v16_v11 = vld [vmem:[%s335_s0 + $0x8] sm:$0xff] }
   0x5   :  { %v18_v12 = vpack.c.bf16 %v16_v11, %v16_v11  ;;  %v249_v13 = vld [vmem:[%s334_s1 + $0x28] sm:$0xff]   ;;  %v250_v14 = vld [vmem:[%s334_s1 + $0x70] sm:$0xff]   ;;  %v252_v16 = vld [vmem:[%s334_s1 + $0x78] sm:$0xff]  }
   0x6   :  { %v251_v15 = vld [vmem:[%s334_s1 + $0x30] sm:$0xff]   ;;  %v253_v17 = vld [vmem:[%s334_s1 + $0x38] sm:$0xff]   ;;  %v15_v18 = vld [vmem:[%s335_s0] sm:$0xff] }
   0x7   :  { %219 = vmatpush3.bf16.msra.mxu0 %v241_v3  ;;  %186 = vmatprep.mubr.bf16.mxu0 %v18_v12  ;;  %v17_v19 = vpack.c.bf16 %v15_v18, %v15_v18  ;;  %v199_v21 = vld [vmem:[%s336_s2] ss:$0 sm:$0xff] }
   0x8   :  { %220 = vmatprep.subr.bf16.mxu0 %v242_v4 }
   0xb   :  { %221 = vmatpush3.bf16.msra.mxu0 %v243_v5 }
   0xc   :  { %222 = vmatprep.subr.bf16.mxu0 %v244_v6 }
   0xf   :  { %223 = vmatpush3.bf16.msra.mxu0 %v245_v7 }
  0x10   :  { %224 = vmatprep.subr.bf16.mxu0 %v246_v8 }
  0x13   :  { %225 = vmatpush3.bf16.msra.mxu0 %v247_v9 }
  0x14   :  { %226 = vmatprep.subr.bf16.mxu0 %v248_v10 }
  0x17   :  { %227 = vmatpush3.bf16.msra.mxu0 %v249_v13 }
  0x18   :  { %228 = vmatprep.subr.bf16.mxu0 %v250_v14 }
  0x1b   :  { %229 = vmatpush3.bf16.msra.mxu0 %v251_v15 }
  0x1c   :  { %230 = vmatprep.subr.bf16.mxu0 %v252_v16 }
  0x1f   :  { %231 = vmatpush3.bf16.msra.mxu0 %v253_v17 }
  0x22   :  { %187 = vmatmul.mubr.bf16.vlgmr.msra.gmra.mrb[0].mxu0 %v17_v19 }
  0xf5   :  { %v232_v20 = vpop.f32.mrb[0].mxu0 }
  0xf6   :  { %v233_v22 = vpop.f32.mrb[1].mxu0 }
  0xf7   :  { %v234_v23 = vadd.f32 %v233_v22, %v232_v20  ;;  %v235_v24 = vpop.f32.mrb[2].mxu0 }
  0xf8   :  { %v236_v25 = vpop.f32.mrb[3].mxu0 }
  0xf9   :  { %v189_v26 = vadd.f32 %v234_v23, %v199_v21 }
  0xfb   :  { %194 = vst [vmem:[%s337_s3] sm:$0xff] %v189_v26 }

// kernel: _lambda_.3
= control target key start
LH: loop header
LB: loop body
LE: loop exit
PB: predicated region body
PF: predicated region fallthrough
CT: control target
= control target key end

     0   :  { %8 = vsyncpa [#allocation3], 0  ;;  %s1932_s0 = inlined_call_operand.vmem [shape: f32[2,72,8], index: 0, kind: input, shape index: {}]   ;;  %s1933_s1 = inlined_call_operand.hbm [shape: bf16[9,8,128], index: 1, kind: input, shape index: {}]   ;;  %s1934_s2 = inlined_call_operand.hbm [shape: f32[1,128], index: 2, kind: input, shape index: {}]   ;;  %s1935_s3 = inlined_call_operand.vmem [shape: f32[2,24,128], index: 3, kind: output, shape index: {}]  }
   0x1   :  { %9 = vsyncpa [#allocation5], 0  ;;  %s1670_s12 = smov 0  }
   0x2 LB: > { %s1676_s13 = sadd.s32 4294967295, %s1643_s12   ;;  %p1280_p0 = scmp.ge.s32.totalorder %s1643_s12, 1  ;;  %s1643_s12 = sphi %s1670_s12, %s15_s12  }
   0x3   : > { %p114_p1 = scmp.lt.s32.totalorder %s1643_s12, 3  ;;  %s1645_s14 = smov [#allocation2]  }
   0x4   : > { %s126_s15 = sshll.u32 %s1645_s14, 4  ;;  %p1936_p3 = scmp.eq.s32.totalorder %s1676_s13, 0  ;;  %s127_s15 = int_to_ptr.vmem [resolvable:$true] %s126_s15 }
   0x5   : > { %p1680_p2 = pnand %p1280_p0, %p114_p1  ;;  %s1646_s17 = smov [#allocation4]  }
   0x6   : > { %s140_s18 = sshll.u32 %s1646_s17, 4  ;;  %s1573_s22 = scalar_lea.hbm %s1933_s1, 576  ;;  %s1693_s18 = int_to_ptr.vmem [resolvable:$true] %s140_s18 }
   0x7   : > { %s1938_s16 = scalar_select %p1680_p2, 1, 0 }
   0x8   : > { %p1549_p4 = pneg %p1680_p2  ;;  %p1574_p6 = scmp.ne.s32.totalorder %s1933_s1, %s1573_s22 }
   0x9   : > { %p1580_p10 = scmp.lt.u32.totalorder %s1573_s22, %s1933_s1 }
   0xa   : > { %p1689_p5 = pnand %p1936_p3, %p1549_p4 }
   0xc   : > { %p1575_p7 = pneg %p1689_p5 }
   0xe   : > { %p1576_p8 = pnand %p1575_p7, %p1574_p6 }
  0x10   : > { %p1577_p9 = pneg %p1576_p8 }
  0x12   : > { %p1582_p11 = pnand %p1580_p10, %p1577_p9 }
  0x14   : > { %1585 = shalt.err (!%p1582_p11)
}
  0x15   : > { %s1586_s27 = scalar_lea.vmem %s127_s15, 576  ;;  %p1594_p1 = scmp.lt.s32.totalorder %s127_s15, %s127_s15 }
  0x16   : > { %p1587_p12 = scmp.ne.s32.totalorder %s127_s15, %s1586_s27  ;;  %p1595_p4 = scmp.lt.s32.totalorder %s1586_s27, %s1586_s27 }
  0x18   : > { %p1589_p13 = pnand %p1587_p12, %p1575_p7  ;;  %p1596_p3 = por %p1595_p4, %p1594_p1 }
  0x1a   : > { %p1590_p0 = pneg %p1589_p13 }
  0x1c   : > { %p1597_p2 = pnand %p1596_p3, %p1590_p0 }
  0x1e   : > { %1600 = shalt.err (!%p1597_p2)
}
  0x1f   : > { %s1647_s28 = smov 64   ;;  %s1648_s29 = smov 4  }
  0x20   : > { %1552 = dma.hbm_to_vmem [thread:$0]  (!%p1689_p5), %s1933_s1, 576, %s127_s15, [#allocation3], %s1647_s28, %s1647_s28, %s1648_s29  }
  0x21   : > { %s1601_s7 = scalar_lea.hbm %s1934_s2, 16 }
  0x22   : > { %p1602_p6 = scmp.ne.s32.totalorder %s1934_s2, %s1601_s7  ;;  %p1608_p8 = scmp.lt.u32.totalorder %s1601_s7, %s1934_s2 }
  0x24   : > { %p1604_p2 = pnand %p1602_p6, %p1575_p7 }
  0x26   : > { %p1605_p3 = pneg %p1604_p2 }
  0x28   : > { %p1610_p9 = pnand %p1608_p8, %p1605_p3 }
  0x2a   : > { %1613 = shalt.err (!%p1610_p9)
}
  0x2b   : > { %s1614_s14 = scalar_lea.vmem %s1693_s18, 16  ;;  %s1621_s15 = scalar_lea.vmem %s1693_s18, 32 }
  0x2c   : > { %p1615_p10 = scmp.ne.s32.totalorder %s1693_s18, %s1614_s14  ;;  %p1622_p13 = scmp.lt.s32.totalorder %s1693_s18, %s1693_s18 }
  0x2d   : > { %p1623_p0 = scmp.lt.s32.totalorder %s1621_s15, %s1614_s14 }
  0x2e   : > { %p1617_p11 = pnand %p1615_p10, %p1575_p7 }
  0x2f   : > { %p1624_p1 = por %p1623_p0, %p1622_p13 }
  0x30   : > { %p1618_p12 = pneg %p1617_p11 }
  0x32   : > { %p1625_p4 = pnand %p1624_p1, %p1618_p12 }
  0x34   : > { %1628 = shalt.err (!%p1625_p4)
}
  0x35   : > { %1555 = dma.hbm_to_vmem [thread:$0]  (!%p1689_p5), %s1934_s2, 16, %s1693_s18, [#allocation5]  }
  0x36   : > { %p1940_p6 = scmp.ne.s32.totalorder %s1938_s16, 0 }
  0x37   : > { %p1941_p7 = scmp.eq.s32.totalorder (!%p1940_p6), %s1676_s13, 0 }
  0x38   : > { %161 = sbr.rel (%p1940_p6) target bundleno = 384 (0x180), region = 32 }
  0x3f   : > { %1634 = dma.done.wait (%p1941_p7), [#allocation3], 576   ;;  %p1942_p2 = pmov %p1941_p7 }
  0x41   : > { %1636 = vsyncadd (%p1942_p2), [#allocation3], 4294966720  ;;  %p1943_p3 = pmov %p1942_p2 }
  0x42   : > { %p1944_p8 = pmov %p1942_p2 }
  0x43   : > { %1638 = dma.done.wait (%p1943_p3), [#allocation5], 16  }
  0x44   : > { %1640 = vsyncadd (%p1944_p8), [#allocation5], 4294967280  ;;  %p189_p9 = scmp.lt.s32.totalorder %s1676_s13, 1  ;;  %vm240_vm0 = vcmask 1043456   ;;  %v226_v0 = vld [vmem:[#allocation2 + $0x4] sm:$0xf] }
  0x45   : > { %v1763_v1 = vld [vmem:[#allocation2 + $0x10] sm:$0xf]  ;;  %1529 = vmatprep.subr.msk.bf16.mxu1 %vm240_vm0, %v226_v0  ;;  %v242_v3 = vsel %vm240_vm0, %v226_v0, 0  ;;  %vm227_vm1 = vcmask 64512   ;;  %v212_v12 = vld [vmem:[#allocation2] sm:$0xf] }
  0x46   : > { %s1946_s13 = smov (!%p189_p9, %s1676_s13), 1  ;;  %1533 = vmatprep.subr.msk.bf16.mxu0 %vm240_vm0, %v1763_v1  ;;  %v1772_v4 = vsel %vm240_vm0, %v1763_v1, 0  ;;  %1374 = vmatpush3.bf16.msra.mxu1 %v242_v3  ;;  %v708_v16 = vld [vmem:[#allocation2 + $0x14] sm:$0xf]  ;;  %v322_v17 = vsel %vm240_vm0, %v212_v12, 0  ;;  %vm1185_vm2 = vcmask 1041409  }
  0x47   : > { %s1539_s16 = smul.u32 72, %s1946_s13  ;;  %1414 = vmatpush3.bf16.msra.mxu0 %v1772_v4  ;;  %1530 = vmatprep.subr.msk.bf16.mxu1 %vm240_vm0, %v212_v12  ;;  %v722_v19 = vsel %vm240_vm0, %v708_v16, 0  ;;  %v810_v28 = vld [vmem:[#allocation2 + $0x18] sm:$0xf]  ;;  %v402_v31 = vld [vmem:[#allocation2 + $0x8] sm:$0xf] }
  0x48   : > { %1535 = vmatprep.subr.msk.bf16.mxu0 %vm240_vm0, %v708_v16  ;;  %v824_v44 = vsel %vm240_vm0, %v810_v28, 0  ;;  %v912_v46 = vld [vmem:[#allocation2 + $0x1c] sm:$0xf]  ;;  %v416_v48 = vsel %vm240_vm0, %v402_v31, 0  ;;  %v504_v53 = vld [vmem:[#allocation2 + $0xc] sm:$0xf] }
  0x49   : > { %s1761_s21 = scalar_lea.vmem %s1932_s0, %s1539_s16  ;;  %v1014_v12 = vld [vmem:[#allocation2 + $0x20] sm:$0xf]  ;;  %s1540_s22 = smul.u32 24, %s1946_s13  ;;  %vm1187_vm3 = vcmask 1042434   ;;  %vm1189_vm4 = vcmask 1043459   ;;  %vm1191_vm5 = vcmask 1044484  }
  0x4a   : > { %v213_v2 = vld [vmem:[%s1761_s21 + $0x1] sm:$0xff]  ;;  %v214_v5 = vld [vmem:[%s1761_s21 + $0x9] sm:$0xff]  ;;  %v215_v10 = vld [vmem:[%s1761_s21 + $0x11] sm:$0xff]  ;;  %vm1193_vm6 = vcmask 1045509   ;;  %vm1195_vm7 = vcmask 1046534   ;;  %vm1197_vm8 = vcmask 1047559  }
  0x4b   : > { %v593_v6 = vld [vmem:[%s1761_s21 + $0x4] sm:$0xff]  ;;  %v594_v7 = vld [vmem:[%s1761_s21 + $0xc] sm:$0xff]  ;;  %v221_v8 = vpack.c.bf16 %v214_v5, %v213_v2  ;;  %v216_v11 = vld [vmem:[%s1761_s21 + $0x19] sm:$0xff]  ;;  %s1924_s25 = scalar_lea.vmem %s1935_s3, %s1540_s22 }
  0x4c   : > { %v601_v9 = vpack.c.bf16 %v594_v7, %v593_v6  ;;  %v222_v13 = vpack.c.bf16 %v216_v11, %v215_v10  ;;  %v595_v14 = vld [vmem:[%s1761_s21 + $0x14] sm:$0xff]  ;;  %v596_v15 = vld [vmem:[%s1761_s21 + $0x1c] sm:$0xff]  ;;  %v218_v21 = vld [vmem:[%s1761_s21 + $0x29] sm:$0xff]  ;;  %v926_v10 = vsel %vm240_vm0, %v912_v46, 0 }
  0x4d   : > { %1375 = vmatprep.mubr.msk.bf16.mxu1 %vm227_vm1, %v221_v8  ;;  %v602_v18 = vpack.c.bf16 %v596_v15, %v595_v14  ;;  %v217_v20 = vld [vmem:[%s1761_s21 + $0x21] sm:$0xff]  ;;  %v696_v24 = vld [vmem:[%s1761_s21 + $0xd] sm:$0xff]  ;;  %v220_v26 = vld [vmem:[%s1761_s21 + $0x39] sm:$0xff]  ;;  %v518_v14 = vsel %vm240_vm0, %v504_v53, 0 }
  0x4e   : > { %1415 = vmatprep.mubr.msk.bf16.mxu0 %vm227_vm1, %v601_v9  ;;  %1376 = vmatmul.mubr.msk.bf16.vlgmr.msra.gmra.mrb[0].mxu1 %vm227_vm1, %v222_v13  ;;  %v223_v22 = vpack.c.bf16 %v218_v21, %v217_v20  ;;  %v695_v23 = vld [vmem:[%s1761_s21 + $0x5] sm:$0xff]  ;;  %v219_v25 = vld [vmem:[%s1761_s21 + $0x31] sm:$0xff]  ;;  %v698_v35 = vld [vmem:[%s1761_s21 + $0x1d] sm:$0xff] }
  0x4f   : > { %1416 = vmatmul.mubr.msk.bf16.vlgmr.msra.gmra.mrb[0].mxu0 %vm227_vm1, %v602_v18  ;;  %1384 = vmatpush3.bf16.msra.mxu1 %v322_v17  ;;  %v703_v27 = vpack.c.bf16 %v696_v24, %v695_v23  ;;  %v200_v29 = vld [vmem:[%s1761_s21] sm:$0xff]  ;;  %v1799_v30 = vld [vmem:[%s1761_s21 + $0x8] sm:$0xff]  ;;  %v224_v32 = vpack.c.bf16 %v220_v26, %v219_v25  ;;  %v697_v34 = vld [vmem:[%s1761_s21 + $0x15] sm:$0xff] }
  0x50   : > { %1424 = vmatpush3.bf16.msra.mxu0 %v722_v19  ;;  %1379 = vmatprep.mubr.msk.bf16.mxu1 %vm227_vm1, %v223_v22  ;;  %v208_v33 = vpack.c.bf16 %v1799_v30, %v200_v29  ;;  %v699_v36 = vld [vmem:[%s1761_s21 + $0x25] sm:$0xff]  ;;  %v700_v37 = vld [vmem:[%s1761_s21 + $0x2d] sm:$0xff]  ;;  %v704_v38 = vpack.c.bf16 %v698_v35, %v697_v34  ;;  %v1815_v40 = vld [vmem:[%s1761_s21 + $0x18] sm:$0xff] }
  0x51   : > { %1425 = vmatprep.mubr.msk.bf16.mxu0 %vm227_vm1, %v703_v27  ;;  %1536 = vmatprep.subr.msk.bf16.mxu0 %vm240_vm0, %v810_v28  ;;  %v1812_v39 = vld [vmem:[%s1761_s21 + $0x10] sm:$0xff]  ;;  %v705_v41 = vpack.c.bf16 %v700_v37, %v699_v36  ;;  %v1818_v42 = vld [vmem:[%s1761_s21 + $0x20] sm:$0xff]  ;;  %v1821_v43 = vld [vmem:[%s1761_s21 + $0x28] sm:$0xff]  ;;  %v1028_v37 = vsel %vm240_vm0, %v1014_v12, 0 }
  0x52   : > { %1531 = vmatprep.subr.msk.bf16.mxu1 %vm240_vm0, %v402_v31  ;;  %v209_v45 = vpack.c.bf16 %v1815_v40, %v1812_v39  ;;  %v210_v47 = vpack.c.bf16 %v1821_v43, %v1818_v42  ;;  %v701_v49 = vld [vmem:[%s1761_s21 + $0x35] sm:$0xff]  ;;  %v702_v50 = vld [vmem:[%s1761_s21 + $0x3d] sm:$0xff]  ;;  %v797_v51 = vld [vmem:[%s1761_s21 + $0x6] sm:$0xff] }
  0x53   : > { %v798_v52 = vld [vmem:[%s1761_s21 + $0xe] sm:$0xff]  ;;  %v706_v54 = vpack.c.bf16 %v702_v50, %v701_v49  ;;  %v1842_v56 = vld [vmem:[%s1761_s21 + $0x38] sm:$0xff]  ;;  %v389_v58 = vld [vmem:[%s1761_s21 + $0x2] sm:$0xff]  ;;  %v1009_v49 = vpack.c.bf16 %v1812_v39, %v1799_v30 }
  0x54   : > { %v1839_v55 = vld [vmem:[%s1761_s21 + $0x30] sm:$0xff]  ;;  %v805_v57 = vpack.c.bf16 %v798_v52, %v797_v51  ;;  %v800_v63 = vld [vmem:[%s1761_s21 + $0x1e] sm:$0xff]  ;;  %v801_v0 = vld [vmem:[%s1761_s21 + $0x26] sm:$0xff] }
  0x55   : > { %v390_v59 = vld [vmem:[%s1761_s21 + $0xa] sm:$0xff]  ;;  %v211_v60 = vpack.c.bf16 %v1842_v56, %v1839_v55  ;;  %v799_v62 = vld [vmem:[%s1761_s21 + $0x16] sm:$0xff]  ;;  %v393_v8 = vld [vmem:[%s1761_s21 + $0x22] sm:$0xff] }
  0x56   : > { %1380 = vmatmul.mubr.msk.bf16.gmra.mrb[4].mxu1 %vm227_vm1, %v224_v32  ;;  %v397_v61 = vpack.c.bf16 %v390_v59, %v389_v58  ;;  %v802_v2 = vld [vmem:[%s1761_s21 + $0x2e] sm:$0xff]  ;;  %v806_v3 = vpack.c.bf16 %v800_v63, %v799_v62  ;;  %v392_v6 = vld [vmem:[%s1761_s21 + $0x1a] sm:$0xff]  ;;  %v491_v23 = vld [vmem:[%s1761_s21 + $0x3] sm:$0xff] }
  0x57   : > { %1385 = vmatprep.mubr.msk.bf16.mxu1 %vm227_vm1, %v208_v33  ;;  %v391_v5 = vld [vmem:[%s1761_s21 + $0x12] sm:$0xff]  ;;  %v807_v7 = vpack.c.bf16 %v802_v2, %v801_v0  ;;  %v394_v9 = vld [vmem:[%s1761_s21 + $0x2a] sm:$0xff]  ;;  %v804_v16 = vld [vmem:[%s1761_s21 + $0x3e] sm:$0xff] }
  0x58   : > { %v398_v11 = vpack.c.bf16 %v392_v6, %v391_v5  ;;  %v399_v13 = vpack.c.bf16 %v394_v9, %v393_v8  ;;  %v803_v15 = vld [vmem:[%s1761_s21 + $0x36] sm:$0xff]  ;;  %v899_v17 = vld [vmem:[%s1761_s21 + $0x7] sm:$0xff]  ;;  %v902_v28 = vld [vmem:[%s1761_s21 + $0x1f] sm:$0xff] }
  0x59   : > { %v900_v18 = vld [vmem:[%s1761_s21 + $0xf] sm:$0xff]  ;;  %v808_v19 = vpack.c.bf16 %v804_v16, %v803_v15  ;;  %v396_v21 = vld [vmem:[%s1761_s21 + $0x3a] sm:$0xff]  ;;  %v903_v29 = vld [vmem:[%s1761_s21 + $0x27] sm:$0xff] }
  0x5a   : > { %v395_v20 = vld [vmem:[%s1761_s21 + $0x32] sm:$0xff]  ;;  %v907_v22 = vpack.c.bf16 %v900_v18, %v899_v17  ;;  %v495_v35 = vld [vmem:[%s1761_s21 + $0x23] sm:$0xff] }
  0x5b   : > { %1426 = vmatmul.mubr.msk.bf16.vlgmr.msra.gmra.mrb[0].mxu0 %vm227_vm1, %v704_v38  ;;  %v492_v24 = vld [vmem:[%s1761_s21 + $0xb] sm:$0xff]  ;;  %v400_v25 = vpack.c.bf16 %v396_v21, %v395_v20  ;;  %v901_v27 = vld [vmem:[%s1761_s21 + $0x17] sm:$0xff] }
  0x5c   : > { %1434 = vmatpush3.bf16.msra.mxu0 %v824_v44  ;;  %1429 = vmatprep.mubr.msk.bf16.mxu0 %vm227_vm1, %v705_v41  ;;  %v499_v26 = vpack.c.bf16 %v492_v24, %v491_v23  ;;  %v904_v31 = vld [vmem:[%s1761_s21 + $0x2f] sm:$0xff]  ;;  %v908_v32 = vpack.c.bf16 %v902_v28, %v901_v27  ;;  %v905_v44 = vld [vmem:[%s1761_s21 + $0x37] sm:$0xff]  ;;  %v597_v50 = vld [vmem:[%s1761_s21 + $0x24] sm:$0xff] }
  0x5d   : > { %1537 = vmatprep.subr.msk.bf16.mxu0 %vm240_vm0, %v912_v46  ;;  %v493_v33 = vld [vmem:[%s1761_s21 + $0x13] sm:$0xff]  ;;  %v909_v34 = vpack.c.bf16 %v904_v31, %v903_v29  ;;  %v496_v36 = vld [vmem:[%s1761_s21 + $0x2b] sm:$0xff]  ;;  %v600_v39 = vld [vmem:[%s1761_s21 + $0x3c] sm:$0xff] }
  0x5e   : > { %1386 = vmatmul.mubr.msk.bf16.vlgmr.msra.gmra.mrb[0].mxu1 %vm227_vm1, %v209_v45  ;;  %v501_v41 = vpack.c.bf16 %v496_v36, %v495_v35  ;;  %v906_v45 = vld [vmem:[%s1761_s21 + $0x3f] sm:$0xff]  ;;  %v598_v51 = vld [vmem:[%s1761_s21 + $0x2c] sm:$0xff]  ;;  %v599_v30 = vld [vmem:[%s1761_s21 + $0x34] sm:$0xff] }
  0x5f   : > { %1394 = vmatpush3.bf16.msra.mxu1 %v416_v48  ;;  %1389 = vmatprep.mubr.msk.bf16.mxu1 %vm227_vm1, %v210_v47  ;;  %v910_v46 = vpack.c.bf16 %v906_v45, %v905_v44  ;;  %v497_v47 = vld [vmem:[%s1761_s21 + $0x33] sm:$0xff]  ;;  %v498_v48 = vld [vmem:[%s1761_s21 + $0x3b] sm:$0xff]  ;;  %v604_v58 = vpack.c.bf16 %v600_v39, %v599_v30 }
  0x60   : > { %1532 = vmatprep.subr.msk.bf16.mxu1 %vm240_vm0, %v504_v53  ;;  %v502_v52 = vpack.c.bf16 %v498_v48, %v497_v47  ;;  %v603_v53 = vpack.c.bf16 %v598_v51, %v597_v50 }
  0x63   : > { %1430 = vmatmul.mubr.msk.bf16.gmra.mrb[4].mxu0 %vm227_vm1, %v706_v54  ;;  %v1011_v54 = vpack.c.bf16 %v1839_v55, %v1821_v43 }
  0x64   : > { %1435 = vmatprep.mubr.msk.bf16.mxu0 %vm227_vm1, %v805_v57  ;;  %v1008_v57 = vld [vmem:[%s1761_s21 + $0x40] sm:$0xff] }
  0x65   : > { %v1012_v59 = vpack.c.bf16 %v1008_v57, %v1842_v56 }
  0x66   : > { %1390 = vmatmul.mubr.msk.bf16.gmra.mrb[4].mxu1 %vm227_vm1, %v211_v60 }
  0x67   : > { %1395 = vmatprep.mubr.msk.bf16.mxu1 %vm227_vm1, %v397_v61  ;;  %v1325_v61 = vld [vmem:[#allocation4] ss:$0 sm:$0xff] }
  0x6b   : > { %1436 = vmatmul.mubr.msk.bf16.vlgmr.msra.gmra.mrb[0].mxu0 %vm227_vm1, %v806_v3 }
  0x6c   : > { %1444 = vmatpush3.bf16.msra.mxu0 %v926_v10  ;;  %1439 = vmatprep.mubr.msk.bf16.mxu0 %vm227_vm1, %v807_v7 }
  0x6d   : > { %1538 = vmatprep.subr.msk.bf16.mxu0 %vm240_vm0, %v1014_v12 }
  0x6e   : > { %1396 = vmatmul.mubr.msk.bf16.vlgmr.msra.gmra.mrb[0].mxu1 %vm227_vm1, %v398_v11 }
  0x6f   : > { %1404 = vmatpush3.bf16.msra.mxu1 %v518_v14  ;;  %1399 = vmatprep.mubr.msk.bf16.mxu1 %vm227_vm1, %v399_v13 }
  0x70   : > { %1534 = vmatprep.subr.msk.bf16.mxu1 %vm240_vm0, %v1763_v1  ;;  %v494_v1 = vld [vmem:[%s1761_s21 + $0x1b] sm:$0xff] }
  0x71   : > { %v500_v38 = vpack.c.bf16 %v494_v1, %v493_v33 }
  0x73   : > { %1440 = vmatmul.mubr.msk.bf16.gmra.mrb[4].mxu0 %vm227_vm1, %v808_v19 }
  0x74   : > { %1445 = vmatprep.mubr.msk.bf16.mxu0 %vm227_vm1, %v907_v22 }
  0x76   : > { %1400 = vmatmul.mubr.msk.bf16.gmra.mrb[4].mxu1 %vm227_vm1, %v400_v25 }
  0x77   : > { %1405 = vmatprep.mubr.msk.bf16.mxu1 %vm227_vm1, %v499_v26 }
  0x7b   : > { %1446 = vmatmul.mubr.msk.bf16.vlgmr.msra.gmra.mrb[0].mxu0 %vm227_vm1, %v908_v32 }
  0x7c   : > { %1454 = vmatpush3.bf16.msra.mxu0 %v1028_v37  ;;  %1449 = vmatprep.mubr.msk.bf16.mxu0 %vm227_vm1, %v909_v34 }
  0x7e   : > { %1406 = vmatmul.mubr.msk.bf16.vlgmr.msra.gmra.mrb[0].mxu1 %vm227_vm1, %v500_v38 }
  0x7f   : > { %1464 = vmatpush3.bf16.msra.mxu1 %v1772_v4  ;;  %1409 = vmatprep.mubr.msk.bf16.mxu1 %vm227_vm1, %v501_v41  ;;  %v1010_v4 = vpack.c.bf16 %v1818_v42, %v1815_v40  ;;  %v1649_v40 = vmov 0.0  }
  0x80   : > { %1174 = vst [vmem:[%s1924_s25] sm:$0xff] %v1649_v40  ;;  %1176 = vst [vmem:[%s1924_s25 + $0x10] sm:$0xff] %v1649_v40 }
  0x83   : > { %1450 = vmatmul.mubr.msk.bf16.gmra.mrb[4].mxu0 %vm227_vm1, %v910_v46 }
  0x84   : > { %1455 = vmatprep.mubr.msk.bf16.mxu0 %vm227_vm1, %v1009_v49 }
  0x86   : > { %1410 = vmatmul.mubr.msk.bf16.gmra.mrb[4].mxu1 %vm227_vm1, %v502_v52 }
  0x87   : > { %1419 = vmatprep.mubr.msk.bf16.mxu1 %vm227_vm1, %v603_v53 }
  0x8b   : > { %1456 = vmatmul.mubr.msk.bf16.vlgmr.msra.gmra.mrb[0].mxu0 %vm227_vm1, %v1010_v4 }
  0x8c   : > { %1459 = vmatprep.mubr.msk.bf16.mxu0 %vm227_vm1, %v1011_v54 }
  0x92   : > { %1420 = vmatmul.mubr.msk.bf16.vlgmr.msra.gmra.mrb[4].mxu1 %vm227_vm1, %v604_v58 }
  0x93   : > { %1460 = vmatmul.mubr.msk.bf16.gmra.mrb[4].mxu0 %vm227_vm1, %v1012_v59 }
 0x151   : > { %v1407_v42 = vpop.f32.mrb[0].mxu1 }
 0x152   : > { %v554_v43 = vpop.f32.mrb[1].mxu1 }
 0x153   : > { %v1408_v55 = vpop.f32.mrb[2].mxu1 }
 0x154   : > { %v557_v60 = vpop.f32.mrb[3].mxu1 }
 0x15e   : > { %v1457_v56 = vpop.f32.mrb[0].mxu0 }
 0x15f   : > { %v1465_v62 = vadd.f32 %v1457_v56, %v1407_v42  ;;  %v1064_v63 = vpop.f32.mrb[1].mxu0 }
 0x160   : > { %v1466_v0 = vadd.f32 %v1064_v63, %v554_v43  ;;  %v1458_v2 = vpop.f32.mrb[2].mxu0 }
 0x161   : > { %v1112_v3 = vadd.f32 %v1465_v62, %v1325_v61  ;;  %v1467_v5 = vadd.f32 %v1458_v2, %v1408_v55  ;;  %v1067_v6 = vpop.f32.mrb[3].mxu0 }
 0x162   : > { %v1110_v7 = vadd.f32 %v1466_v0, %v1325_v61  ;;  %v1468_v8 = vadd.f32 %v1067_v6, %v557_v60 }
 0x163   : > { %v1120_v9 = vmax.f32 %v1112_v3, 0.0  ;;  %v1113_v10 = vadd.f32 %v1467_v5, %v1325_v61 }
 0x164   : > { %v1118_v11 = vmax.f32 %v1110_v7, 0.0  ;;  %v1111_v12 = vadd.f32 %v1468_v8, %v1325_v61 }
 0x165   : > { %v1138_v13 = vrot.slane %v1120_v9, 4  ;;  %v1121_v14 = vmax.f32 %v1113_v10, 0.0  ;;  %v1421_v15 = vpop.f32.mrb[4].mxu1 }
 0x166   : > { %v1126_v16 = vrot.slane %v1118_v11, 4  ;;  %v1119_v17 = vmax.f32 %v1111_v12, 0.0  ;;  %v1461_v18 = vpop.f32.mrb[4].mxu0  ;;  %v672_v19 = vpop.f32.mrb[5].mxu1 }
 0x167   : > { %v1139_v20 = vmax.f32 %v1120_v9, %v1138_v13  ;;  %v1144_v21 = vrot.slane %v1121_v14, 4  ;;  %v1469_v22 = vadd.f32 %v1461_v18, %v1421_v15  ;;  %v1080_v23 = vpop.f32.mrb[5].mxu0  ;;  %v1422_v24 = vpop.f32.mrb[6].mxu1 }
 0x168   : > { %v1127_v25 = vmax.f32 %v1118_v11, %v1126_v16  ;;  %v1132_v26 = vrot.slane %v1119_v17, 4  ;;  %v1470_v27 = vadd.f32 %v1080_v23, %v672_v19  ;;  %v1462_v28 = vpop.f32.mrb[6].mxu0  ;;  %v675_v29 = vpop.f32.mrb[7].mxu1 }
 0x169   : > { %v1140_v31 = vrot.slane %v1139_v20, 2  ;;  %v1145_v32 = vmax.f32 %v1121_v14, %v1144_v21  ;;  %v1116_v33 = vadd.f32 %v1469_v22, %v1325_v61  ;;  %v1471_v1 = vadd.f32 %v1462_v28, %v1422_v24  ;;  %v1083_v34 = vpop.f32.mrb[7].mxu0 }
 0x16a   : > { %v1128_v35 = vrot.slane %v1127_v25, 2  ;;  %v1133_v36 = vmax.f32 %v1119_v17, %v1132_v26  ;;  %v1114_v37 = vadd.f32 %v1470_v27, %v1325_v61  ;;  %v1472_v38 = vadd.f32 %v1083_v34, %v675_v29 }
 0x16b   : > { %v1141_v41 = vmax.f32 %v1139_v20, %v1140_v31  ;;  %v1146_v44 = vrot.slane %v1145_v32, 2  ;;  %v1124_v45 = vmax.f32 %v1116_v33, 0.0  ;;  %v1117_v46 = vadd.f32 %v1471_v1, %v1325_v61 }
 0x16c   : > { %v1129_v47 = vmax.f32 %v1127_v25, %v1128_v35  ;;  %v1134_v48 = vrot.slane %v1133_v36, 2  ;;  %v1122_v49 = vmax.f32 %v1114_v37, 0.0  ;;  %v1115_v50 = vadd.f32 %v1472_v38, %v1325_v61 }
 0x16d   : > { %v1147_v51 = vmax.f32 %v1145_v32, %v1146_v44  ;;  %v1162_v52 = vrot.slane %v1124_v45, 4  ;;  %v1125_v53 = vmax.f32 %v1117_v46, 0.0  ;;  %v1142_v57 = vrot.slane %v1141_v41, 1 }
 0x16e   : > { %v1130_v4 = vrot.slane %v1129_v47, 1  ;;  %v1135_v54 = vmax.f32 %v1133_v36, %v1134_v48  ;;  %v1150_v30 = vrot.slane %v1122_v49, 4  ;;  %v1123_v39 = vmax.f32 %v1115_v50, 0.0 }
 0x16f   : > { %v1163_v58 = vmax.f32 %v1124_v45, %v1162_v52  ;;  %v1168_v59 = vrot.slane %v1125_v53, 4  ;;  %v1148_v40 = vrot.slane %v1147_v51, 1  ;;  %v1143_v2 = vmax.f32 %v1141_v41, %v1142_v57 }
 0x170   : > { %v1136_v42 = vrot.slane %v1135_v54, 1  ;;  %v1151_v43 = vmax.f32 %v1122_v49, %v1150_v30  ;;  %v1156_v55 = vrot.slane %v1123_v39, 4  ;;  %v1131_v62 = vmax.f32 %v1129_v47, %v1130_v4 }
 0x171   : > { %v1164_v60 = vrot.slane %v1163_v58, 2  ;;  %v1169_v56 = vmax.f32 %v1125_v53, %v1168_v59  ;;  %v1149_v6 = vmax.f32 %v1147_v51, %v1148_v40 }
 0x172   : > { %v1137_v61 = vmax.f32 %v1135_v54, %v1136_v42  ;;  %v1152_v63 = vrot.slane %v1151_v43, 2  ;;  %v1157_v0 = vmax.f32 %v1123_v39, %v1156_v55 }
 0x173   : > { %v1165_v3 = vmax.f32 %v1163_v58, %v1164_v60  ;;  %v1170_v5 = vrot.slane %v1169_v56, 2 }
 0x174   : > { %v1186_v7 = vsel %vm1185_vm2, %v1137_v61, %v1131_v62  ;;  %v1153_v8 = vmax.f32 %v1151_v43, %v1152_v63  ;;  %v1158_v9 = vrot.slane %v1157_v0, 2 }
 0x175   : > { %v1188_v10 = vsel %vm1187_vm3, %v1143_v2, %v1186_v7  ;;  %v1171_v11 = vmax.f32 %v1169_v56, %v1170_v5  ;;  %v1166_v15 = vrot.slane %v1165_v3, 1 }
 0x176   : > { %v1154_v12 = vrot.slane %v1153_v8, 1  ;;  %v1190_v13 = vsel %vm1189_vm4, %v1149_v6, %v1188_v10  ;;  %v1159_v14 = vmax.f32 %v1157_v0, %v1158_v9 }
 0x177   : > { %v1172_v17 = vrot.slane %v1171_v11, 1  ;;  %v1167_v21 = vmax.f32 %v1165_v3, %v1166_v15 }
 0x178   : > { %v1155_v16 = vmax.f32 %v1153_v8, %v1154_v12  ;;  %v1160_v18 = vrot.slane %v1159_v14, 1 }
 0x179   : > { %v1173_v22 = vmax.f32 %v1171_v11, %v1172_v17 }
 0x17a   : > { %v1192_v19 = vsel %vm1191_vm5, %v1155_v16, %v1190_v13  ;;  %v1161_v20 = vmax.f32 %v1159_v14, %v1160_v18 }
 0x17c   : > { %v1194_v23 = vsel %vm1193_vm6, %v1161_v20, %v1192_v19 }
 0x17d   : > { %v1196_v24 = vsel %vm1195_vm7, %v1167_v21, %v1194_v23 }
 0x17e   : > { %v1198_v25 = vsel %vm1197_vm8, %v1173_v22, %v1196_v24 }
 0x17f   : > { %1200 = vst [vmem:[%s1924_s25 + $0x8] sm:$0xff] %v1198_v25 }
 0x180 PF: > { %s15_s12 = sadd.s32 1, %s1643_s12  }
 0x181   : > { %p12_p5 = scmp.ge.s32.totalorder %s15_s12, 4  }
 0x183   :  { %14 = sbr.rel (!%p12_p5) target bundleno = 2 (0x2), region = 79 }
 0x18a   :  { %1222 = vsyncpa [#allocation3], 1 }
 0x18b   :  { %1224 = vsyncpa [#allocation3 + $0x1], 1 }
 0x18c   :  { %1225 = vsyncpa [#allocation5], 1 }

// kernel: _lambda_.4
= control target key start
LH: loop header
LB: loop body
LE: loop exit
PB: predicated region body
PF: predicated region fallthrough
CT: control target
= control target key end

     0   :  { %12 = vsyncpa [#allocation4], 0  ;;  %s4948_s0 = inlined_call_operand.vmem [shape: f32[2,24,128], index: 0, kind: input, shape index: {}]   ;;  %s4949_s1 = inlined_call_operand.vmem [shape: bf16[8,128,128], index: 1, kind: input, shape index: {}]   ;;  %s4950_s2 = inlined_call_operand.vmem [shape: f32[1,128], index: 2, kind: input, shape index: {}]   ;;  %s4951_s3 = inlined_call_operand.hbm [shape: bf16[8,128,128], index: 3, kind: input, shape index: {}]   ;;  %s4952_s4 = inlined_call_operand.vmem [shape: f32[1,128], index: 4, kind: input, shape index: {}]   ;;  %s4953_s5 = inlined_call_operand.hbm [shape: bf16[8,128,128], index: 5, kind: input, shape index: {}]   ;;  %s4954_s6 = inlined_call_operand.vmem [shape: f32[1,128], index: 6, kind: input, shape index: {}]   ;;  %s4955_s7 = inlined_call_operand.vmem [shape: f32[2,2,128], index: 7, kind: output, shape index: {}]  }
   0x1   :  { %13 = vsyncpa [#allocation6], 0  ;;  %s4384_s24 = smov 0  }
   0x2 LB: > { %s4390_s25 = sadd.s32 4294967295, %s4336_s24   ;;  %p3024_p0 = scmp.ge.s32.totalorder %s4336_s24, 1  ;;  %s4336_s24 = sphi %s4384_s24, %s19_s24  }
   0x3   : > { %p202_p1 = scmp.lt.s32.totalorder %s4336_s24, 3  ;;  %s4338_s26 = smov [#allocation3]  }
   0x4   : > { %s220_s27 = sshll.u32 %s4338_s26, 4  ;;  %p4956_p3 = scmp.eq.s32.totalorder %s4390_s25, 0  ;;  %s221_s27 = int_to_ptr.vmem [resolvable:$true] %s220_s27 }
   0x5   : > { %p4394_p2 = pnand %p3024_p0, %p202_p1  ;;  %s4339_s29 = smov [#allocation5]  }
   0x6   : > { %s236_s30 = sshll.u32 %s4339_s29, 4  ;;  %s4266_s11 = scalar_lea.hbm %s4951_s3, 8192  ;;  %s4407_s30 = int_to_ptr.vmem [resolvable:$true] %s236_s30 }
   0x7   : > { %s4958_s28 = scalar_select %p4394_p2, 1, 0 }
   0x8   : > { %p4047_p4 = pneg %p4394_p2  ;;  %p4267_p6 = scmp.ne.s32.totalorder %s4951_s3, %s4266_s11 }
   0x9   : > { %p4273_p10 = scmp.lt.u32.totalorder %s4266_s11, %s4951_s3 }
   0xa   : > { %p4403_p5 = pnand %p4956_p3, %p4047_p4 }
   0xc   : > { %p4268_p7 = pneg %p4403_p5 }
   0xe   : > { %p4269_p8 = pnand %p4268_p7, %p4267_p6 }
  0x10   : > { %p4270_p9 = pneg %p4269_p8 }
  0x12   : > { %p4275_p11 = pnand %p4273_p10, %p4270_p9 }
  0x14   : > { %4278 = shalt.err (!%p4275_p11)
}
  0x15   : > { %s4279_s16 = scalar_lea.vmem %s221_s27, 8192  ;;  %p4287_p1 = scmp.lt.s32.totalorder %s221_s27, %s221_s27 }
  0x16   : > { %p4280_p12 = scmp.ne.s32.totalorder %s221_s27, %s4279_s16  ;;  %p4288_p4 = scmp.lt.s32.totalorder %s4279_s16, %s4279_s16 }
  0x18   : > { %p4282_p13 = pnand %p4280_p12, %p4268_p7  ;;  %p4289_p3 = por %p4288_p4, %p4287_p1 }
  0x1a   : > { %p4283_p0 = pneg %p4282_p13 }
  0x1c   : > { %p4290_p2 = pnand %p4289_p3, %p4283_p0 }
  0x1e   : > { %4293 = shalt.err (!%p4290_p2)
}
  0x1f   : > { %s4340_s17 = smov 64   ;;  %s4341_s18 = smov 4  }
  0x20   : > { %4050 = dma.hbm_to_vmem [thread:$0]  (!%p4403_p5), %s4951_s3, 8192, %s221_s27, [#allocation4], %s4340_s17, %s4340_s17, %s4341_s18  }
  0x21   : > { %s4294_s23 = scalar_lea.hbm %s4953_s5, 8192 }
  0x22   : > { %p4295_p6 = scmp.ne.s32.totalorder %s4953_s5, %s4294_s23  ;;  %p4301_p8 = scmp.lt.u32.totalorder %s4294_s23, %s4953_s5 }
  0x24   : > { %p4297_p2 = pnand %p4295_p6, %p4268_p7 }
  0x26   : > { %p4298_p3 = pneg %p4297_p2 }
  0x28   : > { %p4303_p9 = pnand %p4301_p8, %p4298_p3 }
  0x2a   : > { %4306 = shalt.err (!%p4303_p9)
}
  0x2b   : > { %s4307_s27 = scalar_lea.vmem %s4407_s30, 8192  ;;  %p4315_p13 = scmp.lt.s32.totalorder %s4407_s30, %s4407_s30 }
  0x2c   : > { %p4308_p10 = scmp.ne.s32.totalorder %s4407_s30, %s4307_s27  ;;  %p4316_p0 = scmp.lt.s32.totalorder %s4307_s27, %s4307_s27 }
  0x2e   : > { %p4310_p11 = pnand %p4308_p10, %p4268_p7  ;;  %p4317_p1 = por %p4316_p0, %p4315_p13 }
  0x30   : > { %p4311_p12 = pneg %p4310_p11 }
  0x32   : > { %p4318_p4 = pnand %p4317_p1, %p4311_p12 }
  0x34   : > { %4321 = shalt.err (!%p4318_p4)
}
  0x35   : > { %4053 = dma.hbm_to_vmem [thread:$0]  (!%p4403_p5), %s4953_s5, 8192, %s4407_s30, [#allocation6], %s4340_s17, %s4340_s17, %s4341_s18  }
  0x36   : > { %p4960_p6 = scmp.ne.s32.totalorder %s4958_s28, 0 }
  0x37   : > { %p4961_p2 = scmp.eq.s32.totalorder (!%p4960_p6), %s4390_s25, 0 }
  0x38   : > { %263 = sbr.rel (%p4960_p6) target bundleno = 1086 (0x43e), region = 48 }
  0x3f   : > { %4327 = dma.done.wait (%p4961_p2), [#allocation4], 8192   ;;  %p4962_p7 = pmov %p4961_p2 }
  0x40   : > { %p4963_p3 = pmov %p4961_p2 }
  0x41   : > { %4329 = vsyncadd (%p4962_p7), [#allocation4], 4294959104 }
  0x42   : > { %4331 = dma.done.wait (%p4963_p3), [#allocation6], 8192   ;;  %p4964_p8 = pmov %p4961_p2 }
  0x43   : > { %v4342_v0 = vmov 0.0   ;;  %vm4343_vm0 = vmmov 0   ;;  %v4072_v1 = vld [vmem:[%s4949_s1 + $0x40] sm:$0xff]   ;;  %v4074_v3 = vld [vmem:[%s4949_s1 + $0x48] sm:$0xff]   ;;  %v4076_v5 = vld [vmem:[%s4949_s1 + $0x50] sm:$0xff]   ;;  %p298_p5 = scmp.lt.s32.totalorder %s4390_s25, 1 }
  0x44   : > { %4333 = vsyncadd (%p4964_p8), [#allocation6], 4294959104  ;;  %3558 = vmatprep.subr.bf16.mxu0 %v4342_v0  ;;  %1178 = vst [vmem:[#allocation2] sm:$0xff] %v4342_v0  ;;  %3578 = vmatprep.subr.bf16.mxu1 %v4342_v0  ;;  %v4073_v2 = vld [vmem:[%s4949_s1] sm:$0xff]   ;;  %v4075_v4 = vld [vmem:[%s4949_s1 + $0x8] sm:$0xff]   ;;  %vm2926_vm1 = vcmask 1043456  }
  0x45   : > { %1180 = vst [vmem:[#allocation2 + $0x10] sm:$0xff] %v4342_v0  ;;  %3574 = vmatprep.mubr.msk.bf16.mxu0 %vm4343_vm0, %v4342_v0  ;;  %3594 = vmatprep.mubr.msk.bf16.mxu1 %vm4343_vm0, %v4342_v0  ;;  %v4077_v6 = vld [vmem:[%s4949_s1 + $0x10] sm:$0xff]   ;;  %v4078_v7 = vld [vmem:[%s4949_s1 + $0x58] sm:$0xff]   ;;  %v4080_v9 = vld [vmem:[%s4949_s1 + $0x60] sm:$0xff]   ;;  %s4966_s25 = smov (!%p298_p5, %s4390_s25), 1  ;;  %vm2943_vm2 = vcmask 1041409  }
  0x46   : > { %3559 = vmatpush3.bf16.msra.mxu0 %v4072_v1  ;;  %3579 = vmatpush3.bf16.msra.mxu1 %v4073_v2  ;;  %v4079_v8 = vld [vmem:[%s4949_s1 + $0x18] sm:$0xff]   ;;  %v4081_v10 = vld [vmem:[%s4949_s1 + $0x20] sm:$0xff]   ;;  %v4082_v11 = vld [vmem:[%s4949_s1 + $0x68] sm:$0xff]   ;;  %s4038_s13 = smul.u32 24, %s4966_s25  ;;  %s3032_s9 = sshll.u32 %s4966_s25, 1 }
  0x47   : > { %3560 = vmatprep.subr.bf16.mxu0 %v4342_v0  ;;  %3580 = vmatprep.subr.bf16.mxu1 %v4342_v0  ;;  %v4083_v12 = vld [vmem:[%s4949_s1 + $0x28] sm:$0xff]   ;;  %v4084_v13 = vld [vmem:[%s4949_s1 + $0x70] sm:$0xff]   ;;  %v4086_v15 = vld [vmem:[%s4949_s1 + $0x78] sm:$0xff]   ;;  %s306_s11 = scalar_lea.vmem %s4955_s7, %s3032_s9 }
  0x48   : > { %v4085_v14 = vld [vmem:[%s4949_s1 + $0x30] sm:$0xff]   ;;  %s4535_s20 = scalar_lea.vmem %s4948_s0, %s4038_s13  ;;  %v4087_v16 = vld [vmem:[%s4949_s1 + $0x38] sm:$0xff]   ;;  %v4088_v21 = vld [vmem:[%s4949_s1 + $0x80] sm:$0xff]  }
  0x49   : > { %v326_v17 = vld [vmem:[%s4535_s20 + $0x6] sm:$0xff]  ;;  %v4092_v25 = vld [vmem:[%s4949_s1 + $0x90] sm:$0xff]   ;;  %v4094_v27 = vld [vmem:[%s4949_s1 + $0x98] sm:$0xff]  }
  0x4a   : > { %3561 = vmatpush3.bf16.msra.mxu0 %v4074_v3  ;;  %3581 = vmatpush3.bf16.msra.mxu1 %v4075_v4  ;;  %v308_v18 = vld [vmem:[%s4535_s20 + $0x5] sm:$0xff]  ;;  %v327_v19 = vpack.c.bf16 %v326_v17, %v326_v17  ;;  %v4093_v26 = vld [vmem:[%s4949_s1 + $0xd0] sm:$0xff]   ;;  %v4095_v28 = vld [vmem:[%s4949_s1 + $0xd8] sm:$0xff]  }
  0x4b   : > { %3562 = vmatprep.subr.bf16.mxu0 %v4342_v0  ;;  %3582 = vmatprep.subr.bf16.mxu1 %v4342_v0  ;;  %v309_v20 = vpack.c.bf16 %v308_v18, %v308_v18  ;;  %v4089_v22 = vld [vmem:[%s4949_s1 + $0xc0] sm:$0xff]   ;;  %v4090_v23 = vld [vmem:[%s4949_s1 + $0x88] sm:$0xff]   ;;  %v4100_v33 = vld [vmem:[%s4949_s1 + $0xb0] sm:$0xff]  }
  0x4c   : > { %v4091_v24 = vld [vmem:[%s4949_s1 + $0xc8] sm:$0xff]   ;;  %v4096_v29 = vld [vmem:[%s4949_s1 + $0xa0] sm:$0xff]   ;;  %v4101_v34 = vld [vmem:[%s4949_s1 + $0xf0] sm:$0xff]  }
  0x4d   : > { %v4097_v30 = vld [vmem:[%s4949_s1 + $0xe0] sm:$0xff]   ;;  %v4098_v31 = vld [vmem:[%s4949_s1 + $0xa8] sm:$0xff]   ;;  %v4102_v35 = vld [vmem:[%s4949_s1 + $0xb8] sm:$0xff]  }
  0x4e   : > { %3563 = vmatpush3.bf16.msra.mxu0 %v4076_v5  ;;  %3583 = vmatpush3.bf16.msra.mxu1 %v4077_v6  ;;  %v4099_v32 = vld [vmem:[%s4949_s1 + $0xe8] sm:$0xff]   ;;  %v4103_v36 = vld [vmem:[%s4949_s1 + $0xf8] sm:$0xff]   ;;  %v4104_v41 = vld [vmem:[%s4949_s1 + $0x100] sm:$0xff]  }
  0x4f   : > { %3564 = vmatprep.subr.bf16.mxu0 %v4342_v0  ;;  %3584 = vmatprep.subr.bf16.mxu1 %v4342_v0  ;;  %v521_v37 = vld [vmem:[%s4535_s20 + $0x7] sm:$0xff]  ;;  %v4108_v45 = vld [vmem:[%s4949_s1 + $0x110] sm:$0xff]   ;;  %v4110_v47 = vld [vmem:[%s4949_s1 + $0x118] sm:$0xff]  }
  0x50   : > { %v629_v38 = vld [vmem:[%s4535_s20 + $0x8] sm:$0xff]  ;;  %v522_v39 = vpack.c.bf16 %v521_v37, %v521_v37  ;;  %v4105_v42 = vld [vmem:[%s4949_s1 + $0x140] sm:$0xff]   ;;  %v4109_v46 = vld [vmem:[%s4949_s1 + $0x150] sm:$0xff]  }
  0x51   : > { %v630_v40 = vpack.c.bf16 %v629_v38, %v629_v38  ;;  %v4106_v43 = vld [vmem:[%s4949_s1 + $0x108] sm:$0xff]   ;;  %v4111_v48 = vld [vmem:[%s4949_s1 + $0x158] sm:$0xff]   ;;  %v4112_v49 = vld [vmem:[%s4949_s1 + $0x120] sm:$0xff]  }
  0x52   : > { %3565 = vmatpush3.bf16.msra.mxu0 %v4078_v7  ;;  %3585 = vmatpush3.bf16.msra.mxu1 %v4079_v8  ;;  %v4107_v44 = vld [vmem:[%s4949_s1 + $0x148] sm:$0xff]   ;;  %v4113_v50 = vld [vmem:[%s4949_s1 + $0x160] sm:$0xff]   ;;  %v4116_v53 = vld [vmem:[%s4949_s1 + $0x130] sm:$0xff]  }
  0x53   : > { %3566 = vmatprep.subr.bf16.mxu0 %v4342_v0  ;;  %3586 = vmatprep.subr.bf16.mxu1 %v4342_v0  ;;  %v4114_v51 = vld [vmem:[%s4949_s1 + $0x128] sm:$0xff]   ;;  %v4117_v54 = vld [vmem:[%s4949_s1 + $0x170] sm:$0xff]   ;;  %v4118_v55 = vld [vmem:[%s4949_s1 + $0x138] sm:$0xff]  }
  0x54   : > { %v4115_v52 = vld [vmem:[%s4949_s1 + $0x168] sm:$0xff]   ;;  %v4119_v57 = vld [vmem:[%s4949_s1 + $0x178] sm:$0xff]   ;;  %v4120_v59 = vld [vmem:[%s4949_s1 + $0x180] sm:$0xff]  }
  0x55   : > { %v737_v56 = vld [vmem:[%s4535_s20 + $0x9] sm:$0xff]  ;;  %v4121_v61 = vld [vmem:[%s4949_s1 + $0x1c0] sm:$0xff]   ;;  %v4126_v4 = vld [vmem:[%s4949_s1 + $0x198] sm:$0xff]  }
  0x56   : > { %3567 = vmatpush3.bf16.msra.mxu0 %v4080_v9  ;;  %3587 = vmatpush3.bf16.msra.mxu1 %v4081_v10  ;;  %v845_v58 = vld [vmem:[%s4535_s20 + $0xa] sm:$0xff]  ;;  %v738_v60 = vpack.c.bf16 %v737_v56, %v737_v56  ;;  %v4127_v5 = vld [vmem:[%s4949_s1 + $0x1d8] sm:$0xff]   ;;  %v4128_v6 = vld [vmem:[%s4949_s1 + $0x1a0] sm:$0xff]  }
  0x57   : > { %3568 = vmatprep.subr.bf16.mxu0 %v4342_v0  ;;  %3588 = vmatprep.subr.bf16.mxu1 %v4342_v0  ;;  %v846_v62 = vpack.c.bf16 %v845_v58, %v845_v58  ;;  %v4122_v63 = vld [vmem:[%s4949_s1 + $0x188] sm:$0xff]   ;;  %v4124_v2 = vld [vmem:[%s4949_s1 + $0x190] sm:$0xff]   ;;  %v4129_v7 = vld [vmem:[%s4949_s1 + $0x1e0] sm:$0xff]  }
  0x58   : > { %v4123_v1 = vld [vmem:[%s4949_s1 + $0x1c8] sm:$0xff]   ;;  %v4125_v3 = vld [vmem:[%s4949_s1 + $0x1d0] sm:$0xff]   ;;  %v4136_v18 = vld [vmem:[#allocation3 + $0x40] sm:$0xff]  }
  0x59   : > { %v4130_v8 = vld [vmem:[%s4949_s1 + $0x1a8] sm:$0xff]   ;;  %v4132_v10 = vld [vmem:[%s4949_s1 + $0x1b0] sm:$0xff]  }
  0x5a   : > { %3569 = vmatpush3.bf16.msra.mxu0 %v4082_v11  ;;  %3589 = vmatpush3.bf16.msra.mxu1 %v4083_v12  ;;  %v4131_v9 = vld [vmem:[%s4949_s1 + $0x1e8] sm:$0xff]   ;;  %v4133_v11 = vld [vmem:[%s4949_s1 + $0x1f0] sm:$0xff]   ;;  %v4134_v12 = vld [vmem:[%s4949_s1 + $0x1b8] sm:$0xff]  }
  0x5b   : > { %3570 = vmatprep.subr.bf16.mxu0 %v4342_v0  ;;  %3590 = vmatprep.subr.bf16.mxu1 %v4342_v0 }
  0x5e   : > { %3571 = vmatpush3.bf16.msra.mxu0 %v4084_v13  ;;  %3591 = vmatpush3.bf16.msra.mxu1 %v4085_v14  ;;  %v953_v13 = vld [vmem:[%s4535_s20 + $0xb] sm:$0xff]  ;;  %v4135_v14 = vld [vmem:[%s4949_s1 + $0x1f8] sm:$0xff]  }
  0x5f   : > { %3572 = vmatprep.subr.bf16.mxu0 %v4342_v0  ;;  %3592 = vmatprep.subr.bf16.mxu1 %v4342_v0  ;;  %v954_v17 = vpack.c.bf16 %v953_v13, %v953_v13  ;;  %v4152_v13 = vld [vmem:[#allocation3 + $0x80] sm:$0xff]  }
  0x62   : > { %3573 = vmatpush3.bf16.msra.mxu0 %v4086_v15  ;;  %3593 = vmatpush3.bf16.msra.mxu1 %v4087_v16  ;;  %v1061_v15 = vld [vmem:[%s4535_s20 + $0xc] sm:$0xff]  ;;  %v4756_v16 = vld [vmem:[#allocation2] sm:$0xff] }
  0x63   : > { %3598 = vmatprep.subr.bf16.mxu0 %v4342_v0  ;;  %3618 = vmatprep.subr.bf16.mxu1 %v4342_v0 }
  0x65   : > { %3575 = vmatmul.mubr.bf16.vlgmr.msra.gmra.mrb[0].mxu0 %v327_v19  ;;  %3595 = vmatmul.mubr.bf16.vlgmr.msra.gmra.mrb[0].mxu1 %v309_v20  ;;  %v4137_v19 = vld [vmem:[#allocation3] sm:$0xff]   ;;  %v4138_v20 = vld [vmem:[#allocation3 + $0x48] sm:$0xff]  }
  0x66   : > { %3599 = vmatpush3.bf16.msra.mxu0 %v4088_v21  ;;  %3619 = vmatpush3.bf16.msra.mxu1 %v4089_v22  ;;  %v4139_v21 = vld [vmem:[#allocation3 + $0x8] sm:$0xff]   ;;  %v4140_v22 = vld [vmem:[#allocation3 + $0x50] sm:$0xff]  }
  0x67   : > { %3600 = vmatprep.subr.bf16.mxu0 %v4342_v0  ;;  %3620 = vmatprep.subr.bf16.mxu1 %v4342_v0 }
  0x68   : > { %3614 = vmatprep.mubr.msk.bf16.mxu0 %vm4343_vm0, %v4342_v0  ;;  %3634 = vmatprep.mubr.msk.bf16.mxu1 %vm4343_vm0, %v4342_v0 }
  0x6a   : > { %3601 = vmatpush3.bf16.msra.mxu0 %v4090_v23  ;;  %3621 = vmatpush3.bf16.msra.mxu1 %v4091_v24  ;;  %v4141_v23 = vld [vmem:[#allocation3 + $0x10] sm:$0xff]   ;;  %v4142_v24 = vld [vmem:[#allocation3 + $0x58] sm:$0xff]  }
  0x6b   : > { %3602 = vmatprep.subr.bf16.mxu0 %v4342_v0  ;;  %3622 = vmatprep.subr.bf16.mxu1 %v4342_v0 }
  0x6e   : > { %3603 = vmatpush3.bf16.msra.mxu0 %v4092_v25  ;;  %3623 = vmatpush3.bf16.msra.mxu1 %v4093_v26  ;;  %v4143_v25 = vld [vmem:[#allocation3 + $0x18] sm:$0xff]   ;;  %v4144_v26 = vld [vmem:[#allocation3 + $0x60] sm:$0xff]  }
  0x6f   : > { %3604 = vmatprep.subr.bf16.mxu0 %v4342_v0  ;;  %3624 = vmatprep.subr.bf16.mxu1 %v4342_v0 }
  0x72   : > { %3605 = vmatpush3.bf16.msra.mxu0 %v4094_v27  ;;  %3625 = vmatpush3.bf16.msra.mxu1 %v4095_v28  ;;  %v4145_v27 = vld [vmem:[#allocation3 + $0x20] sm:$0xff]   ;;  %v4146_v28 = vld [vmem:[#allocation3 + $0x68] sm:$0xff]  }
  0x73   : > { %3606 = vmatprep.subr.bf16.mxu0 %v4342_v0  ;;  %3626 = vmatprep.subr.bf16.mxu1 %v4342_v0 }
  0x76   : > { %3607 = vmatpush3.bf16.msra.mxu0 %v4096_v29  ;;  %3627 = vmatpush3.bf16.msra.mxu1 %v4097_v30  ;;  %v4147_v29 = vld [vmem:[#allocation3 + $0x28] sm:$0xff]   ;;  %v4148_v30 = vld [vmem:[#allocation3 + $0x70] sm:$0xff]  }
  0x77   : > { %3608 = vmatprep.subr.bf16.mxu0 %v4342_v0  ;;  %3628 = vmatprep.subr.bf16.mxu1 %v4342_v0 }
  0x7a   : > { %3609 = vmatpush3.bf16.msra.mxu0 %v4098_v31  ;;  %3629 = vmatpush3.bf16.msra.mxu1 %v4099_v32  ;;  %v4149_v31 = vld [vmem:[#allocation3 + $0x30] sm:$0xff]   ;;  %v4150_v32 = vld [vmem:[#allocation3 + $0x78] sm:$0xff]  }
  0x7b   : > { %3610 = vmatprep.subr.bf16.mxu0 %v4342_v0  ;;  %3630 = vmatprep.subr.bf16.mxu1 %v4342_v0 }
  0x7e   : > { %3611 = vmatpush3.bf16.msra.mxu0 %v4100_v33  ;;  %3631 = vmatpush3.bf16.msra.mxu1 %v4101_v34  ;;  %v4151_v33 = vld [vmem:[#allocation3 + $0x38] sm:$0xff]  }
  0x7f   : > { %3612 = vmatprep.subr.bf16.mxu0 %v4342_v0  ;;  %3632 = vmatprep.subr.bf16.mxu1 %v4342_v0 }
  0x82   : > { %3613 = vmatpush3.bf16.msra.mxu0 %v4102_v35  ;;  %3633 = vmatpush3.bf16.msra.mxu1 %v4103_v36 }
  0x83   : > { %3638 = vmatprep.subr.bf16.mxu0 %v4342_v0  ;;  %3658 = vmatprep.subr.bf16.mxu1 %v4342_v0 }
  0x85   : > { %3615 = vmatmul.mubr.bf16.vlgmr.msra.gmra.mrb[4].mxu0 %v522_v39  ;;  %3635 = vmatmul.mubr.bf16.vlgmr.msra.gmra.mrb[4].mxu1 %v630_v40 }
  0x86   : > { %3639 = vmatpush3.bf16.msra.mxu0 %v4104_v41  ;;  %3659 = vmatpush3.bf16.msra.mxu1 %v4105_v42 }
  0x87   : > { %3640 = vmatprep.subr.bf16.mxu0 %v4342_v0  ;;  %3660 = vmatprep.subr.bf16.mxu1 %v4342_v0 }
  0x88   : > { %3654 = vmatprep.mubr.msk.bf16.mxu0 %vm4343_vm0, %v4342_v0  ;;  %3674 = vmatprep.mubr.msk.bf16.mxu1 %vm4343_vm0, %v4342_v0 }
  0x8a   : > { %3641 = vmatpush3.bf16.msra.mxu0 %v4106_v43  ;;  %3661 = vmatpush3.bf16.msra.mxu1 %v4107_v44 }
  0x8b   : > { %3642 = vmatprep.subr.bf16.mxu0 %v4342_v0  ;;  %3662 = vmatprep.subr.bf16.mxu1 %v4342_v0 }
  0x8e   : > { %3643 = vmatpush3.bf16.msra.mxu0 %v4108_v45  ;;  %3663 = vmatpush3.bf16.msra.mxu1 %v4109_v46 }
  0x8f   : > { %3644 = vmatprep.subr.bf16.mxu0 %v4342_v0  ;;  %3664 = vmatprep.subr.bf16.mxu1 %v4342_v0 }
  0x92   : > { %3645 = vmatpush3.bf16.msra.mxu0 %v4110_v47  ;;  %3665 = vmatpush3.bf16.msra.mxu1 %v4111_v48 }
  0x93   : > { %3646 = vmatprep.subr.bf16.mxu0 %v4342_v0  ;;  %3666 = vmatprep.subr.bf16.mxu1 %v4342_v0 }
  0x96   : > { %3647 = vmatpush3.bf16.msra.mxu0 %v4112_v49  ;;  %3667 = vmatpush3.bf16.msra.mxu1 %v4113_v50 }
  0x97   : > { %3648 = vmatprep.subr.bf16.mxu0 %v4342_v0  ;;  %3668 = vmatprep.subr.bf16.mxu1 %v4342_v0 }
  0x9a   : > { %3649 = vmatpush3.bf16.msra.mxu0 %v4114_v51  ;;  %3669 = vmatpush3.bf16.msra.mxu1 %v4115_v52 }
  0x9b   : > { %3650 = vmatprep.subr.bf16.mxu0 %v4342_v0  ;;  %3670 = vmatprep.subr.bf16.mxu1 %v4342_v0 }
  0x9e   : > { %3651 = vmatpush3.bf16.msra.mxu0 %v4116_v53  ;;  %3671 = vmatpush3.bf16.msra.mxu1 %v4117_v54 }
  0x9f   : > { %3652 = vmatprep.subr.bf16.mxu0 %v4342_v0  ;;  %3672 = vmatprep.subr.bf16.mxu1 %v4342_v0 }
  0xa2   : > { %3653 = vmatpush3.bf16.msra.mxu0 %v4118_v55  ;;  %3673 = vmatpush3.bf16.msra.mxu1 %v4119_v57 }
  0xa3   : > { %3678 = vmatprep.subr.bf16.mxu0 %v4342_v0  ;;  %3698 = vmatprep.subr.bf16.mxu1 %v4342_v0 }
  0xa5   : > { %3655 = vmatmul.mubr.bf16.vlgmr.msra.gmra.mrb[8].mxu0 %v738_v60  ;;  %3675 = vmatmul.mubr.bf16.vlgmr.msra.gmra.mrb[8].mxu1 %v846_v62 }
  0xa6   : > { %3679 = vmatpush3.bf16.msra.mxu0 %v4120_v59  ;;  %3699 = vmatpush3.bf16.msra.mxu1 %v4121_v61 }
  0xa7   : > { %3680 = vmatprep.subr.bf16.mxu0 %v4342_v0  ;;  %3700 = vmatprep.subr.bf16.mxu1 %v4342_v0 }
  0xa8   : > { %3694 = vmatprep.mubr.msk.bf16.mxu0 %vm4343_vm0, %v4342_v0  ;;  %3714 = vmatprep.mubr.msk.bf16.mxu1 %vm4343_vm0, %v4342_v0 }
  0xaa   : > { %3681 = vmatpush3.bf16.msra.mxu0 %v4122_v63  ;;  %3701 = vmatpush3.bf16.msra.mxu1 %v4123_v1 }
  0xab   : > { %3682 = vmatprep.subr.bf16.mxu0 %v4342_v0  ;;  %3702 = vmatprep.subr.bf16.mxu1 %v4342_v0 }
  0xae   : > { %3683 = vmatpush3.bf16.msra.mxu0 %v4124_v2  ;;  %3703 = vmatpush3.bf16.msra.mxu1 %v4125_v3 }
  0xaf   : > { %3684 = vmatprep.subr.bf16.mxu0 %v4342_v0  ;;  %3704 = vmatprep.subr.bf16.mxu1 %v4342_v0 }
  0xb2   : > { %3685 = vmatpush3.bf16.msra.mxu0 %v4126_v4  ;;  %3705 = vmatpush3.bf16.msra.mxu1 %v4127_v5  ;;  %v3209_v4 = vld [vmem:[%s4950_s2] ss:$0 sm:$0xff] }
  0xb3   : > { %3686 = vmatprep.subr.bf16.mxu0 %v4342_v0  ;;  %3706 = vmatprep.subr.bf16.mxu1 %v4342_v0 }
  0xb6   : > { %3687 = vmatpush3.bf16.msra.mxu0 %v4128_v6  ;;  %3707 = vmatpush3.bf16.msra.mxu1 %v4129_v7 }
  0xb7   : > { %3688 = vmatprep.subr.bf16.mxu0 %v4342_v0  ;;  %3708 = vmatprep.subr.bf16.mxu1 %v4342_v0 }
  0xba   : > { %3689 = vmatpush3.bf16.msra.mxu0 %v4130_v8  ;;  %3709 = vmatpush3.bf16.msra.mxu1 %v4131_v9 }
  0xbb   : > { %3690 = vmatprep.subr.bf16.mxu0 %v4342_v0  ;;  %3710 = vmatprep.subr.bf16.mxu1 %v4342_v0  ;;  %v1062_v0 = vpack.c.bf16 %v1061_v15, %v1061_v15 }
  0xbe   : > { %3691 = vmatpush3.bf16.msra.mxu0 %v4132_v10  ;;  %3711 = vmatpush3.bf16.msra.mxu1 %v4133_v11 }
  0xbf   : > { %3692 = vmatprep.subr.bf16.mxu0 %v4756_v16  ;;  %3712 = vmatprep.subr.bf16.mxu1 %v4756_v16 }
  0xc2   : > { %3693 = vmatpush3.bf16.msra.mxu0 %v4134_v12  ;;  %3713 = vmatpush3.bf16.msra.mxu1 %v4135_v14 }
  0xc3   : > { %3718 = vmatprep.subr.bf16.mxu0 %v4756_v16  ;;  %3738 = vmatprep.subr.bf16.mxu1 %v4756_v16 }
  0xc5   : > { %3695 = vmatmul.mubr.bf16.vlgmr.msra.gmra.mrb[12].mxu0 %v954_v17  ;;  %3715 = vmatmul.mubr.bf16.vlgmr.msra.gmra.mrb[12].mxu1 %v1062_v0  ;;  %v4153_v17 = vld [vmem:[#allocation3 + $0xc0] sm:$0xff]  }
  0xc6   : > { %3734 = vmatprep.mubr.msk.bf16.mxu0 %vm4343_vm0, %v4756_v16  ;;  %3754 = vmatprep.mubr.msk.bf16.mxu1 %vm4343_vm0, %v4756_v16 }
  0xc7   : > { %3719 = vmatpush3.bf16.msra.mxu0 %v4136_v18  ;;  %3739 = vmatpush3.bf16.msra.mxu1 %v4137_v19  ;;  %v4154_v19 = vld [vmem:[#allocation3 + $0x88] sm:$0xff]  }
  0xc8   : > { %3720 = vmatprep.subr.bf16.mxu0 %v4756_v16  ;;  %3740 = vmatprep.subr.bf16.mxu1 %v4756_v16 }
  0xcb   : > { %3721 = vmatpush3.bf16.msra.mxu0 %v4138_v20  ;;  %3741 = vmatpush3.bf16.msra.mxu1 %v4139_v21  ;;  %v4155_v20 = vld [vmem:[#allocation3 + $0xc8] sm:$0xff]   ;;  %v4156_v21 = vld [vmem:[#allocation3 + $0x90] sm:$0xff]  }
  0xcc   : > { %3722 = vmatprep.subr.bf16.mxu0 %v4756_v16  ;;  %3742 = vmatprep.subr.bf16.mxu1 %v4756_v16 }
  0xcf   : > { %3723 = vmatpush3.bf16.msra.mxu0 %v4140_v22  ;;  %3743 = vmatpush3.bf16.msra.mxu1 %v4141_v23  ;;  %v4157_v22 = vld [vmem:[#allocation3 + $0xd0] sm:$0xff]   ;;  %v4158_v23 = vld [vmem:[#allocation3 + $0x98] sm:$0xff]  }
  0xd0   : > { %3724 = vmatprep.subr.bf16.mxu0 %v4756_v16  ;;  %3744 = vmatprep.subr.bf16.mxu1 %v4756_v16 }
  0xd3   : > { %3725 = vmatpush3.bf16.msra.mxu0 %v4142_v24  ;;  %3745 = vmatpush3.bf16.msra.mxu1 %v4143_v25  ;;  %v4159_v24 = vld [vmem:[#allocation3 + $0xd8] sm:$0xff]   ;;  %v4160_v25 = vld [vmem:[#allocation3 + $0xa0] sm:$0xff]  }
  0xd4   : > { %3726 = vmatprep.subr.bf16.mxu0 %v4756_v16  ;;  %3746 = vmatprep.subr.bf16.mxu1 %v4756_v16 }
  0xd7   : > { %3727 = vmatpush3.bf16.msra.mxu0 %v4144_v26  ;;  %3747 = vmatpush3.bf16.msra.mxu1 %v4145_v27  ;;  %v4161_v26 = vld [vmem:[#allocation3 + $0xe0] sm:$0xff]   ;;  %v4162_v27 = vld [vmem:[#allocation3 + $0xa8] sm:$0xff]  }
  0xd8   : > { %3728 = vmatprep.subr.bf16.mxu0 %v4756_v16  ;;  %3748 = vmatprep.subr.bf16.mxu1 %v4756_v16 }
  0xdb   : > { %3729 = vmatpush3.bf16.msra.mxu0 %v4146_v28  ;;  %3749 = vmatpush3.bf16.msra.mxu1 %v4147_v29  ;;  %v4163_v28 = vld [vmem:[#allocation3 + $0xe8] sm:$0xff]   ;;  %v4164_v29 = vld [vmem:[#allocation3 + $0xb0] sm:$0xff]  }
  0xdc   : > { %3730 = vmatprep.subr.bf16.mxu0 %v4756_v16  ;;  %3750 = vmatprep.subr.bf16.mxu1 %v4756_v16 }
  0xdf   : > { %3731 = vmatpush3.bf16.msra.mxu0 %v4148_v30  ;;  %3751 = vmatpush3.bf16.msra.mxu1 %v4149_v31  ;;  %v4165_v30 = vld [vmem:[#allocation3 + $0xf0] sm:$0xff]   ;;  %v4166_v31 = vld [vmem:[#allocation3 + $0xb8] sm:$0xff]  }
  0xe0   : > { %3732 = vmatprep.subr.bf16.mxu0 %v4756_v16  ;;  %3752 = vmatprep.subr.bf16.mxu1 %v4756_v16 }
  0xe3   : > { %3733 = vmatpush3.bf16.msra.mxu0 %v4150_v32  ;;  %3753 = vmatpush3.bf16.msra.mxu1 %v4151_v33  ;;  %v4167_v32 = vld [vmem:[#allocation3 + $0xf8] sm:$0xff]  }
  0xe4   : > { %3758 = vmatprep.subr.bf16.mxu0 %v4756_v16  ;;  %3778 = vmatprep.subr.bf16.mxu1 %v4756_v16 }
 0x138   : > { %v427_v34 = vpop.f32.mrb[0].mxu0  ;;  %v515_v35 = vpop.f32.mrb[0].mxu1 }
 0x139   : > { %v3576_v36 = vpop.f32.mrb[1].mxu0  ;;  %v516_v37 = vadd.f32 %v515_v35, %v427_v34  ;;  %v3596_v38 = vpop.f32.mrb[1].mxu1  ;;  %v4168_v34 = vld [vmem:[#allocation3 + $0x100] sm:$0xff]  }
 0x13a   : > { %v430_v39 = vpop.f32.mrb[2].mxu0  ;;  %v518_v40 = vpop.f32.mrb[2].mxu1  ;;  %v4169_v35 = vld [vmem:[#allocation3 + $0x140] sm:$0xff]   ;;  %v4170_v38 = vld [vmem:[#allocation3 + $0x108] sm:$0xff]  }
 0x13b   : > { %v3577_v41 = vpop.f32.mrb[3].mxu0  ;;  %v3597_v42 = vpop.f32.mrb[3].mxu1  ;;  %v4171_v39 = vld [vmem:[#allocation3 + $0x148] sm:$0xff]   ;;  %v4172_v40 = vld [vmem:[#allocation3 + $0x110] sm:$0xff]  }
 0x13c   : > { %v4173_v41 = vld [vmem:[#allocation3 + $0x150] sm:$0xff]   ;;  %v4174_v42 = vld [vmem:[#allocation3 + $0x118] sm:$0xff]  }
 0x158   : > { %v622_v43 = vpop.f32.mrb[4].mxu0  ;;  %v730_v45 = vpop.f32.mrb[4].mxu1 }
 0x159   : > { %v628_v44 = vadd.f32 %v622_v43, %v516_v37  ;;  %v3616_v46 = vpop.f32.mrb[5].mxu0  ;;  %v3636_v47 = vpop.f32.mrb[5].mxu1  ;;  %v4175_v43 = vld [vmem:[#allocation3 + $0x158] sm:$0xff]  }
 0x15a   : > { %v625_v48 = vpop.f32.mrb[6].mxu0  ;;  %v733_v50 = vpop.f32.mrb[6].mxu1  ;;  %v4178_v46 = vld [vmem:[#allocation3 + $0x128] sm:$0xff]  }
 0x15b   : > { %v736_v49 = vadd.f32 %v730_v45, %v628_v44  ;;  %v3617_v51 = vpop.f32.mrb[7].mxu0  ;;  %v3637_v52 = vpop.f32.mrb[7].mxu1  ;;  %v4176_v44 = vld [vmem:[#allocation3 + $0x120] sm:$0xff]   ;;  %v4179_v47 = vld [vmem:[#allocation3 + $0x168] sm:$0xff]   ;;  %v4180_v48 = vld [vmem:[#allocation3 + $0x130] sm:$0xff]  }
 0x15c   : > { %v4177_v45 = vld [vmem:[#allocation3 + $0x160] sm:$0xff]   ;;  %v4182_v50 = vld [vmem:[#allocation3 + $0x138] sm:$0xff]  }
 0x15d   : > { %v4183_v51 = vld [vmem:[#allocation3 + $0x178] sm:$0xff]  }
 0x178   : > { %v838_v53 = vpop.f32.mrb[8].mxu0  ;;  %v946_v55 = vpop.f32.mrb[8].mxu1 }
 0x179   : > { %v844_v54 = vadd.f32 %v838_v53, %v736_v49  ;;  %v3656_v56 = vpop.f32.mrb[9].mxu0  ;;  %v3676_v57 = vpop.f32.mrb[9].mxu1  ;;  %v4181_v49 = vld [vmem:[#allocation3 + $0x170] sm:$0xff]  }
 0x17a   : > { %v841_v58 = vpop.f32.mrb[10].mxu0  ;;  %v949_v60 = vpop.f32.mrb[10].mxu1 }
 0x17b   : > { %v952_v59 = vadd.f32 %v946_v55, %v844_v54  ;;  %v3657_v61 = vpop.f32.mrb[11].mxu0  ;;  %v3677_v62 = vpop.f32.mrb[11].mxu1  ;;  %v4184_v54 = vld [vmem:[#allocation3 + $0x180] sm:$0xff]   ;;  %v4186_v58 = vld [vmem:[#allocation3 + $0x188] sm:$0xff]   ;;  %v4188_v60 = vld [vmem:[#allocation3 + $0x190] sm:$0xff]  }
 0x17c   : > { %v4185_v55 = vld [vmem:[#allocation3 + $0x1c0] sm:$0xff]   ;;  %v4189_v61 = vld [vmem:[#allocation3 + $0x1d0] sm:$0xff]   ;;  %v4190_v62 = vld [vmem:[#allocation3 + $0x198] sm:$0xff]  }
 0x198   : > { %v1054_v63 = vpop.f32.mrb[12].mxu0  ;;  %v1162_v2 = vpop.f32.mrb[12].mxu1 }
 0x199   : > { %v1060_v1 = vadd.f32 %v1054_v63, %v952_v59  ;;  %v3696_v3 = vpop.f32.mrb[13].mxu0  ;;  %v3716_v5 = vpop.f32.mrb[13].mxu1  ;;  %v4187_v59 = vld [vmem:[#allocation3 + $0x1c8] sm:$0xff]   ;;  %v4191_v63 = vld [vmem:[#allocation3 + $0x1d8] sm:$0xff]  }
 0x19a   : > { %v1057_v6 = vpop.f32.mrb[14].mxu0  ;;  %v1165_v8 = vpop.f32.mrb[14].mxu1  ;;  %v4194_v3 = vld [vmem:[#allocation3 + $0x1a8] sm:$0xff]   ;;  %v4196_v5 = vld [vmem:[#allocation3 + $0x1b0] sm:$0xff]  }
 0x19b   : > { %v1168_v7 = vadd.f32 %v1162_v2, %v1060_v1  ;;  %v3697_v9 = vpop.f32.mrb[15].mxu0  ;;  %v3717_v10 = vpop.f32.mrb[15].mxu1  ;;  %v4192_v1 = vld [vmem:[#allocation3 + $0x1a0] sm:$0xff]   ;;  %v4197_v6 = vld [vmem:[#allocation3 + $0x1f0] sm:$0xff]   ;;  %v4199_v8 = vld [vmem:[#allocation3 + $0x1f8] sm:$0xff]  }
 0x19c   : > { %v4193_v2 = vld [vmem:[#allocation3 + $0x1e0] sm:$0xff]  }
 0x19d   : > { %v1176_v11 = vadd.f32 %v3209_v4, %v1168_v7  ;;  %v4195_v4 = vld [vmem:[#allocation3 + $0x1e8] sm:$0xff]   ;;  %v4198_v7 = vld [vmem:[#allocation3 + $0x1b8] sm:$0xff]  }
 0x19f   : > { %v4785_v12 = vmax.f32 %v1176_v11, 0.0 }
 0x1a1   : > { %1181 = vst [vmem:[#allocation2 + $0x8] sm:$0xff] %v4785_v12  ;;  %v1504_v37 = vpack.c.bf16 %v4785_v12, %v4785_v12 }
 0x1a8   : > { %v1200_v14 = vld [vmem:[#allocation2 + $0x6] sm:$0xff] }
 0x1a9   : > { %v1182_v15 = vld [vmem:[#allocation2 + $0x5] sm:$0xff]  ;;  %v1201_v0 = vpack.c.bf16 %v1200_v14, %v1200_v14  ;;  %v4201_v14 = vld [vmem:[#allocation5] sm:$0xff]  }
 0x1aa   : > { %v1183_v18 = vpack.c.bf16 %v1182_v15, %v1182_v15  ;;  %v1395_v33 = vld [vmem:[#allocation2 + $0x7] sm:$0xff] }
 0x1ab   : > { %3735 = vmatmul.mubr.bf16.vlgmr.msra.gmra.mrb[16].mxu0 %v1201_v0  ;;  %v1396_v36 = vpack.c.bf16 %v1395_v33, %v1395_v33  ;;  %v1611_v52 = vld [vmem:[#allocation2 + $0x9] sm:$0xff]  ;;  %v4202_v15 = vld [vmem:[#allocation5 + $0x48] sm:$0xff]  }
 0x1ac   : > { %3755 = vmatmul.mubr.bf16.vlgmr.msra.gmra.mrb[16].mxu1 %v1183_v18  ;;  %3759 = vmatpush3.bf16.msra.mxu0 %v4152_v13  ;;  %v1719_v53 = vld [vmem:[#allocation2 + $0xa] sm:$0xff]  ;;  %v1612_v56 = vpack.c.bf16 %v1611_v52, %v1611_v52  ;;  %v4200_v13 = vld [vmem:[#allocation5 + $0x40] sm:$0xff]  }
 0x1ad   : > { %3779 = vmatpush3.bf16.msra.mxu1 %v4153_v17  ;;  %3760 = vmatprep.subr.bf16.mxu0 %v4756_v16  ;;  %v1720_v57 = vpack.c.bf16 %v1719_v53, %v1719_v53  ;;  %v1827_v9 = vld [vmem:[#allocation2 + $0xb] sm:$0xff]  ;;  %v4203_v17 = vld [vmem:[#allocation5 + $0x8] sm:$0xff]  }
 0x1ae   : > { %3780 = vmatprep.subr.bf16.mxu1 %v4756_v16  ;;  %3774 = vmatprep.mubr.msk.bf16.mxu0 %vm4343_vm0, %v4756_v16  ;;  %v1935_v10 = vld [vmem:[#allocation2 + $0xc] sm:$0xff]  ;;  %v1828_v11 = vpack.c.bf16 %v1827_v9, %v1827_v9 }
 0x1af   : > { %3794 = vmatprep.mubr.msk.bf16.mxu1 %vm4343_vm0, %v4756_v16  ;;  %v1936_v12 = vpack.c.bf16 %v1935_v10, %v1935_v10  ;;  %v4204_v0 = vld [vmem:[#allocation5 + $0x50] sm:$0xff]  }
 0x1b0   : > { %3761 = vmatpush3.bf16.msra.mxu0 %v4154_v19  ;;  %v4205_v18 = vld [vmem:[#allocation5 + $0x10] sm:$0xff]   ;;  %v4206_v19 = vld [vmem:[#allocation5 + $0x58] sm:$0xff]  }
 0x1b1   : > { %3781 = vmatpush3.bf16.msra.mxu1 %v4155_v20  ;;  %3762 = vmatprep.subr.bf16.mxu0 %v4756_v16  ;;  %v4207_v20 = vld [vmem:[#allocation5 + $0x18] sm:$0xff]  }
 0x1b2   : > { %3782 = vmatprep.subr.bf16.mxu1 %v4756_v16 }
 0x1b4   : > { %3763 = vmatpush3.bf16.msra.mxu0 %v4156_v21  ;;  %v4208_v21 = vld [vmem:[#allocation5 + $0x60] sm:$0xff]  }
 0x1b5   : > { %3783 = vmatpush3.bf16.msra.mxu1 %v4157_v22  ;;  %3764 = vmatprep.subr.bf16.mxu0 %v4756_v16  ;;  %v4209_v22 = vld [vmem:[#allocation5 + $0x20] sm:$0xff]  }
 0x1b6   : > { %3784 = vmatprep.subr.bf16.mxu1 %v4756_v16 }
 0x1b8   : > { %3765 = vmatpush3.bf16.msra.mxu0 %v4158_v23  ;;  %v4210_v23 = vld [vmem:[#allocation5 + $0x68] sm:$0xff]  }
 0x1b9   : > { %3785 = vmatpush3.bf16.msra.mxu1 %v4159_v24  ;;  %3766 = vmatprep.subr.bf16.mxu0 %v4756_v16  ;;  %v4211_v24 = vld [vmem:[#allocation5 + $0x28] sm:$0xff]  }
 0x1ba   : > { %3786 = vmatprep.subr.bf16.mxu1 %v4756_v16 }
 0x1bc   : > { %3767 = vmatpush3.bf16.msra.mxu0 %v4160_v25  ;;  %v4212_v25 = vld [vmem:[#allocation5 + $0x70] sm:$0xff]  }
 0x1bd   : > { %3787 = vmatpush3.bf16.msra.mxu1 %v4161_v26  ;;  %3768 = vmatprep.subr.bf16.mxu0 %v4756_v16  ;;  %v4213_v26 = vld [vmem:[#allocation5 + $0x30] sm:$0xff]  }
 0x1be   : > { %3788 = vmatprep.subr.bf16.mxu1 %v4756_v16 }
 0x1c0   : > { %3769 = vmatpush3.bf16.msra.mxu0 %v4162_v27  ;;  %v4214_v27 = vld [vmem:[#allocation5 + $0x78] sm:$0xff]  }
 0x1c1   : > { %3789 = vmatpush3.bf16.msra.mxu1 %v4163_v28  ;;  %3770 = vmatprep.subr.bf16.mxu0 %v4756_v16  ;;  %v4215_v28 = vld [vmem:[#allocation5 + $0x38] sm:$0xff]  }
 0x1c2   : > { %3790 = vmatprep.subr.bf16.mxu1 %v4756_v16 }
 0x1c4   : > { %3771 = vmatpush3.bf16.msra.mxu0 %v4164_v29 }
 0x1c5   : > { %3791 = vmatpush3.bf16.msra.mxu1 %v4165_v30  ;;  %3772 = vmatprep.subr.bf16.mxu0 %v4756_v16 }
 0x1c6   : > { %3792 = vmatprep.subr.bf16.mxu1 %v4756_v16 }
 0x1c8   : > { %3773 = vmatpush3.bf16.msra.mxu0 %v4166_v31 }
 0x1c9   : > { %3793 = vmatpush3.bf16.msra.mxu1 %v4167_v32  ;;  %3798 = vmatprep.subr.bf16.mxu0 %v4756_v16 }
 0x1ca   : > { %3818 = vmatprep.subr.bf16.mxu1 %v4756_v16 }
 0x1cb   : > { %3775 = vmatmul.mubr.bf16.vlgmr.msra.gmra.mrb[20].mxu0 %v1396_v36 }
 0x1cc   : > { %3795 = vmatmul.mubr.bf16.vlgmr.msra.gmra.mrb[20].mxu1 %v1504_v37  ;;  %3799 = vmatpush3.bf16.msra.mxu0 %v4168_v34 }
 0x1cd   : > { %3819 = vmatpush3.bf16.msra.mxu1 %v4169_v35  ;;  %3800 = vmatprep.subr.bf16.mxu0 %v4756_v16 }
 0x1ce   : > { %3820 = vmatprep.subr.bf16.mxu1 %v4756_v16  ;;  %3814 = vmatprep.mubr.msk.bf16.mxu0 %vm4343_vm0, %v4756_v16 }
 0x1cf   : > { %3834 = vmatprep.mubr.msk.bf16.mxu1 %vm4343_vm0, %v4756_v16 }
 0x1d0   : > { %3801 = vmatpush3.bf16.msra.mxu0 %v4170_v38 }
 0x1d1   : > { %3821 = vmatpush3.bf16.msra.mxu1 %v4171_v39  ;;  %3802 = vmatprep.subr.bf16.mxu0 %v4756_v16 }
 0x1d2   : > { %3822 = vmatprep.subr.bf16.mxu1 %v4756_v16 }
 0x1d4   : > { %3803 = vmatpush3.bf16.msra.mxu0 %v4172_v40 }
 0x1d5   : > { %3823 = vmatpush3.bf16.msra.mxu1 %v4173_v41  ;;  %3804 = vmatprep.subr.bf16.mxu0 %v4756_v16 }
 0x1d6   : > { %3824 = vmatprep.subr.bf16.mxu1 %v4756_v16 }
 0x1d8   : > { %3805 = vmatpush3.bf16.msra.mxu0 %v4174_v42 }
 0x1d9   : > { %3825 = vmatpush3.bf16.msra.mxu1 %v4175_v43  ;;  %3806 = vmatprep.subr.bf16.mxu0 %v4756_v16 }
 0x1da   : > { %3826 = vmatprep.subr.bf16.mxu1 %v4756_v16 }
 0x1dc   : > { %3807 = vmatpush3.bf16.msra.mxu0 %v4176_v44 }
 0x1dd   : > { %3827 = vmatpush3.bf16.msra.mxu1 %v4177_v45  ;;  %3808 = vmatprep.subr.bf16.mxu0 %v4756_v16 }
 0x1de   : > { %3828 = vmatprep.subr.bf16.mxu1 %v4756_v16 }
 0x1e0   : > { %3809 = vmatpush3.bf16.msra.mxu0 %v4178_v46 }
 0x1e1   : > { %3829 = vmatpush3.bf16.msra.mxu1 %v4179_v47  ;;  %3810 = vmatprep.subr.bf16.mxu0 %v4756_v16 }
 0x1e2   : > { %3830 = vmatprep.subr.bf16.mxu1 %v4756_v16 }
 0x1e4   : > { %3811 = vmatpush3.bf16.msra.mxu0 %v4180_v48 }
 0x1e5   : > { %3831 = vmatpush3.bf16.msra.mxu1 %v4181_v49  ;;  %3812 = vmatprep.subr.bf16.mxu0 %v4756_v16 }
 0x1e6   : > { %3832 = vmatprep.subr.bf16.mxu1 %v4756_v16 }
 0x1e8   : > { %3813 = vmatpush3.bf16.msra.mxu0 %v4182_v50 }
 0x1e9   : > { %3833 = vmatpush3.bf16.msra.mxu1 %v4183_v51  ;;  %3838 = vmatprep.subr.bf16.mxu0 %v4756_v16 }
 0x1ea   : > { %3858 = vmatprep.subr.bf16.mxu1 %v4756_v16 }
 0x1eb   : > { %3815 = vmatmul.mubr.bf16.vlgmr.msra.gmra.mrb[24].mxu0 %v1612_v56 }
 0x1ec   : > { %3835 = vmatmul.mubr.bf16.vlgmr.msra.gmra.mrb[24].mxu1 %v1720_v57  ;;  %3839 = vmatpush3.bf16.msra.mxu0 %v4184_v54 }
 0x1ed   : > { %3859 = vmatpush3.bf16.msra.mxu1 %v4185_v55  ;;  %3840 = vmatprep.subr.bf16.mxu0 %v4756_v16 }
 0x1ee   : > { %3860 = vmatprep.subr.bf16.mxu1 %v4756_v16  ;;  %3854 = vmatprep.mubr.msk.bf16.mxu0 %vm4343_vm0, %v4756_v16 }
 0x1ef   : > { %3874 = vmatprep.mubr.msk.bf16.mxu1 %vm4343_vm0, %v4756_v16 }
 0x1f0   : > { %3841 = vmatpush3.bf16.msra.mxu0 %v4186_v58 }
 0x1f1   : > { %3861 = vmatpush3.bf16.msra.mxu1 %v4187_v59  ;;  %3842 = vmatprep.subr.bf16.mxu0 %v4756_v16 }
 0x1f2   : > { %3862 = vmatprep.subr.bf16.mxu1 %v4756_v16 }
 0x1f4   : > { %3843 = vmatpush3.bf16.msra.mxu0 %v4188_v60 }
 0x1f5   : > { %3863 = vmatpush3.bf16.msra.mxu1 %v4189_v61  ;;  %3844 = vmatprep.subr.bf16.mxu0 %v4756_v16 }
 0x1f6   : > { %3864 = vmatprep.subr.bf16.mxu1 %v4756_v16 }
 0x1f8   : > { %3845 = vmatpush3.bf16.msra.mxu0 %v4190_v62 }
 0x1f9   : > { %3865 = vmatpush3.bf16.msra.mxu1 %v4191_v63  ;;  %3846 = vmatprep.subr.bf16.mxu0 %v4756_v16  ;;  %v3274_v63 = vld [vmem:[%s4952_s4] ss:$0 sm:$0xff] }
 0x1fa   : > { %3866 = vmatprep.subr.bf16.mxu1 %v4756_v16 }
 0x1fc   : > { %3847 = vmatpush3.bf16.msra.mxu0 %v4192_v1 }
 0x1fd   : > { %3867 = vmatpush3.bf16.msra.mxu1 %v4193_v2  ;;  %3848 = vmatprep.subr.bf16.mxu0 %v4756_v16 }
 0x1fe   : > { %3868 = vmatprep.subr.bf16.mxu1 %v4756_v16 }
 0x200   : > { %3849 = vmatpush3.bf16.msra.mxu0 %v4194_v3 }
 0x201   : > { %3869 = vmatpush3.bf16.msra.mxu1 %v4195_v4  ;;  %3850 = vmatprep.subr.bf16.mxu0 %v4756_v16 }
 0x202   : > { %3870 = vmatprep.subr.bf16.mxu1 %v4756_v16 }
 0x204   : > { %3851 = vmatpush3.bf16.msra.mxu0 %v4196_v5 }
 0x205   : > { %3871 = vmatpush3.bf16.msra.mxu1 %v4197_v6  ;;  %3852 = vmatprep.subr.bf16.mxu0 %v4756_v16 }
 0x206   : > { %3872 = vmatprep.subr.bf16.mxu1 %v4756_v16 }
 0x208   : > { %3853 = vmatpush3.bf16.msra.mxu0 %v4198_v7 }
 0x209   : > { %3873 = vmatpush3.bf16.msra.mxu1 %v4199_v8  ;;  %3878 = vmatprep.subr.bf16.mxu0 %v4756_v16  ;;  %v4216_v8 = vld [vmem:[#allocation5 + $0x80] sm:$0xff]  }
 0x20a   : > { %3898 = vmatprep.subr.bf16.mxu1 %v4756_v16 }
 0x20b   : > { %3855 = vmatmul.mubr.bf16.vlgmr.msra.gmra.mrb[28].mxu0 %v1828_v11  ;;  %v4217_v11 = vld [vmem:[#allocation5 + $0xc0] sm:$0xff]  }
 0x20c   : > { %3875 = vmatmul.mubr.bf16.vlgmr.msra.gmra.mrb[28].mxu1 %v1936_v12  ;;  %3894 = vmatprep.mubr.msk.bf16.mxu0 %vm4343_vm0, %v4756_v16 }
 0x20d   : > { %3914 = vmatprep.mubr.msk.bf16.mxu1 %vm4343_vm0, %v4756_v16  ;;  %3879 = vmatpush3.bf16.msra.mxu0 %v4200_v13 }
 0x20e   : > { %3899 = vmatpush3.bf16.msra.mxu1 %v4201_v14  ;;  %3880 = vmatprep.subr.bf16.mxu0 %v4756_v16  ;;  %v4218_v14 = vld [vmem:[#allocation5 + $0x88] sm:$0xff]  }
 0x20f   : > { %3900 = vmatprep.subr.bf16.mxu1 %v4756_v16 }
 0x211   : > { %3881 = vmatpush3.bf16.msra.mxu0 %v4202_v15  ;;  %v4219_v15 = vld [vmem:[#allocation5 + $0xc8] sm:$0xff]  }
 0x212   : > { %3901 = vmatpush3.bf16.msra.mxu1 %v4203_v17  ;;  %3882 = vmatprep.subr.bf16.mxu0 %v4756_v16  ;;  %v4220_v17 = vld [vmem:[#allocation5 + $0x90] sm:$0xff]  }
 0x213   : > { %3902 = vmatprep.subr.bf16.mxu1 %v4756_v16 }
 0x215   : > { %3883 = vmatpush3.bf16.msra.mxu0 %v4204_v0  ;;  %v4221_v0 = vld [vmem:[#allocation5 + $0xd0] sm:$0xff]  }
 0x216   : > { %3903 = vmatpush3.bf16.msra.mxu1 %v4205_v18  ;;  %3884 = vmatprep.subr.bf16.mxu0 %v4756_v16  ;;  %v4222_v18 = vld [vmem:[#allocation5 + $0x98] sm:$0xff]  }
 0x217   : > { %3904 = vmatprep.subr.bf16.mxu1 %v4756_v16 }
 0x219   : > { %3885 = vmatpush3.bf16.msra.mxu0 %v4206_v19  ;;  %v4223_v19 = vld [vmem:[#allocation5 + $0xd8] sm:$0xff]  }
 0x21a   : > { %3905 = vmatpush3.bf16.msra.mxu1 %v4207_v20  ;;  %3886 = vmatprep.subr.bf16.mxu0 %v4756_v16  ;;  %v4224_v20 = vld [vmem:[#allocation5 + $0xa0] sm:$0xff]  }
 0x21b   : > { %3906 = vmatprep.subr.bf16.mxu1 %v4756_v16 }
 0x21d   : > { %3887 = vmatpush3.bf16.msra.mxu0 %v4208_v21  ;;  %v4225_v21 = vld [vmem:[#allocation5 + $0xe0] sm:$0xff]  }
 0x21e   : > { %3907 = vmatpush3.bf16.msra.mxu1 %v4209_v22  ;;  %3888 = vmatprep.subr.bf16.mxu0 %v4756_v16  ;;  %v4226_v22 = vld [vmem:[#allocation5 + $0xa8] sm:$0xff]  }
 0x21f   : > { %3908 = vmatprep.subr.bf16.mxu1 %v4756_v16 }
 0x221   : > { %3889 = vmatpush3.bf16.msra.mxu0 %v4210_v23  ;;  %v4227_v23 = vld [vmem:[#allocation5 + $0xe8] sm:$0xff]  }
 0x222   : > { %3909 = vmatpush3.bf16.msra.mxu1 %v4211_v24  ;;  %3890 = vmatprep.subr.bf16.mxu0 %v4756_v16  ;;  %v4228_v24 = vld [vmem:[#allocation5 + $0xb0] sm:$0xff]  }
 0x223   : > { %3910 = vmatprep.subr.bf16.mxu1 %v4756_v16 }
 0x225   : > { %3891 = vmatpush3.bf16.msra.mxu0 %v4212_v25  ;;  %v4229_v25 = vld [vmem:[#allocation5 + $0xf0] sm:$0xff]  }
 0x226   : > { %3911 = vmatpush3.bf16.msra.mxu1 %v4213_v26  ;;  %3892 = vmatprep.subr.bf16.mxu0 %v4756_v16  ;;  %v4230_v26 = vld [vmem:[#allocation5 + $0xb8] sm:$0xff]  }
 0x227   : > { %3912 = vmatprep.subr.bf16.mxu1 %v4756_v16 }
 0x229   : > { %3893 = vmatpush3.bf16.msra.mxu0 %v4214_v27  ;;  %v4231_v27 = vld [vmem:[#allocation5 + $0xf8] sm:$0xff]  }
 0x22a   : > { %3913 = vmatpush3.bf16.msra.mxu1 %v4215_v28  ;;  %3918 = vmatprep.subr.bf16.mxu0 %v4756_v16 }
 0x22b   : > { %3938 = vmatprep.subr.bf16.mxu1 %v4756_v16 }
 0x27e   : > { %v1301_v29 = vpop.f32.mrb[16].mxu0 }
 0x27f   : > { %v1389_v30 = vpop.f32.mrb[16].mxu1  ;;  %v3736_v32 = vpop.f32.mrb[17].mxu0 }
 0x280   : > { %v1390_v31 = vadd.f32 %v1389_v30, %v1301_v29  ;;  %v3756_v33 = vpop.f32.mrb[17].mxu1  ;;  %v1304_v34 = vpop.f32.mrb[18].mxu0  ;;  %v4232_v29 = vld [vmem:[#allocation5 + $0x100] sm:$0xff]  }
 0x281   : > { %v1392_v35 = vpop.f32.mrb[18].mxu1  ;;  %v3737_v36 = vpop.f32.mrb[19].mxu0  ;;  %v4233_v30 = vld [vmem:[#allocation5 + $0x140] sm:$0xff]   ;;  %v4896_v33 = vld [vmem:[#allocation2] sm:$0xff] }
 0x282   : > { %v3757_v37 = vpop.f32.mrb[19].mxu1  ;;  %v4235_v34 = vld [vmem:[#allocation5 + $0x148] sm:$0xff]   ;;  %v4236_v35 = vld [vmem:[#allocation5 + $0x110] sm:$0xff]  }
 0x283   : > { %v4237_v36 = vld [vmem:[#allocation5 + $0x150] sm:$0xff]   ;;  %v4238_v37 = vld [vmem:[#allocation5 + $0x118] sm:$0xff]  }
 0x29e   : > { %v1496_v38 = vpop.f32.mrb[20].mxu0 }
 0x29f   : > { %v1604_v39 = vpop.f32.mrb[20].mxu1  ;;  %v1502_v40 = vadd.f32 %v1496_v38, %v1390_v31  ;;  %v3776_v41 = vpop.f32.mrb[21].mxu0  ;;  %v4239_v38 = vld [vmem:[#allocation5 + $0x158] sm:$0xff]  }
 0x2a0   : > { %v3796_v42 = vpop.f32.mrb[21].mxu1  ;;  %v1499_v43 = vpop.f32.mrb[22].mxu0  ;;  %v4242_v41 = vld [vmem:[#allocation5 + $0x128] sm:$0xff]  }
 0x2a1   : > { %v1607_v44 = vpop.f32.mrb[22].mxu1  ;;  %v1610_v45 = vadd.f32 %v1604_v39, %v1502_v40  ;;  %v3777_v46 = vpop.f32.mrb[23].mxu0  ;;  %v4240_v39 = vld [vmem:[#allocation5 + $0x120] sm:$0xff]   ;;  %v4243_v42 = vld [vmem:[#allocation5 + $0x168] sm:$0xff]   ;;  %v4244_v43 = vld [vmem:[#allocation5 + $0x130] sm:$0xff]  }
 0x2a2   : > { %v3797_v47 = vpop.f32.mrb[23].mxu1  ;;  %v4241_v40 = vld [vmem:[#allocation5 + $0x160] sm:$0xff]   ;;  %v4245_v44 = vld [vmem:[#allocation5 + $0x170] sm:$0xff]   ;;  %v4247_v46 = vld [vmem:[#allocation5 + $0x178] sm:$0xff]  }
 0x2be   : > { %v1712_v48 = vpop.f32.mrb[24].mxu0 }
 0x2bf   : > { %v1820_v49 = vpop.f32.mrb[24].mxu1  ;;  %v1718_v50 = vadd.f32 %v1712_v48, %v1610_v45  ;;  %v3816_v51 = vpop.f32.mrb[25].mxu0  ;;  %v4246_v45 = vld [vmem:[#allocation5 + $0x138] sm:$0xff]  }
 0x2c0   : > { %v3836_v52 = vpop.f32.mrb[25].mxu1  ;;  %v1715_v53 = vpop.f32.mrb[26].mxu0 }
 0x2c1   : > { %v1823_v54 = vpop.f32.mrb[26].mxu1  ;;  %v1826_v55 = vadd.f32 %v1820_v49, %v1718_v50  ;;  %v3817_v56 = vpop.f32.mrb[27].mxu0  ;;  %v4248_v49 = vld [vmem:[#allocation5 + $0x180] sm:$0xff]   ;;  %v4250_v53 = vld [vmem:[#allocation5 + $0x188] sm:$0xff]  }
 0x2c2   : > { %v3837_v57 = vpop.f32.mrb[27].mxu1  ;;  %v4249_v50 = vld [vmem:[#allocation5 + $0x1c0] sm:$0xff]   ;;  %v4251_v54 = vld [vmem:[#allocation5 + $0x1c8] sm:$0xff]   ;;  %v4253_v56 = vld [vmem:[#allocation5 + $0x1d0] sm:$0xff]  }
 0x2c3   : > { %v4254_v57 = vld [vmem:[#allocation5 + $0x198] sm:$0xff]  }
 0x2de   : > { %v1928_v58 = vpop.f32.mrb[28].mxu0 }
 0x2df   : > { %v2036_v59 = vpop.f32.mrb[28].mxu1  ;;  %v1934_v60 = vadd.f32 %v1928_v58, %v1826_v55  ;;  %v3856_v61 = vpop.f32.mrb[29].mxu0  ;;  %v4252_v55 = vld [vmem:[#allocation5 + $0x190] sm:$0xff]   ;;  %v4255_v58 = vld [vmem:[#allocation5 + $0x1d8] sm:$0xff]  }
 0x2e0   : > { %v3876_v62 = vpop.f32.mrb[29].mxu1  ;;  %v1931_v1 = vpop.f32.mrb[30].mxu0  ;;  %v4258_v61 = vld [vmem:[#allocation5 + $0x1a8] sm:$0xff]  }
 0x2e1   : > { %v2039_v2 = vpop.f32.mrb[30].mxu1  ;;  %v2042_v3 = vadd.f32 %v2036_v59, %v1934_v60  ;;  %v3857_v4 = vpop.f32.mrb[31].mxu0  ;;  %v4256_v59 = vld [vmem:[#allocation5 + $0x1a0] sm:$0xff]   ;;  %v4259_v62 = vld [vmem:[#allocation5 + $0x1e8] sm:$0xff]   ;;  %v4261_v1 = vld [vmem:[#allocation5 + $0x1f0] sm:$0xff]  }
 0x2e2   : > { %v3877_v5 = vpop.f32.mrb[31].mxu1  ;;  %v4257_v60 = vld [vmem:[#allocation5 + $0x1e0] sm:$0xff]   ;;  %v4262_v2 = vld [vmem:[#allocation5 + $0x1b8] sm:$0xff]  }
 0x2e3   : > { %v2050_v6 = vadd.f32 %v3274_v63, %v2042_v3  ;;  %v4260_v63 = vld [vmem:[#allocation5 + $0x1b0] sm:$0xff]   ;;  %v4263_v3 = vld [vmem:[#allocation5 + $0x1f8] sm:$0xff]  }
 0x2e5   : > { %v4873_v7 = vmax.f32 %v2050_v6, 0.0 }
 0x2e7   : > { %2052 = vst [vmem:[#allocation2 + $0x8] sm:$0xff] %v4873_v7  ;;  %v2375_v32 = vpack.c.bf16 %v4873_v7, %v4873_v7 }
 0x2ee   : > { %v2071_v9 = vld [vmem:[#allocation2 + $0x6] sm:$0xff] }
 0x2ef   : > { %v2053_v10 = vld [vmem:[#allocation2 + $0x5] sm:$0xff]  ;;  %v2072_v12 = vpack.c.bf16 %v2071_v9, %v2071_v9 }
 0x2f0   : > { %v2054_v13 = vpack.c.bf16 %v2053_v10, %v2053_v10  ;;  %v2266_v28 = vld [vmem:[#allocation2 + $0x7] sm:$0xff] }
 0x2f1   : > { %3895 = vmatmul.mubr.bf16.vlgmr.msra.gmra.mrb[32].mxu0 %v2072_v12  ;;  %v2267_v31 = vpack.c.bf16 %v2266_v28, %v2266_v28  ;;  %v2482_v47 = vld [vmem:[#allocation2 + $0x9] sm:$0xff] }
 0x2f2   : > { %3915 = vmatmul.mubr.bf16.vlgmr.msra.gmra.mrb[32].mxu1 %v2054_v13  ;;  %3919 = vmatpush3.bf16.msra.mxu0 %v4216_v8  ;;  %v2590_v48 = vld [vmem:[#allocation2 + $0xa] sm:$0xff]  ;;  %v2483_v51 = vpack.c.bf16 %v2482_v47, %v2482_v47 }
 0x2f3   : > { %3939 = vmatpush3.bf16.msra.mxu1 %v4217_v11  ;;  %3920 = vmatprep.subr.bf16.mxu0 %v4756_v16  ;;  %v2591_v52 = vpack.c.bf16 %v2590_v48, %v2590_v48  ;;  %v2698_v4 = vld [vmem:[#allocation2 + $0xb] sm:$0xff] }
 0x2f4   : > { %3940 = vmatprep.subr.bf16.mxu1 %v4756_v16  ;;  %3934 = vmatprep.mubr.msk.bf16.mxu0 %vm4343_vm0, %v4756_v16  ;;  %v2806_v5 = vld [vmem:[#allocation2 + $0xc] sm:$0xff]  ;;  %v2699_v6 = vpack.c.bf16 %v2698_v4, %v2698_v4 }
 0x2f5   : > { %3954 = vmatprep.mubr.msk.bf16.mxu1 %vm4343_vm0, %v4756_v16  ;;  %v2807_v7 = vpack.c.bf16 %v2806_v5, %v2806_v5 }
 0x2f6   : > { %3921 = vmatpush3.bf16.msra.mxu0 %v4218_v14 }
 0x2f7   : > { %3941 = vmatpush3.bf16.msra.mxu1 %v4219_v15  ;;  %3922 = vmatprep.subr.bf16.mxu0 %v4756_v16 }
 0x2f8   : > { %3942 = vmatprep.subr.bf16.mxu1 %v4756_v16 }
 0x2fa   : > { %3923 = vmatpush3.bf16.msra.mxu0 %v4220_v17 }
 0x2fb   : > { %3943 = vmatpush3.bf16.msra.mxu1 %v4221_v0  ;;  %3924 = vmatprep.subr.bf16.mxu0 %v4756_v16 }
 0x2fc   : > { %3944 = vmatprep.subr.bf16.mxu1 %v4756_v16 }
 0x2fe   : > { %3925 = vmatpush3.bf16.msra.mxu0 %v4222_v18 }
 0x2ff   : > { %3945 = vmatpush3.bf16.msra.mxu1 %v4223_v19  ;;  %3926 = vmatprep.subr.bf16.mxu0 %v4756_v16 }
 0x300   : > { %3946 = vmatprep.subr.bf16.mxu1 %v4756_v16 }
 0x302   : > { %3927 = vmatpush3.bf16.msra.mxu0 %v4224_v20 }
 0x303   : > { %3947 = vmatpush3.bf16.msra.mxu1 %v4225_v21  ;;  %3928 = vmatprep.subr.bf16.mxu0 %v4756_v16 }
 0x304   : > { %3948 = vmatprep.subr.bf16.mxu1 %v4756_v16 }
 0x306   : > { %3929 = vmatpush3.bf16.msra.mxu0 %v4226_v22 }
 0x307   : > { %3949 = vmatpush3.bf16.msra.mxu1 %v4227_v23  ;;  %3930 = vmatprep.subr.bf16.mxu0 %v4756_v16 }
 0x308   : > { %3950 = vmatprep.subr.bf16.mxu1 %v4756_v16 }
 0x30a   : > { %3931 = vmatpush3.bf16.msra.mxu0 %v4228_v24 }
 0x30b   : > { %3951 = vmatpush3.bf16.msra.mxu1 %v4229_v25  ;;  %3932 = vmatprep.subr.bf16.mxu0 %v4756_v16 }
 0x30c   : > { %3952 = vmatprep.subr.bf16.mxu1 %v4756_v16  ;;  %v4234_v16 = vld [vmem:[#allocation5 + $0x108] sm:$0xff]  }
 0x30e   : > { %3933 = vmatpush3.bf16.msra.mxu0 %v4230_v26 }
 0x30f   : > { %3953 = vmatpush3.bf16.msra.mxu1 %v4231_v27  ;;  %3958 = vmatprep.subr.bf16.mxu0 %v4896_v33 }
 0x310   : > { %3978 = vmatprep.subr.bf16.mxu1 %v4896_v33 }
 0x311   : > { %3935 = vmatmul.mubr.bf16.vlgmr.msra.gmra.mrb[36].mxu0 %v2267_v31 }
 0x312   : > { %3955 = vmatmul.mubr.bf16.vlgmr.msra.gmra.mrb[36].mxu1 %v2375_v32  ;;  %3959 = vmatpush3.bf16.msra.mxu0 %v4232_v29 }
 0x313   : > { %3979 = vmatpush3.bf16.msra.mxu1 %v4233_v30  ;;  %3960 = vmatprep.subr.bf16.mxu0 %v4896_v33 }
 0x314   : > { %3980 = vmatprep.subr.bf16.mxu1 %v4896_v33  ;;  %3974 = vmatprep.mubr.msk.bf16.mxu0 %vm4343_vm0, %v4896_v33 }
 0x315   : > { %3994 = vmatprep.mubr.msk.bf16.mxu1 %vm4343_vm0, %v4896_v33 }
 0x316   : > { %3961 = vmatpush3.bf16.msra.mxu0 %v4234_v16 }
 0x317   : > { %3981 = vmatpush3.bf16.msra.mxu1 %v4235_v34  ;;  %3962 = vmatprep.subr.bf16.mxu0 %v4896_v33 }
 0x318   : > { %3982 = vmatprep.subr.bf16.mxu1 %v4896_v33 }
 0x31a   : > { %3963 = vmatpush3.bf16.msra.mxu0 %v4236_v35 }
 0x31b   : > { %3983 = vmatpush3.bf16.msra.mxu1 %v4237_v36  ;;  %3964 = vmatprep.subr.bf16.mxu0 %v4896_v33 }
 0x31c   : > { %3984 = vmatprep.subr.bf16.mxu1 %v4896_v33 }
 0x31e   : > { %3965 = vmatpush3.bf16.msra.mxu0 %v4238_v37 }
 0x31f   : > { %3985 = vmatpush3.bf16.msra.mxu1 %v4239_v38  ;;  %3966 = vmatprep.subr.bf16.mxu0 %v4896_v33 }
 0x320   : > { %3986 = vmatprep.subr.bf16.mxu1 %v4896_v33 }
 0x322   : > { %3967 = vmatpush3.bf16.msra.mxu0 %v4240_v39 }
 0x323   : > { %3987 = vmatpush3.bf16.msra.mxu1 %v4241_v40  ;;  %3968 = vmatprep.subr.bf16.mxu0 %v4896_v33 }
 0x324   : > { %3988 = vmatprep.subr.bf16.mxu1 %v4896_v33 }
 0x326   : > { %3969 = vmatpush3.bf16.msra.mxu0 %v4242_v41  ;;  %v3339_v41 = vld [vmem:[%s4954_s6] ss:$0 sm:$0xff] }
 0x327   : > { %3989 = vmatpush3.bf16.msra.mxu1 %v4243_v42  ;;  %3970 = vmatprep.subr.bf16.mxu0 %v4896_v33 }
 0x328   : > { %3990 = vmatprep.subr.bf16.mxu1 %v4896_v33 }
 0x32a   : > { %3971 = vmatpush3.bf16.msra.mxu0 %v4244_v43 }
 0x32b   : > { %3991 = vmatpush3.bf16.msra.mxu1 %v4245_v44  ;;  %3972 = vmatprep.subr.bf16.mxu0 %v4896_v33 }
 0x32c   : > { %3992 = vmatprep.subr.bf16.mxu1 %v4896_v33 }
 0x32e   : > { %3973 = vmatpush3.bf16.msra.mxu0 %v4246_v45 }
 0x32f   : > { %3993 = vmatpush3.bf16.msra.mxu1 %v4247_v46  ;;  %3998 = vmatprep.subr.bf16.mxu0 %v4896_v33 }
 0x330   : > { %4018 = vmatprep.subr.bf16.mxu1 %v4896_v33 }
 0x331   : > { %3975 = vmatmul.mubr.bf16.vlgmr.msra.gmra.mrb[40].mxu0 %v2483_v51 }
 0x332   : > { %3995 = vmatmul.mubr.bf16.vlgmr.msra.gmra.mrb[40].mxu1 %v2591_v52  ;;  %3999 = vmatpush3.bf16.msra.mxu0 %v4248_v49 }
 0x333   : > { %4019 = vmatpush3.bf16.msra.mxu1 %v4249_v50  ;;  %4000 = vmatprep.subr.bf16.mxu0 %v4896_v33 }
 0x334   : > { %4020 = vmatprep.subr.bf16.mxu1 %v4896_v33  ;;  %4014 = vmatprep.mubr.msk.bf16.mxu0 %vm4343_vm0, %v4896_v33 }
 0x335   : > { %4034 = vmatprep.mubr.msk.bf16.mxu1 %vm4343_vm0, %v4896_v33 }
 0x336   : > { %4001 = vmatpush3.bf16.msra.mxu0 %v4250_v53 }
 0x337   : > { %4021 = vmatpush3.bf16.msra.mxu1 %v4251_v54  ;;  %4002 = vmatprep.subr.bf16.mxu0 %v4896_v33 }
 0x338   : > { %4022 = vmatprep.subr.bf16.mxu1 %v4896_v33 }
 0x33a   : > { %4003 = vmatpush3.bf16.msra.mxu0 %v4252_v55 }
 0x33b   : > { %4023 = vmatpush3.bf16.msra.mxu1 %v4253_v56  ;;  %4004 = vmatprep.subr.bf16.mxu0 %v4896_v33 }
 0x33c   : > { %4024 = vmatprep.subr.bf16.mxu1 %v4896_v33 }
 0x33e   : > { %4005 = vmatpush3.bf16.msra.mxu0 %v4254_v57 }
 0x33f   : > { %4025 = vmatpush3.bf16.msra.mxu1 %v4255_v58  ;;  %4006 = vmatprep.subr.bf16.mxu0 %v4896_v33 }
 0x340   : > { %4026 = vmatprep.subr.bf16.mxu1 %v4896_v33 }
 0x342   : > { %4007 = vmatpush3.bf16.msra.mxu0 %v4256_v59 }
 0x343   : > { %4027 = vmatpush3.bf16.msra.mxu1 %v4257_v60  ;;  %4008 = vmatprep.subr.bf16.mxu0 %v4896_v33 }
 0x344   : > { %4028 = vmatprep.subr.bf16.mxu1 %v4896_v33 }
 0x346   : > { %4009 = vmatpush3.bf16.msra.mxu0 %v4258_v61 }
 0x347   : > { %4029 = vmatpush3.bf16.msra.mxu1 %v4259_v62  ;;  %4010 = vmatprep.subr.bf16.mxu0 %v4896_v33 }
 0x348   : > { %4030 = vmatprep.subr.bf16.mxu1 %v4896_v33 }
 0x34a   : > { %4011 = vmatpush3.bf16.msra.mxu0 %v4260_v63 }
 0x34b   : > { %4031 = vmatpush3.bf16.msra.mxu1 %v4261_v1  ;;  %4012 = vmatprep.subr.bf16.mxu0 %v4896_v33 }
 0x34c   : > { %4032 = vmatprep.subr.bf16.mxu1 %v4896_v33 }
 0x34e   : > { %4013 = vmatpush3.bf16.msra.mxu0 %v4262_v2 }
 0x34f   : > { %4033 = vmatpush3.bf16.msra.mxu1 %v4263_v3 }
 0x351   : > { %4015 = vmatmul.mubr.bf16.vlgmr.msra.gmra.mrb[44].mxu0 %v2699_v6 }
 0x352   : > { %4035 = vmatmul.mubr.bf16.vlgmr.msra.gmra.mrb[44].mxu1 %v2807_v7 }
 0x3c4   : > { %v2172_v8 = vpop.f32.mrb[32].mxu0 }
 0x3c5   : > { %v2260_v9 = vpop.f32.mrb[32].mxu1  ;;  %v3896_v11 = vpop.f32.mrb[33].mxu0 }
 0x3c6   : > { %v2261_v10 = vadd.f32 %v2260_v9, %v2172_v8  ;;  %v3916_v12 = vpop.f32.mrb[33].mxu1  ;;  %v2175_v13 = vpop.f32.mrb[34].mxu0 }
 0x3c7   : > { %v2263_v14 = vpop.f32.mrb[34].mxu1  ;;  %v3897_v15 = vpop.f32.mrb[35].mxu0 }
 0x3c8   : > { %v3917_v17 = vpop.f32.mrb[35].mxu1 }
 0x3e4   : > { %v2367_v0 = vpop.f32.mrb[36].mxu0 }
 0x3e5   : > { %v2475_v18 = vpop.f32.mrb[36].mxu1  ;;  %v2373_v19 = vadd.f32 %v2367_v0, %v2261_v10  ;;  %v3936_v20 = vpop.f32.mrb[37].mxu0 }
 0x3e6   : > { %v3956_v21 = vpop.f32.mrb[37].mxu1  ;;  %v2370_v22 = vpop.f32.mrb[38].mxu0 }
 0x3e7   : > { %v2478_v23 = vpop.f32.mrb[38].mxu1  ;;  %v2481_v24 = vadd.f32 %v2475_v18, %v2373_v19  ;;  %v3937_v25 = vpop.f32.mrb[39].mxu0 }
 0x3e8   : > { %v3957_v26 = vpop.f32.mrb[39].mxu1 }
 0x404   : > { %v2583_v27 = vpop.f32.mrb[40].mxu0 }
 0x405   : > { %v2691_v28 = vpop.f32.mrb[40].mxu1  ;;  %v2589_v29 = vadd.f32 %v2583_v27, %v2481_v24  ;;  %v3976_v30 = vpop.f32.mrb[41].mxu0 }
 0x406   : > { %v3996_v31 = vpop.f32.mrb[41].mxu1  ;;  %v2586_v32 = vpop.f32.mrb[42].mxu0 }
 0x407   : > { %v2694_v33 = vpop.f32.mrb[42].mxu1  ;;  %v2697_v16 = vadd.f32 %v2691_v28, %v2589_v29  ;;  %v3977_v34 = vpop.f32.mrb[43].mxu0 }
 0x408   : > { %v3997_v35 = vpop.f32.mrb[43].mxu1 }
 0x424   : > { %v2799_v36 = vpop.f32.mrb[44].mxu0 }
 0x425   : > { %v2907_v37 = vpop.f32.mrb[44].mxu1  ;;  %v2805_v38 = vadd.f32 %v2799_v36, %v2697_v16  ;;  %v4016_v39 = vpop.f32.mrb[45].mxu0 }
 0x426   : > { %v4036_v40 = vpop.f32.mrb[45].mxu1  ;;  %v2802_v42 = vpop.f32.mrb[46].mxu0 }
 0x427   : > { %v2910_v43 = vpop.f32.mrb[46].mxu1  ;;  %v2913_v44 = vadd.f32 %v2907_v37, %v2805_v38  ;;  %v4017_v45 = vpop.f32.mrb[47].mxu0 }
 0x428   : > { %v4037_v46 = vpop.f32.mrb[47].mxu1 }
 0x429   : > { %v2921_v47 = vadd.f32 %v3339_v41, %v2913_v44 }
 0x42b   : > { %v2922_v48 = vmax.f32 %v2921_v47, 0.0 }
 0x42d   : > { %v2924_v49 = vcombine.high %v2922_v48, %v2922_v48  ;;  %v2927_v50 = vsel %vm2926_vm1, %v2922_v48, -inf }
 0x42e   : > { %v2928_v51 = vrot.slane %v2927_v50, 4 }
 0x42f   : > { %v2934_v52 = vsel %vm2926_vm1, %v2924_v49, -inf }
 0x430   : > { %v2929_v53 = vmax.f32 %v2927_v50, %v2928_v51  ;;  %v2935_v54 = vrot.slane %v2934_v52, 4 }
 0x432   : > { %v2930_v55 = vrot.slane %v2929_v53, 2  ;;  %v2936_v56 = vmax.f32 %v2934_v52, %v2935_v54 }
 0x434   : > { %v2931_v57 = vmax.f32 %v2929_v53, %v2930_v55  ;;  %v2937_v58 = vrot.slane %v2936_v56, 2 }
 0x436   : > { %v2932_v59 = vrot.slane %v2931_v57, 1  ;;  %v2938_v60 = vmax.f32 %v2936_v56, %v2937_v58 }
 0x438   : > { %v2939_v61 = vrot.slane %v2938_v60, 1  ;;  %v2933_v62 = vmax.f32 %v2931_v57, %v2932_v59 }
 0x43a   : > { %v2940_v63 = vmax.f32 %v2938_v60, %v2939_v61 }
 0x43c   : > { %v2944_v1 = vsel %vm2943_vm2, %v2940_v63, %v2933_v62 }
 0x43d   : > { %2946 = vst [vmem:[%s306_s11] sm:$0x3] %v2944_v1 }
 0x43e PF: > { %s19_s24 = sadd.s32 1, %s4336_s24  }
 0x43f   : > { %p16_p9 = scmp.ge.s32.totalorder %s19_s24, 4  }
 0x441   :  { %18 = sbr.rel (!%p16_p9) target bundleno = 2 (0x2), region = 108 }
 0x448   :  { %2966 = vsyncpa [#allocation4], 1 }
 0x449   :  { %2968 = vsyncpa [#allocation4 + $0x1], 1 }
 0x44a   :  { %2969 = vsyncpa [#allocation6], 1 }

</bundles_post_ra>
